<compile_context>
chip_gen: v6e
topology: v6e:2x2x1
jax: 0.10.0
libtpu: 0.0.40
codegen_flags: <defaults>
</compile_context>

<pallas_src>
import functools

import jax
import jax.numpy as jnp
from jax import lax
from jax.experimental import pallas as pl
from jax.experimental.pallas import tpu as pltpu


def _vmem_limit_bytes(working_set_bytes):
    """Scoped-VMEM request: actual working set x2 (compiler temps / spills)
    plus fixed headroom, clamped to [8 MiB, 32 MiB]."""
    need = 2 * int(working_set_bytes) + 2 * 1024 * 1024
    return int(min(32 * 1024 * 1024, max(8 * 1024 * 1024, need)))


# ---------------------------------------------------------------------------
# Kernel 1: fused stride-2 ConvTranspose2d + BatchNorm(train) + optional PReLU,
#           phase-decomposed (sub-pixel), per-tap MXU accumulation (no im2col).
# ---------------------------------------------------------------------------
def _deconv_bn_kernel(starts_phase, n, h, w, cin, cout, eps, prelu,
                      x_ref, w0_ref, w1_ref, w2_ref, w3_ref,
                      g_ref, b_ref, *rest):
    """x_ref : (n, h+pad, w+pad, cin) f32, spatially pre-padded input.
       wX_ref: (ntaps_X, cin, cout) bf16 per-phase tap weights, X = 2*py+px.
       out   : (4, n*h*w, cout) f32 — one contiguous slab per output phase.
       The ConvTranspose bias is intentionally absent: it cancels exactly under
       train-mode BatchNorm (the batch mean absorbs it)."""
    if prelu:
        a_ref, o_ref = rest
    else:
        (o_ref,) = rest
        a_ref = None
    m = n * h * w
    w_refs = (w0_ref, w1_ref, w2_ref, w3_ref)
    inv_count = 1.0 / float(4 * m)

    # Hoist loop-invariant parameter reads out of the unrolled loops.
    gamma = g_ref[...]                       # (1, cout)
    beta = b_ref[...]                        # (1, cout)
    alpha = a_ref[...] if prelu else None    # (1, 1)

    s = jnp.zeros((1, cout), jnp.float32)
    ss = jnp.zeros((1, cout), jnp.float32)
    for p in range(4):                       # static unroll: 2x2 output phases
        starts = starts_phase[p]
        z = jnp.zeros((m, cout), jnp.float32)
        for j, (sy, sx) in enumerate(starts):
            # Per-tap accumulation straight from a shifted view of the padded
            # input: no im2col patch scratch, no patch vst/vld round-trip.
            tile = x_ref[:, sy:sy + h, sx:sx + w, :].astype(jnp.bfloat16)
            z = z + jnp.dot(tile.reshape(m, cin), w_refs[p][j],
                            preferred_element_type=jnp.float32)
        o_ref[p] = z                         # stash raw conv output
        s = s + jnp.sum(z, axis=0, keepdims=True)
        ss = ss + jnp.sum(z * z, axis=0, keepdims=True)

    mean = s * inv_count
    var = jnp.maximum(ss * inv_count - mean * mean, 0.0)   # biased batch var
    scale = gamma * lax.rsqrt(var + eps)
    shift = beta - mean * scale
    for p in range(4):
        y = o_ref[p] * scale + shift
        if prelu:
            y = jnp.where(y >= 0.0, y, y * alpha)
        o_ref[p] = y


def _phase_taps_1d(k, padding):
    """Stride-2 sub-pixel decomposition.  For each output phase (0/1) returns the
    list of (input offset d, kernel index) pairs such that
        out[2*o + phase] = sum_taps  W[kidx] * x[o + d]   (per spatial axis)."""
    taps = []
    for phase in range(2):
        lst = []
        for t in range(k):
            q = phase + t + padding - (k - 1)
            if q % 2 == 0:
                lst.append((q // 2, k - 1 - t))
        taps.append(lst)
    return taps


def deconv_bn_act(x, wt, bias, gamma, beta, *, k, padding, alpha=None, eps=1e-5):
    """ConvTranspose2d(stride=2, output_padding=1) + BatchNorm(train) [+ PReLU].

    x  : (N, H, W, Cin) NHWC float32
    wt : (Cin, Cout, k, k)  torch ConvTranspose2d weight layout
    returns (N, 2H, 2W, Cout) float32
    """
    # A per-channel bias applied right before train-mode BatchNorm cancels
    # exactly (the batch mean absorbs it), so it is not fed to the kernel.
    del bias
    n, h, w, cin = x.shape
    assert wt.shape[0] == cin and wt.shape[2] == k and wt.shape[3] == k
    assert 2 * padding + 2 - k == 1, "specialized to stride=2, output_padding=1"
    cout = wt.shape[1]

    taps = _phase_taps_1d(k, padding)
    offs = [d for lst in taps for (d, _) in lst]
    lo, hi = max(0, -min(offs)), max(0, max(offs))
    xp = jnp.pad(x.astype(jnp.float32), ((0, 0), (lo, hi), (lo, hi), (0, 0)))

    w_phase, starts_phase = [], []
    for py in range(2):
        for px in range(2):
            blocks, starts = [], []
            for dy, wy in taps[py]:
                for dx, wx in taps[px]:
                    blocks.append(wt[:, :, wy, wx])             # (Cin, Cout)
                    starts.append((dy + lo, dx + lo))
            w_phase.append(jnp.stack(blocks, axis=0).astype(jnp.bfloat16))
            starts_phase.append(tuple(starts))

    m = n * h * w
    prelu = alpha is not None
    args = [xp] + w_phase + [
        gamma.reshape(1, cout).astype(jnp.float32),
        beta.reshape(1, cout).astype(jnp.float32),
    ]
    if prelu:
        args.append(jnp.asarray(alpha, jnp.float32).reshape(1, 1))

    in_bytes = sum(a.size * a.dtype.itemsize for a in args)
    out_bytes = 4 * m * cout * 4
    vmem_bytes = _vmem_limit_bytes(in_bytes + out_bytes)

    kern = functools.partial(_deconv_bn_kernel, tuple(starts_phase),
                             n, h, w, cin, cout, eps, prelu)
    vmem = pl.BlockSpec(memory_space=pltpu.MemorySpace.VMEM)
    out = pl.pallas_call(
        kern,
        out_shape=jax.ShapeDtypeStruct((4, m, cout), jnp.float32),
        in_specs=[vmem] * len(args),
        out_specs=vmem,
        compiler_params=pltpu.CompilerParams(vmem_limit_bytes=vmem_bytes),
    )(*args)

    # interleave the 2x2 phases:  y[n, 2i+py, 2j+px, c] = phase[py, px][n, i, j, c]
    out = out.reshape(2, 2, n, h, w, cout)
    out = jnp.transpose(out, (2, 3, 0, 4, 1, 5)).reshape(n, 2 * h, 2 * w, cout)
    return out


# ---------------------------------------------------------------------------
# Kernel 2: whole residual tower (5 x D_ResBlock, shared weights) in one launch.
# ---------------------------------------------------------------------------
def _res_tower_kernel(n, h, w, c, eps, x_ref, w_ref, g_ref, b_ref, a_ref, o_ref,
                      pad_ref, rbin_ref, dres_ref):
    """out = (5x D_ResBlock)(x) + x, with
       D_ResBlock(x) = (ResBlock^3)(x) + x,
       ResBlock(x)   = bn(conv(prelu(bn(conv(x))))) + x  (conv/bn/prelu shared).
       w_ref is the 3x3 conv weight as (9, c, c) bf16 tap matrices.
       The running activation lives in the interior of pad_ref (borders stay
       zero from the one-time memset); convs accumulate 9 per-tap MXU matmuls
       from shifted views of pad_ref -- no im2col patch buffer."""
    m = n * h * w
    inv_m = 1.0 / float(m)

    # Hoist loop-invariant parameter reads out of the runtime loops.
    gamma = g_ref[...]                 # (1, c)
    beta = b_ref[...]                  # (1, c)
    alpha = a_ref[...]                 # (1, 1)

    pad_ref[...] = jnp.zeros_like(pad_ref)                # border stays zero
    pad_ref[:, 1:h + 1, 1:w + 1, :] = x_ref[...]

    def conv_bn(prelu, add_res):
        # zero-padded 3x3 conv: 9 per-tap bf16 matmuls accumulated in f32.
        z = jnp.zeros((m, c), jnp.float32)
        for j in range(9):
            dy, dx = j // 3, j % 3
            tile = pad_ref[:, dy:dy + h, dx:dx + w, :].astype(jnp.bfloat16)
            z = z + jnp.dot(tile.reshape(m, c), w_ref[j],
                            preferred_element_type=jnp.float32)
        # training-mode BatchNorm, single-pass stats (biased batch variance)
        s = jnp.sum(z, axis=0, keepdims=True)
        ss = jnp.sum(z * z, axis=0, keepdims=True)
        mean = s * inv_m
        var = jnp.maximum(ss * inv_m - mean * mean, 0.0)
        scale = gamma * lax.rsqrt(var + eps)
        shift = beta - mean * scale
        y = z * scale + shift
        if prelu:
            y = jnp.where(y >= 0.0, y, y * alpha)
        if add_res:
            y = y + rbin_ref[...].reshape(m, c)
        # running activation stays resident in the padded-buffer interior
        pad_ref[:, 1:h + 1, 1:w + 1, :] = y.reshape(n, h, w, c)

    @pl.loop(0, 5)
    def _d_res_block(_):
        dres_ref[...] = pad_ref[:, 1:h + 1, 1:w + 1, :]

        @pl.loop(0, 3)
        def _res_block(_):
            rbin_ref[...] = pad_ref[:, 1:h + 1, 1:w + 1, :]
            conv_bn(prelu=True, add_res=False)            # PReLU(bn(conv(x)))
            conv_bn(prelu=False, add_res=True)            # bn(conv(.)) + x

        pad_ref[:, 1:h + 1, 1:w + 1, :] = (
            pad_ref[:, 1:h + 1, 1:w + 1, :] + dres_ref[...])

    o_ref[...] = pad_ref[:, 1:h + 1, 1:w + 1, :] + x_ref[...]


def res_tower(x, w_taps, gamma, beta, alpha, eps=1e-5):
    """x: (N,H,W,128) f32; w_taps: (9,128,128) conv taps (HW-major, Cin x Cout)."""
    n, h, w, c = x.shape
    kern = functools.partial(_res_tower_kernel, n, h, w, c, eps)
    vmem = pl.BlockSpec(memory_space=pltpu.MemorySpace.VMEM)

    act_bytes = n * h * w * c * 4
    pad_bytes = n * (h + 2) * (w + 2) * c * 4
    work = 3 * act_bytes + pad_bytes + 2 * act_bytes + w_taps.size * 2
    vmem_bytes = _vmem_limit_bytes(work)

    return pl.pallas_call(
        kern,
        out_shape=jax.ShapeDtypeStruct((n, h, w, c), jnp.float32),
        in_specs=[vmem] * 5,
        out_specs=vmem,
        scratch_shapes=[
            pltpu.VMEM((n, h + 2, w + 2, c), jnp.float32),  # padded running act
            pltpu.VMEM((n, h, w, c), jnp.float32),          # ResBlock input
            pltpu.VMEM((n, h, w, c), jnp.float32),          # D_ResBlock input
        ],
        compiler_params=pltpu.CompilerParams(vmem_limit_bytes=vmem_bytes),
    )(x.astype(jnp.float32), w_taps.astype(jnp.bfloat16),
      gamma.reshape(1, c).astype(jnp.float32),
      beta.reshape(1, c).astype(jnp.float32),
      jnp.asarray(alpha, jnp.float32).reshape(1, 1))


# ---------------------------------------------------------------------------
# DeCoder forward (4 fused pallas_call launches).
# ---------------------------------------------------------------------------
def decoder_forward(x_nchw, p):
    x = jnp.transpose(x_nchw, (0, 2, 3, 1)).astype(jnp.float32)     # NCHW -> NHWC

    # deconv1 (66->128, k3 s2 p1 op1) + bn128 + PReLU, fused & phase-decomposed.
    # Pad Cin 66 -> 128 (zero channels x zero weight rows: exact) so every
    # per-tap matmul operand is 128-lane aligned.
    cin = x.shape[-1]
    cpad = (-cin) % 128
    x1 = jnp.pad(x, ((0, 0), (0, 0), (0, 0), (0, cpad)))
    w1 = jnp.pad(p["deconv1_w"], ((0, cpad), (0, 0), (0, 0), (0, 0)))
    x2 = deconv_bn_act(x1, w1, p["deconv1_b"], p["bn128_g"], p["bn128_b"],
                       k=3, padding=1, alpha=p["alpha_dec"])

    # 5 x D_ResBlock (one shared ResBlock instance) + outer residual: ONE kernel.
    w_res = jnp.transpose(p["res_conv_w"], (2, 3, 1, 0)).reshape(9, 128, 128)
    x3 = res_tower(x2, w_res, p["res_bn_g"], p["res_bn_b"], p["alpha_res"])

    # deconv2 is declared with 130 input channels but only ever sees 128; using
    # the first 128 weight rows is numerically identical to zero-padding x.
    x4 = deconv_bn_act(x3, p["deconv2_w"][:128], p["deconv2_b"],
                       p["bn64_g"], p["bn64_b"], k=5, padding=2,
                       alpha=p["alpha_dec"])

    # deconv3: declared 66 input channels, actual 64; no PReLU after bn3.
    x5 = deconv_bn_act(x4, p["deconv3_w"][:64], p["deconv3_b"],
                       p["bn3_g"], p["bn3_b"], k=5, padding=2, alpha=None)

    return jnp.transpose(x5, (0, 3, 1, 2))                          # NHWC -> NCHW


def init_params(key):
    ks = jax.random.split(key, 7)

    def nrm(k, shape, scale=0.05):
        return (jax.random.normal(k, shape, jnp.float32) * scale).astype(jnp.float32)

    p = {}
    # ConvTranspose2d weights, torch layout (Cin, Cout, kh, kw).
    p["deconv1_w"] = nrm(ks[0], (66, 128, 3, 3))
    p["deconv1_b"] = nrm(ks[1], (128,))
    p["deconv2_w"] = nrm(ks[2], (130, 64, 5, 5))
    p["deconv2_b"] = nrm(ks[3], (64,))
    p["deconv3_w"] = nrm(ks[4], (66, 3, 5, 5))
    p["deconv3_b"] = nrm(ks[5], (3,))
    # ResBlock conv, torch layout (Cout, Cin, kh, kw), bias=False.
    p["res_conv_w"] = nrm(ks[6], (128, 128, 3, 3))
    # BatchNorm affine params (torch defaults gamma=1, beta=0).
    p["res_bn_g"] = jnp.ones((128,), jnp.float32)
    p["res_bn_b"] = jnp.zeros((128,), jnp.float32)
    p["bn128_g"] = jnp.ones((128,), jnp.float32)
    p["bn128_b"] = jnp.zeros((128,), jnp.float32)
    p["bn64_g"] = jnp.ones((64,), jnp.float32)
    p["bn64_b"] = jnp.zeros((64,), jnp.float32)
    p["bn3_g"] = jnp.ones((3,), jnp.float32)
    p["bn3_b"] = jnp.zeros((3,), jnp.float32)
    # PReLU slopes (num_parameters=1, init=0.25): one in DeCoder, one in ResBlock.
    p["alpha_dec"] = jnp.array(0.25, jnp.float32)
    p["alpha_res"] = jnp.array(0.25, jnp.float32)
    return p


# ---------------------------------------------------------------------------
# Pure-JAX/XLA reference (same bf16-input / f32-accumulate matmul convention).
# ---------------------------------------------------------------------------
def _ref_bn(x, g, b, eps=1e-5):
    mean = jnp.mean(x, axis=(0, 1, 2), keepdims=True)
    var = jnp.mean(jnp.square(x - mean), axis=(0, 1, 2), keepdims=True)
    return (x - mean) * (g * lax.rsqrt(var + eps)) + b


def _ref_prelu(x, a):
    return jnp.where(x >= 0.0, x, x * a)


def _ref_conv_same(x, w_oihw):
    w = jnp.transpose(w_oihw, (2, 3, 1, 0)).astype(jnp.bfloat16)
    return lax.conv_general_dilated(
        x.astype(jnp.bfloat16), w, (1, 1), [(1, 1), (1, 1)],
        dimension_numbers=("NHWC", "HWIO", "NHWC"),
        preferred_element_type=jnp.float32)


def _ref_deconv(x, wt, b, *, stride, padding, output_padding):
    k = wt.shape[2]
    w = jnp.transpose(wt[:, :, ::-1, ::-1], (2, 3, 0, 1)).astype(jnp.bfloat16)
    lo = k - 1 - padding
    hi = lo + output_padding
    y = lax.conv_general_dilated(
        x.astype(jnp.bfloat16), w, (1, 1), [(lo, hi), (lo, hi)],
        lhs_dilation=(stride, stride),
        dimension_numbers=("NHWC", "HWIO", "NHWC"),
        preferred_element_type=jnp.float32)
    return y + b


def _ref_res_block(x, p):
    h = _ref_bn(_ref_conv_same(x, p["res_conv_w"]), p["res_bn_g"], p["res_bn_b"])
    h = _ref_prelu(h, p["alpha_res"])
    h = _ref_bn(_ref_conv_same(h, p["res_conv_w"]), p["res_bn_g"], p["res_bn_b"])
    return h + x


def decoder_forward_ref(x_nchw, p):
    x = jnp.transpose(x_nchw, (0, 2, 3, 1)).astype(jnp.float32)
    x2 = _ref_deconv(x, p["deconv1_w"], p["deconv1_b"],
                     stride=2, padding=1, output_padding=1)
    x2 = _ref_prelu(_ref_bn(x2, p["bn128_g"], p["bn128_b"]), p["alpha_dec"])
    h = x2
    for _ in range(5):
        d_in = h
        for _ in range(3):
            h = _ref_res_block(h, p)
        h = h + d_in
    x3 = h + x2
    x3 = _ref_deconv(x3, p["deconv2_w"][:128], p["deconv2_b"],
                     stride=2, padding=2, output_padding=1)
    x3 = _ref_prelu(_ref_bn(x3, p["bn64_g"], p["bn64_b"]), p["alpha_dec"])
    x3 = _ref_deconv(x3, p["deconv3_w"][:64], p["deconv3_b"],
                     stride=2, padding=2, output_padding=1)
    x3 = _ref_bn(x3, p["bn3_g"], p["bn3_b"])
    return jnp.transpose(x3, (0, 3, 1, 2))


if __name__ == "__main__":
    root = jax.random.PRNGKey(0)
    kx, kp = jax.random.split(root, 2)

    params = init_params(kp)
    # DeCoder input: NCHW, 66 channels (deconv1 in_channels), small spatial.
    x = jax.random.normal(kx, (2, 66, 8, 8), jnp.float32)

    # --- unit check: fused phase-decomposed deconv + BN + PReLU kernel -------
    # Both sides use identical bf16 inputs with f32 accumulation, so the only
    # differences are summation order / transcendental impls -> tight tolerance.
    k1, k2, k3, k4, k5 = jax.random.split(jax.random.PRNGKey(1), 5)
    xt = jax.random.normal(k1, (2, 8, 8, 64), jnp.float32)
    wt = jax.random.normal(k2, (64, 32, 5, 5), jnp.float32) * 0.05
    bt = jax.random.normal(k3, (32,), jnp.float32) * 0.1
    gt = 1.0 + 0.1 * jax.random.normal(k4, (32,), jnp.float32)
    bet = 0.1 * jax.random.normal(k5, (32,), jnp.float32)
    got = deconv_bn_act(xt, wt, bt, gt, bet, k=5, padding=2, alpha=0.25)
    want = _ref_prelu(_ref_bn(_ref_deconv(xt, wt, bt, stride=2, padding=2,
                                          output_padding=1), gt, bet),
                      jnp.float32(0.25))
    uerr = float(jnp.max(jnp.abs(got - want)))
    assert uerr < 1e-2, f"fused deconv kernel mismatch vs XLA reference: {uerr}"

    # --- full DeCoder forward (4 fused pallas_call launches) -----------------
    out = jax.block_until_ready(jax.jit(decoder_forward)(x, params))
    assert out.shape == (2, 3, 64, 64), out.shape
    assert bool(jnp.all(jnp.isfinite(out)))

    # End-to-end check against the pure-XLA reference (same bf16 convention);
    # tolerance covers accumulation-order / rsqrt-impl drift across ~32 BN layers.
    ref = jax.block_until_ready(jax.jit(decoder_forward_ref)(x, params))
    err = float(jnp.max(jnp.abs(out - ref)))
    assert err < 5e-2, f"decoder forward mismatch vs XLA reference: {err}"

    print("KERNEL_OK")
</pallas_src>

<mosaic_0001>
module attributes {stable_mosaic.version = 11 : i64} {
  func.func @_deconv_bn_kernel(%arg0: memref<2x10x10x64xf32, #tpu.memory_space<vmem>>, %arg1: memref<9x64x32xbf16, #tpu.memory_space<vmem>>, %arg2: memref<6x64x32xbf16, #tpu.memory_space<vmem>>, %arg3: memref<6x64x32xbf16, #tpu.memory_space<vmem>>, %arg4: memref<4x64x32xbf16, #tpu.memory_space<vmem>>, %arg5: memref<1x32xf32, #tpu.memory_space<vmem>>, %arg6: memref<1x32xf32, #tpu.memory_space<vmem>>, %arg7: memref<1x1xf32, #tpu.memory_space<vmem>>, %arg8: memref<4x128x32xf32, #tpu.memory_space<vmem>>) attributes {dimension_semantics = [], scalar_prefetch = 0 : i64, scratch_operands = 0 : i64, tpu.core_type = #tpu.core_type<tc>} {
    %c0 = arith.constant 0 : index
    %c0_0 = arith.constant 0 : index
    %0 = vector.load %arg5[%c0, %c0_0] : memref<1x32xf32, #tpu.memory_space<vmem>>, vector<1x32xf32>
    %c0_1 = arith.constant 0 : index
    %c0_2 = arith.constant 0 : index
    %1 = vector.load %arg6[%c0_1, %c0_2] : memref<1x32xf32, #tpu.memory_space<vmem>>, vector<1x32xf32>
    %c0_3 = arith.constant 0 : index
    %c0_4 = arith.constant 0 : index
    %2 = vector.load %arg7[%c0_3, %c0_4] : memref<1x1xf32, #tpu.memory_space<vmem>>, vector<1x1xf32>
    %cst = arith.constant 0.000000e+00 : f32
    %3 = vector.broadcast %cst : f32 to vector<1x32xf32>
    %cst_5 = arith.constant 0.000000e+00 : f32
    %4 = vector.broadcast %cst_5 : f32 to vector<1x32xf32>
    %cst_6 = arith.constant 0.000000e+00 : f32
    %5 = vector.broadcast %cst_6 : f32 to vector<128x32xf32>
    %c0_7 = arith.constant 0 : index
    %c0_8 = arith.constant 0 : index
    %c0_9 = arith.constant 0 : index
    %c0_10 = arith.constant 0 : index
    %6 = vector.load %arg0[%c0_7, %c0_8, %c0_9, %c0_10] : memref<2x10x10x64xf32, #tpu.memory_space<vmem>>, vector<2x8x8x64xf32>
    %7 = arith.truncf %6 : vector<2x8x8x64xf32> to vector<2x8x8x64xbf16>
    %8 = vector.shape_cast %7 : vector<2x8x8x64xbf16> to vector<128x64xbf16>
    %c0_11 = arith.constant 0 : index
    %c0_12 = arith.constant 0 : index
    %c0_13 = arith.constant 0 : index
    %9 = vector.load %arg1[%c0_11, %c0_12, %c0_13] : memref<9x64x32xbf16, #tpu.memory_space<vmem>>, vector<1x64x32xbf16>
    %10 = vector.shape_cast %9 : vector<1x64x32xbf16> to vector<64x32xbf16>
    %cst_14 = arith.constant dense<0.000000e+00> : vector<128x32xf32>
    %11 = tpu.matmul %8, %10, %cst_14 {dimension_numbers = #tpu.dot_dimension_numbers<[1], [0], [0], [1], [0, 0, 1, 1], [], []>} : vector<128x64xbf16>, vector<64x32xbf16>, vector<128x32xf32> -> vector<128x32xf32>
    %12 = arith.addf %5, %11 : vector<128x32xf32>
    %c0_15 = arith.constant 0 : index
    %c0_16 = arith.constant 0 : index
    %c1 = arith.constant 1 : index
    %c0_17 = arith.constant 0 : index
    %13 = vector.load %arg0[%c0_15, %c0_16, %c1, %c0_17] : memref<2x10x10x64xf32, #tpu.memory_space<vmem>>, vector<2x8x8x64xf32>
    %14 = arith.truncf %13 : vector<2x8x8x64xf32> to vector<2x8x8x64xbf16>
    %15 = vector.shape_cast %14 : vector<2x8x8x64xbf16> to vector<128x64xbf16>
    %c1_18 = arith.constant 1 : index
    %c0_19 = arith.constant 0 : index
    %c0_20 = arith.constant 0 : index
    %16 = vector.load %arg1[%c1_18, %c0_19, %c0_20] : memref<9x64x32xbf16, #tpu.memory_space<vmem>>, vector<1x64x32xbf16>
    %17 = vector.shape_cast %16 : vector<1x64x32xbf16> to vector<64x32xbf16>
    %cst_21 = arith.constant dense<0.000000e+00> : vector<128x32xf32>
    %18 = tpu.matmul %15, %17, %cst_21 {dimension_numbers = #tpu.dot_dimension_numbers<[1], [0], [0], [1], [0, 0, 1, 1], [], []>} : vector<128x64xbf16>, vector<64x32xbf16>, vector<128x32xf32> -> vector<128x32xf32>
    %19 = arith.addf %12, %18 : vector<128x32xf32>
    %c0_22 = arith.constant 0 : index
    %c0_23 = arith.constant 0 : index
    %c2 = arith.constant 2 : index
    %c0_24 = arith.constant 0 : index
    %20 = vector.load %arg0[%c0_22, %c0_23, %c2, %c0_24] : memref<2x10x10x64xf32, #tpu.memory_space<vmem>>, vector<2x8x8x64xf32>
    %21 = arith.truncf %20 : vector<2x8x8x64xf32> to vector<2x8x8x64xbf16>
    %22 = vector.shape_cast %21 : vector<2x8x8x64xbf16> to vector<128x64xbf16>
    %c2_25 = arith.constant 2 : index
    %c0_26 = arith.constant 0 : index
    %c0_27 = arith.constant 0 : index
    %23 = vector.load %arg1[%c2_25, %c0_26, %c0_27] : memref<9x64x32xbf16, #tpu.memory_space<vmem>>, vector<1x64x32xbf16>
    %24 = vector.shape_cast %23 : vector<1x64x32xbf16> to vector<64x32xbf16>
    %cst_28 = arith.constant dense<0.000000e+00> : vector<128x32xf32>
    %25 = tpu.matmul %22, %24, %cst_28 {dimension_numbers = #tpu.dot_dimension_numbers<[1], [0], [0], [1], [0, 0, 1, 1], [], []>} : vector<128x64xbf16>, vector<64x32xbf16>, vector<128x32xf32> -> vector<128x32xf32>
    %26 = arith.addf %19, %25 : vector<128x32xf32>
    %c0_29 = arith.constant 0 : index
    %c1_30 = arith.constant 1 : index
    %c0_31 = arith.constant 0 : index
    %c0_32 = arith.constant 0 : index
    %27 = vector.load %arg0[%c0_29, %c1_30, %c0_31, %c0_32] : memref<2x10x10x64xf32, #tpu.memory_space<vmem>>, vector<2x8x8x64xf32>
    %28 = arith.truncf %27 : vector<2x8x8x64xf32> to vector<2x8x8x64xbf16>
    %29 = vector.shape_cast %28 : vector<2x8x8x64xbf16> to vector<128x64xbf16>
    %c3 = arith.constant 3 : index
    %c0_33 = arith.constant 0 : index
    %c0_34 = arith.constant 0 : index
    %30 = vector.load %arg1[%c3, %c0_33, %c0_34] : memref<9x64x32xbf16, #tpu.memory_space<vmem>>, vector<1x64x32xbf16>
    %31 = vector.shape_cast %30 : vector<1x64x32xbf16> to vector<64x32xbf16>
    %cst_35 = arith.constant dense<0.000000e+00> : vector<128x32xf32>
    %32 = tpu.matmul %29, %31, %cst_35 {dimension_numbers = #tpu.dot_dimension_numbers<[1], [0], [0], [1], [0, 0, 1, 1], [], []>} : vector<128x64xbf16>, vector<64x32xbf16>, vector<128x32xf32> -> vector<128x32xf32>
    %33 = arith.addf %26, %32 : vector<128x32xf32>
    %c0_36 = arith.constant 0 : index
    %c1_37 = arith.constant 1 : index
    %c1_38 = arith.constant 1 : index
    %c0_39 = arith.constant 0 : index
    %34 = vector.load %arg0[%c0_36, %c1_37, %c1_38, %c0_39] : memref<2x10x10x64xf32, #tpu.memory_space<vmem>>, vector<2x8x8x64xf32>
    %35 = arith.truncf %34 : vector<2x8x8x64xf32> to vector<2x8x8x64xbf16>
    %36 = vector.shape_cast %35 : vector<2x8x8x64xbf16> to vector<128x64xbf16>
    %c4 = arith.constant 4 : index
    %c0_40 = arith.constant 0 : index
    %c0_41 = arith.constant 0 : index
    %37 = vector.load %arg1[%c4, %c0_40, %c0_41] : memref<9x64x32xbf16, #tpu.memory_space<vmem>>, vector<1x64x32xbf16>
    %38 = vector.shape_cast %37 : vector<1x64x32xbf16> to vector<64x32xbf16>
    %cst_42 = arith.constant dense<0.000000e+00> : vector<128x32xf32>
    %39 = tpu.matmul %36, %38, %cst_42 {dimension_numbers = #tpu.dot_dimension_numbers<[1], [0], [0], [1], [0, 0, 1, 1], [], []>} : vector<128x64xbf16>, vector<64x32xbf16>, vector<128x32xf32> -> vector<128x32xf32>
    %40 = arith.addf %33, %39 : vector<128x32xf32>
    %c0_43 = arith.constant 0 : index
    %c1_44 = arith.constant 1 : index
    %c2_45 = arith.constant 2 : index
    %c0_46 = arith.constant 0 : index
    %41 = vector.load %arg0[%c0_43, %c1_44, %c2_45, %c0_46] : memref<2x10x10x64xf32, #tpu.memory_space<vmem>>, vector<2x8x8x64xf32>
    %42 = arith.truncf %41 : vector<2x8x8x64xf32> to vector<2x8x8x64xbf16>
    %43 = vector.shape_cast %42 : vector<2x8x8x64xbf16> to vector<128x64xbf16>
    %c5 = arith.constant 5 : index
    %c0_47 = arith.constant 0 : index
    %c0_48 = arith.constant 0 : index
    %44 = vector.load %arg1[%c5, %c0_47, %c0_48] : memref<9x64x32xbf16, #tpu.memory_space<vmem>>, vector<1x64x32xbf16>
    %45 = vector.shape_cast %44 : vector<1x64x32xbf16> to vector<64x32xbf16>
    %cst_49 = arith.constant dense<0.000000e+00> : vector<128x32xf32>
    %46 = tpu.matmul %43, %45, %cst_49 {dimension_numbers = #tpu.dot_dimension_numbers<[1], [0], [0], [1], [0, 0, 1, 1], [], []>} : vector<128x64xbf16>, vector<64x32xbf16>, vector<128x32xf32> -> vector<128x32xf32>
    %47 = arith.addf %40, %46 : vector<128x32xf32>
    %c0_50 = arith.constant 0 : index
    %c2_51 = arith.constant 2 : index
    %c0_52 = arith.constant 0 : index
    %c0_53 = arith.constant 0 : index
    %48 = vector.load %arg0[%c0_50, %c2_51, %c0_52, %c0_53] : memref<2x10x10x64xf32, #tpu.memory_space<vmem>>, vector<2x8x8x64xf32>
    %49 = arith.truncf %48 : vector<2x8x8x64xf32> to vector<2x8x8x64xbf16>
    %50 = vector.shape_cast %49 : vector<2x8x8x64xbf16> to vector<128x64xbf16>
    %c6 = arith.constant 6 : index
    %c0_54 = arith.constant 0 : index
    %c0_55 = arith.constant 0 : index
    %51 = vector.load %arg1[%c6, %c0_54, %c0_55] : memref<9x64x32xbf16, #tpu.memory_space<vmem>>, vector<1x64x32xbf16>
    %52 = vector.shape_cast %51 : vector<1x64x32xbf16> to vector<64x32xbf16>
    %cst_56 = arith.constant dense<0.000000e+00> : vector<128x32xf32>
    %53 = tpu.matmul %50, %52, %cst_56 {dimension_numbers = #tpu.dot_dimension_numbers<[1], [0], [0], [1], [0, 0, 1, 1], [], []>} : vector<128x64xbf16>, vector<64x32xbf16>, vector<128x32xf32> -> vector<128x32xf32>
    %54 = arith.addf %47, %53 : vector<128x32xf32>
    %c0_57 = arith.constant 0 : index
    %c2_58 = arith.constant 2 : index
    %c1_59 = arith.constant 1 : index
    %c0_60 = arith.constant 0 : index
    %55 = vector.load %arg0[%c0_57, %c2_58, %c1_59, %c0_60] : memref<2x10x10x64xf32, #tpu.memory_space<vmem>>, vector<2x8x8x64xf32>
    %56 = arith.truncf %55 : vector<2x8x8x64xf32> to vector<2x8x8x64xbf16>
    %57 = vector.shape_cast %56 : vector<2x8x8x64xbf16> to vector<128x64xbf16>
    %c7 = arith.constant 7 : index
    %c0_61 = arith.constant 0 : index
    %c0_62 = arith.constant 0 : index
    %58 = vector.load %arg1[%c7, %c0_61, %c0_62] : memref<9x64x32xbf16, #tpu.memory_space<vmem>>, vector<1x64x32xbf16>
    %59 = vector.shape_cast %58 : vector<1x64x32xbf16> to vector<64x32xbf16>
    %cst_63 = arith.constant dense<0.000000e+00> : vector<128x32xf32>
    %60 = tpu.matmul %57, %59, %cst_63 {dimension_numbers = #tpu.dot_dimension_numbers<[1], [0], [0], [1], [0, 0, 1, 1], [], []>} : vector<128x64xbf16>, vector<64x32xbf16>, vector<128x32xf32> -> vector<128x32xf32>
    %61 = arith.addf %54, %60 : vector<128x32xf32>
    %c0_64 = arith.constant 0 : index
    %c2_65 = arith.constant 2 : index
    %c2_66 = arith.constant 2 : index
    %c0_67 = arith.constant 0 : index
    %62 = vector.load %arg0[%c0_64, %c2_65, %c2_66, %c0_67] : memref<2x10x10x64xf32, #tpu.memory_space<vmem>>, vector<2x8x8x64xf32>
    %63 = arith.truncf %62 : vector<2x8x8x64xf32> to vector<2x8x8x64xbf16>
    %64 = vector.shape_cast %63 : vector<2x8x8x64xbf16> to vector<128x64xbf16>
    %c8 = arith.constant 8 : index
    %c0_68 = arith.constant 0 : index
    %c0_69 = arith.constant 0 : index
    %65 = vector.load %arg1[%c8, %c0_68, %c0_69] : memref<9x64x32xbf16, #tpu.memory_space<vmem>>, vector<1x64x32xbf16>
    %66 = vector.shape_cast %65 : vector<1x64x32xbf16> to vector<64x32xbf16>
    %cst_70 = arith.constant dense<0.000000e+00> : vector<128x32xf32>
    %67 = tpu.matmul %64, %66, %cst_70 {dimension_numbers = #tpu.dot_dimension_numbers<[1], [0], [0], [1], [0, 0, 1, 1], [], []>} : vector<128x64xbf16>, vector<64x32xbf16>, vector<128x32xf32> -> vector<128x32xf32>
    %68 = arith.addf %61, %67 : vector<128x32xf32>
    %c0_71 = arith.constant 0 : index
    %c0_72 = arith.constant 0 : index
    %c0_73 = arith.constant 0 : index
    %69 = vector.load %arg8[%c0_71, %c0_72, %c0_73] : memref<4x128x32xf32, #tpu.memory_space<vmem>>, vector<1x128x32xf32>
    %70 = vector.shape_cast %69 : vector<1x128x32xf32> to vector<128x32xf32>
    %71 = vector.shape_cast %68 : vector<128x32xf32> to vector<1x128x32xf32>
    tpu.vector_store %arg8[%c0_71, %c0_72, %c0_73], %71 {strides = array<i32>} : memref<4x128x32xf32, #tpu.memory_space<vmem>>, vector<1x128x32xf32>,
    %cst_74 = arith.constant dense<0.000000e+00> : vector<32xf32>
    %72 = vector.multi_reduction <add>, %68, %cst_74 [0] : vector<128x32xf32> to vector<32xf32>
    %73 = vector.shape_cast %72 : vector<32xf32> to vector<1x32xf32>
    %74 = arith.addf %3, %73 : vector<1x32xf32>
    %75 = arith.mulf %68, %68 : vector<128x32xf32>
    %cst_75 = arith.constant dense<0.000000e+00> : vector<32xf32>
    %76 = vector.multi_reduction <add>, %75, %cst_75 [0] : vector<128x32xf32> to vector<32xf32>
    %77 = vector.shape_cast %76 : vector<32xf32> to vector<1x32xf32>
    %78 = arith.addf %4, %77 : vector<1x32xf32>
    %cst_76 = arith.constant 0.000000e+00 : f32
    %79 = vector.broadcast %cst_76 : f32 to vector<128x32xf32>
    %c0_77 = arith.constant 0 : index
    %c0_78 = arith.constant 0 : index
    %c1_79 = arith.constant 1 : index
    %c0_80 = arith.constant 0 : index
    %80 = vector.load %arg0[%c0_77, %c0_78, %c1_79, %c0_80] : memref<2x10x10x64xf32, #tpu.memory_space<vmem>>, vector<2x8x8x64xf32>
    %81 = arith.truncf %80 : vector<2x8x8x64xf32> to vector<2x8x8x64xbf16>
    %82 = vector.shape_cast %81 : vector<2x8x8x64xbf16> to vector<128x64xbf16>
    %c0_81 = arith.constant 0 : index
    %c0_82 = arith.constant 0 : index
    %c0_83 = arith.constant 0 : index
    %83 = vector.load %arg2[%c0_81, %c0_82, %c0_83] : memref<6x64x32xbf16, #tpu.memory_space<vmem>>, vector<1x64x32xbf16>
    %84 = vector.shape_cast %83 : vector<1x64x32xbf16> to vector<64x32xbf16>
    %cst_84 = arith.constant dense<0.000000e+00> : vector<128x32xf32>
    %85 = tpu.matmul %82, %84, %cst_84 {dimension_numbers = #tpu.dot_dimension_numbers<[1], [0], [0], [1], [0, 0, 1, 1], [], []>} : vector<128x64xbf16>, vector<64x32xbf16>, vector<128x32xf32> -> vector<128x32xf32>
    %86 = arith.addf %79, %85 : vector<128x32xf32>
    %c0_85 = arith.constant 0 : index
    %c0_86 = arith.constant 0 : index
    %c2_87 = arith.constant 2 : index
    %c0_88 = arith.constant 0 : index
    %87 = vector.load %arg0[%c0_85, %c0_86, %c2_87, %c0_88] : memref<2x10x10x64xf32, #tpu.memory_space<vmem>>, vector<2x8x8x64xf32>
    %88 = arith.truncf %87 : vector<2x8x8x64xf32> to vector<2x8x8x64xbf16>
    %89 = vector.shape_cast %88 : vector<2x8x8x64xbf16> to vector<128x64xbf16>
    %c1_89 = arith.constant 1 : index
    %c0_90 = arith.constant 0 : index
    %c0_91 = arith.constant 0 : index
    %90 = vector.load %arg2[%c1_89, %c0_90, %c0_91] : memref<6x64x32xbf16, #tpu.memory_space<vmem>>, vector<1x64x32xbf16>
    %91 = vector.shape_cast %90 : vector<1x64x32xbf16> to vector<64x32xbf16>
    %cst_92 = arith.constant dense<0.000000e+00> : vector<128x32xf32>
    %92 = tpu.matmul %89, %91, %cst_92 {dimension_numbers = #tpu.dot_dimension_numbers<[1], [0], [0], [1], [0, 0, 1, 1], [], []>} : vector<128x64xbf16>, vector<64x32xbf16>, vector<128x32xf32> -> vector<128x32xf32>
    %93 = arith.addf %86, %92 : vector<128x32xf32>
    %c0_93 = arith.constant 0 : index
    %c1_94 = arith.constant 1 : index
    %c1_95 = arith.constant 1 : index
    %c0_96 = arith.constant 0 : index
    %94 = vector.load %arg0[%c0_93, %c1_94, %c1_95, %c0_96] : memref<2x10x10x64xf32, #tpu.memory_space<vmem>>, vector<2x8x8x64xf32>
    %95 = arith.truncf %94 : vector<2x8x8x64xf32> to vector<2x8x8x64xbf16>
    %96 = vector.shape_cast %95 : vector<2x8x8x64xbf16> to vector<128x64xbf16>
    %c2_97 = arith.constant 2 : index
    %c0_98 = arith.constant 0 : index
    %c0_99 = arith.constant 0 : index
    %97 = vector.load %arg2[%c2_97, %c0_98, %c0_99] : memref<6x64x32xbf16, #tpu.memory_space<vmem>>, vector<1x64x32xbf16>
    %98 = vector.shape_cast %97 : vector<1x64x32xbf16> to vector<64x32xbf16>
    %cst_100 = arith.constant dense<0.000000e+00> : vector<128x32xf32>
    %99 = tpu.matmul %96, %98, %cst_100 {dimension_numbers = #tpu.dot_dimension_numbers<[1], [0], [0], [1], [0, 0, 1, 1], [], []>} : vector<128x64xbf16>, vector<64x32xbf16>, vector<128x32xf32> -> vector<128x32xf32>
    %100 = arith.addf %93, %99 : vector<128x32xf32>
    %c0_101 = arith.constant 0 : index
    %c1_102 = arith.constant 1 : index
    %c2_103 = arith.constant 2 : index
    %c0_104 = arith.constant 0 : index
    %101 = vector.load %arg0[%c0_101, %c1_102, %c2_103, %c0_104] : memref<2x10x10x64xf32, #tpu.memory_space<vmem>>, vector<2x8x8x64xf32>
    %102 = arith.truncf %101 : vector<2x8x8x64xf32> to vector<2x8x8x64xbf16>
    %103 = vector.shape_cast %102 : vector<2x8x8x64xbf16> to vector<128x64xbf16>
    %c3_105 = arith.constant 3 : index
    %c0_106 = arith.constant 0 : index
    %c0_107 = arith.constant 0 : index
    %104 = vector.load %arg2[%c3_105, %c0_106, %c0_107] : memref<6x64x32xbf16, #tpu.memory_space<vmem>>, vector<1x64x32xbf16>
    %105 = vector.shape_cast %104 : vector<1x64x32xbf16> to vector<64x32xbf16>
    %cst_108 = arith.constant dense<0.000000e+00> : vector<128x32xf32>
    %106 = tpu.matmul %103, %105, %cst_108 {dimension_numbers = #tpu.dot_dimension_numbers<[1], [0], [0], [1], [0, 0, 1, 1], [], []>} : vector<128x64xbf16>, vector<64x32xbf16>, vector<128x32xf32> -> vector<128x32xf32>
    %107 = arith.addf %100, %106 : vector<128x32xf32>
    %c0_109 = arith.constant 0 : index
    %c2_110 = arith.constant 2 : index
    %c1_111 = arith.constant 1 : index
    %c0_112 = arith.constant 0 : index
    %108 = vector.load %arg0[%c0_109, %c2_110, %c1_111, %c0_112] : memref<2x10x10x64xf32, #tpu.memory_space<vmem>>, vector<2x8x8x64xf32>
    %109 = arith.truncf %108 : vector<2x8x8x64xf32> to vector<2x8x8x64xbf16>
    %110 = vector.shape_cast %109 : vector<2x8x8x64xbf16> to vector<128x64xbf16>
    %c4_113 = arith.constant 4 : index
    %c0_114 = arith.constant 0 : index
    %c0_115 = arith.constant 0 : index
    %111 = vector.load %arg2[%c4_113, %c0_114, %c0_115] : memref<6x64x32xbf16, #tpu.memory_space<vmem>>, vector<1x64x32xbf16>
    %112 = vector.shape_cast %111 : vector<1x64x32xbf16> to vector<64x32xbf16>
    %cst_116 = arith.constant dense<0.000000e+00> : vector<128x32xf32>
    %113 = tpu.matmul %110, %112, %cst_116 {dimension_numbers = #tpu.dot_dimension_numbers<[1], [0], [0], [1], [0, 0, 1, 1], [], []>} : vector<128x64xbf16>, vector<64x32xbf16>, vector<128x32xf32> -> vector<128x32xf32>
    %114 = arith.addf %107, %113 : vector<128x32xf32>
    %c0_117 = arith.constant 0 : index
    %c2_118 = arith.constant 2 : index
    %c2_119 = arith.constant 2 : index
    %c0_120 = arith.constant 0 : index
    %115 = vector.load %arg0[%c0_117, %c2_118, %c2_119, %c0_120] : memref<2x10x10x64xf32, #tpu.memory_space<vmem>>, vector<2x8x8x64xf32>
    %116 = arith.truncf %115 : vector<2x8x8x64xf32> to vector<2x8x8x64xbf16>
    %117 = vector.shape_cast %116 : vector<2x8x8x64xbf16> to vector<128x64xbf16>
    %c5_121 = arith.constant 5 : index
    %c0_122 = arith.constant 0 : index
    %c0_123 = arith.constant 0 : index
    %118 = vector.load %arg2[%c5_121, %c0_122, %c0_123] : memref<6x64x32xbf16, #tpu.memory_space<vmem>>, vector<1x64x32xbf16>
    %119 = vector.shape_cast %118 : vector<1x64x32xbf16> to vector<64x32xbf16>
    %cst_124 = arith.constant dense<0.000000e+00> : vector<128x32xf32>
    %120 = tpu.matmul %117, %119, %cst_124 {dimension_numbers = #tpu.dot_dimension_numbers<[1], [0], [0], [1], [0, 0, 1, 1], [], []>} : vector<128x64xbf16>, vector<64x32xbf16>, vector<128x32xf32> -> vector<128x32xf32>
    %121 = arith.addf %114, %120 : vector<128x32xf32>
    %c1_125 = arith.constant 1 : index
    %c0_126 = arith.constant 0 : index
    %c0_127 = arith.constant 0 : index
    %122 = vector.load %arg8[%c1_125, %c0_126, %c0_127] : memref<4x128x32xf32, #tpu.memory_space<vmem>>, vector<1x128x32xf32>
    %123 = vector.shape_cast %122 : vector<1x128x32xf32> to vector<128x32xf32>
    %124 = vector.shape_cast %121 : vector<128x32xf32> to vector<1x128x32xf32>
    tpu.vector_store %arg8[%c1_125, %c0_126, %c0_127], %124 {strides = array<i32>} : memref<4x128x32xf32, #tpu.memory_space<vmem>>, vector<1x128x32xf32>,
    %cst_128 = arith.constant dense<0.000000e+00> : vector<32xf32>
    %125 = vector.multi_reduction <add>, %121, %cst_128 [0] : vector<128x32xf32> to vector<32xf32>
    %126 = vector.shape_cast %125 : vector<32xf32> to vector<1x32xf32>
    %127 = arith.addf %74, %126 : vector<1x32xf32>
    %128 = arith.mulf %121, %121 : vector<128x32xf32>
    %cst_129 = arith.constant dense<0.000000e+00> : vector<32xf32>
    %129 = vector.multi_reduction <add>, %128, %cst_129 [0] : vector<128x32xf32> to vector<32xf32>
    %130 = vector.shape_cast %129 : vector<32xf32> to vector<1x32xf32>
    %131 = arith.addf %78, %130 : vector<1x32xf32>
    %cst_130 = arith.constant 0.000000e+00 : f32
    %132 = vector.broadcast %cst_130 : f32 to vector<128x32xf32>
    %c0_131 = arith.constant 0 : index
    %c1_132 = arith.constant 1 : index
    %c0_133 = arith.constant 0 : index
    %c0_134 = arith.constant 0 : index
    %133 = vector.load %arg0[%c0_131, %c1_132, %c0_133, %c0_134] : memref<2x10x10x64xf32, #tpu.memory_space<vmem>>, vector<2x8x8x64xf32>
    %134 = arith.truncf %133 : vector<2x8x8x64xf32> to vector<2x8x8x64xbf16>
    %135 = vector.shape_cast %134 : vector<2x8x8x64xbf16> to vector<128x64xbf16>
    %c0_135 = arith.constant 0 : index
    %c0_136 = arith.constant 0 : index
    %c0_137 = arith.constant 0 : index
    %136 = vector.load %arg3[%c0_135, %c0_136, %c0_137] : memref<6x64x32xbf16, #tpu.memory_space<vmem>>, vector<1x64x32xbf16>
    %137 = vector.shape_cast %136 : vector<1x64x32xbf16> to vector<64x32xbf16>
    %cst_138 = arith.constant dense<0.000000e+00> : vector<128x32xf32>
    %138 = tpu.matmul %135, %137, %cst_138 {dimension_numbers = #tpu.dot_dimension_numbers<[1], [0], [0], [1], [0, 0, 1, 1], [], []>} : vector<128x64xbf16>, vector<64x32xbf16>, vector<128x32xf32> -> vector<128x32xf32>
    %139 = arith.addf %132, %138 : vector<128x32xf32>
    %c0_139 = arith.constant 0 : index
    %c1_140 = arith.constant 1 : index
    %c1_141 = arith.constant 1 : index
    %c0_142 = arith.constant 0 : index
    %140 = vector.load %arg0[%c0_139, %c1_140, %c1_141, %c0_142] : memref<2x10x10x64xf32, #tpu.memory_space<vmem>>, vector<2x8x8x64xf32>
    %141 = arith.truncf %140 : vector<2x8x8x64xf32> to vector<2x8x8x64xbf16>
    %142 = vector.shape_cast %141 : vector<2x8x8x64xbf16> to vector<128x64xbf16>
    %c1_143 = arith.constant 1 : index
    %c0_144 = arith.constant 0 : index
    %c0_145 = arith.constant 0 : index
    %143 = vector.load %arg3[%c1_143, %c0_144, %c0_145] : memref<6x64x32xbf16, #tpu.memory_space<vmem>>, vector<1x64x32xbf16>
    %144 = vector.shape_cast %143 : vector<1x64x32xbf16> to vector<64x32xbf16>
    %cst_146 = arith.constant dense<0.000000e+00> : vector<128x32xf32>
    %145 = tpu.matmul %142, %144, %cst_146 {dimension_numbers = #tpu.dot_dimension_numbers<[1], [0], [0], [1], [0, 0, 1, 1], [], []>} : vector<128x64xbf16>, vector<64x32xbf16>, vector<128x32xf32> -> vector<128x32xf32>
    %146 = arith.addf %139, %145 : vector<128x32xf32>
    %c0_147 = arith.constant 0 : index
    %c1_148 = arith.constant 1 : index
    %c2_149 = arith.constant 2 : index
    %c0_150 = arith.constant 0 : index
    %147 = vector.load %arg0[%c0_147, %c1_148, %c2_149, %c0_150] : memref<2x10x10x64xf32, #tpu.memory_space<vmem>>, vector<2x8x8x64xf32>
    %148 = arith.truncf %147 : vector<2x8x8x64xf32> to vector<2x8x8x64xbf16>
    %149 = vector.shape_cast %148 : vector<2x8x8x64xbf16> to vector<128x64xbf16>
    %c2_151 = arith.constant 2 : index
    %c0_152 = arith.constant 0 : index
    %c0_153 = arith.constant 0 : index
    %150 = vector.load %arg3[%c2_151, %c0_152, %c0_153] : memref<6x64x32xbf16, #tpu.memory_space<vmem>>, vector<1x64x32xbf16>
    %151 = vector.shape_cast %150 : vector<1x64x32xbf16> to vector<64x32xbf16>
    %cst_154 = arith.constant dense<0.000000e+00> : vector<128x32xf32>
    %152 = tpu.matmul %149, %151, %cst_154 {dimension_numbers = #tpu.dot_dimension_numbers<[1], [0], [0], [1], [0, 0, 1, 1], [], []>} : vector<128x64xbf16>, vector<64x32xbf16>, vector<128x32xf32> -> vector<128x32xf32>
    %153 = arith.addf %146, %152 : vector<128x32xf32>
    %c0_155 = arith.constant 0 : index
    %c2_156 = arith.constant 2 : index
    %c0_157 = arith.constant 0 : index
    %c0_158 = arith.constant 0 : index
    %154 = vector.load %arg0[%c0_155, %c2_156, %c0_157, %c0_158] : memref<2x10x10x64xf32, #tpu.memory_space<vmem>>, vector<2x8x8x64xf32>
    %155 = arith.truncf %154 : vector<2x8x8x64xf32> to vector<2x8x8x64xbf16>
    %156 = vector.shape_cast %155 : vector<2x8x8x64xbf16> to vector<128x64xbf16>
    %c3_159 = arith.constant 3 : index
    %c0_160 = arith.constant 0 : index
    %c0_161 = arith.constant 0 : index
    %157 = vector.load %arg3[%c3_159, %c0_160, %c0_161] : memref<6x64x32xbf16, #tpu.memory_space<vmem>>, vector<1x64x32xbf16>
    %158 = vector.shape_cast %157 : vector<1x64x32xbf16> to vector<64x32xbf16>
    %cst_162 = arith.constant dense<0.000000e+00> : vector<128x32xf32>
    %159 = tpu.matmul %156, %158, %cst_162 {dimension_numbers = #tpu.dot_dimension_numbers<[1], [0], [0], [1], [0, 0, 1, 1], [], []>} : vector<128x64xbf16>, vector<64x32xbf16>, vector<128x32xf32> -> vector<128x32xf32>
    %160 = arith.addf %153, %159 : vector<128x32xf32>
    %c0_163 = arith.constant 0 : index
    %c2_164 = arith.constant 2 : index
    %c1_165 = arith.constant 1 : index
    %c0_166 = arith.constant 0 : index
    %161 = vector.load %arg0[%c0_163, %c2_164, %c1_165, %c0_166] : memref<2x10x10x64xf32, #tpu.memory_space<vmem>>, vector<2x8x8x64xf32>
    %162 = arith.truncf %161 : vector<2x8x8x64xf32> to vector<2x8x8x64xbf16>
    %163 = vector.shape_cast %162 : vector<2x8x8x64xbf16> to vector<128x64xbf16>
    %c4_167 = arith.constant 4 : index
    %c0_168 = arith.constant 0 : index
    %c0_169 = arith.constant 0 : index
    %164 = vector.load %arg3[%c4_167, %c0_168, %c0_169] : memref<6x64x32xbf16, #tpu.memory_space<vmem>>, vector<1x64x32xbf16>
    %165 = vector.shape_cast %164 : vector<1x64x32xbf16> to vector<64x32xbf16>
    %cst_170 = arith.constant dense<0.000000e+00> : vector<128x32xf32>
    %166 = tpu.matmul %163, %165, %cst_170 {dimension_numbers = #tpu.dot_dimension_numbers<[1], [0], [0], [1], [0, 0, 1, 1], [], []>} : vector<128x64xbf16>, vector<64x32xbf16>, vector<128x32xf32> -> vector<128x32xf32>
    %167 = arith.addf %160, %166 : vector<128x32xf32>
    %c0_171 = arith.constant 0 : index
    %c2_172 = arith.constant 2 : index
    %c2_173 = arith.constant 2 : index
    %c0_174 = arith.constant 0 : index
    %168 = vector.load %arg0[%c0_171, %c2_172, %c2_173, %c0_174] : memref<2x10x10x64xf32, #tpu.memory_space<vmem>>, vector<2x8x8x64xf32>
    %169 = arith.truncf %168 : vector<2x8x8x64xf32> to vector<2x8x8x64xbf16>
    %170 = vector.shape_cast %169 : vector<2x8x8x64xbf16> to vector<128x64xbf16>
    %c5_175 = arith.constant 5 : index
    %c0_176 = arith.constant 0 : index
    %c0_177 = arith.constant 0 : index
    %171 = vector.load %arg3[%c5_175, %c0_176, %c0_177] : memref<6x64x32xbf16, #tpu.memory_space<vmem>>, vector<1x64x32xbf16>
    %172 = vector.shape_cast %171 : vector<1x64x32xbf16> to vector<64x32xbf16>
    %cst_178 = arith.constant dense<0.000000e+00> : vector<128x32xf32>
    %173 = tpu.matmul %170, %172, %cst_178 {dimension_numbers = #tpu.dot_dimension_numbers<[1], [0], [0], [1], [0, 0, 1, 1], [], []>} : vector<128x64xbf16>, vector<64x32xbf16>, vector<128x32xf32> -> vector<128x32xf32>
    %174 = arith.addf %167, %173 : vector<128x32xf32>
    %c2_179 = arith.constant 2 : index
    %c0_180 = arith.constant 0 : index
    %c0_181 = arith.constant 0 : index
    %175 = vector.load %arg8[%c2_179, %c0_180, %c0_181] : memref<4x128x32xf32, #tpu.memory_space<vmem>>, vector<1x128x32xf32>
    %176 = vector.shape_cast %175 : vector<1x128x32xf32> to vector<128x32xf32>
    %177 = vector.shape_cast %174 : vector<128x32xf32> to vector<1x128x32xf32>
    tpu.vector_store %arg8[%c2_179, %c0_180, %c0_181], %177 {strides = array<i32>} : memref<4x128x32xf32, #tpu.memory_space<vmem>>, vector<1x128x32xf32>,
    %cst_182 = arith.constant dense<0.000000e+00> : vector<32xf32>
    %178 = vector.multi_reduction <add>, %174, %cst_182 [0] : vector<128x32xf32> to vector<32xf32>
    %179 = vector.shape_cast %178 : vector<32xf32> to vector<1x32xf32>
    %180 = arith.addf %127, %179 : vector<1x32xf32>
    %181 = arith.mulf %174, %174 : vector<128x32xf32>
    %cst_183 = arith.constant dense<0.000000e+00> : vector<32xf32>
    %182 = vector.multi_reduction <add>, %181, %cst_183 [0] : vector<128x32xf32> to vector<32xf32>
    %183 = vector.shape_cast %182 : vector<32xf32> to vector<1x32xf32>
    %184 = arith.addf %131, %183 : vector<1x32xf32>
    %cst_184 = arith.constant 0.000000e+00 : f32
    %185 = vector.broadcast %cst_184 : f32 to vector<128x32xf32>
    %c0_185 = arith.constant 0 : index
    %c1_186 = arith.constant 1 : index
    %c1_187 = arith.constant 1 : index
    %c0_188 = arith.constant 0 : index
    %186 = vector.load %arg0[%c0_185, %c1_186, %c1_187, %c0_188] : memref<2x10x10x64xf32, #tpu.memory_space<vmem>>, vector<2x8x8x64xf32>
    %187 = arith.truncf %186 : vector<2x8x8x64xf32> to vector<2x8x8x64xbf16>
    %188 = vector.shape_cast %187 : vector<2x8x8x64xbf16> to vector<128x64xbf16>
    %c0_189 = arith.constant 0 : index
    %c0_190 = arith.constant 0 : index
    %c0_191 = arith.constant 0 : index
    %189 = vector.load %arg4[%c0_189, %c0_190, %c0_191] : memref<4x64x32xbf16, #tpu.memory_space<vmem>>, vector<1x64x32xbf16>
    %190 = vector.shape_cast %189 : vector<1x64x32xbf16> to vector<64x32xbf16>
    %cst_192 = arith.constant dense<0.000000e+00> : vector<128x32xf32>
    %191 = tpu.matmul %188, %190, %cst_192 {dimension_numbers = #tpu.dot_dimension_numbers<[1], [0], [0], [1], [0, 0, 1, 1], [], []>} : vector<128x64xbf16>, vector<64x32xbf16>, vector<128x32xf32> -> vector<128x32xf32>
    %192 = arith.addf %185, %191 : vector<128x32xf32>
    %c0_193 = arith.constant 0 : index
    %c1_194 = arith.constant 1 : index
    %c2_195 = arith.constant 2 : index
    %c0_196 = arith.constant 0 : index
    %193 = vector.load %arg0[%c0_193, %c1_194, %c2_195, %c0_196] : memref<2x10x10x64xf32, #tpu.memory_space<vmem>>, vector<2x8x8x64xf32>
    %194 = arith.truncf %193 : vector<2x8x8x64xf32> to vector<2x8x8x64xbf16>
    %195 = vector.shape_cast %194 : vector<2x8x8x64xbf16> to vector<128x64xbf16>
    %c1_197 = arith.constant 1 : index
    %c0_198 = arith.constant 0 : index
    %c0_199 = arith.constant 0 : index
    %196 = vector.load %arg4[%c1_197, %c0_198, %c0_199] : memref<4x64x32xbf16, #tpu.memory_space<vmem>>, vector<1x64x32xbf16>
    %197 = vector.shape_cast %196 : vector<1x64x32xbf16> to vector<64x32xbf16>
    %cst_200 = arith.constant dense<0.000000e+00> : vector<128x32xf32>
    %198 = tpu.matmul %195, %197, %cst_200 {dimension_numbers = #tpu.dot_dimension_numbers<[1], [0], [0], [1], [0, 0, 1, 1], [], []>} : vector<128x64xbf16>, vector<64x32xbf16>, vector<128x32xf32> -> vector<128x32xf32>
    %199 = arith.addf %192, %198 : vector<128x32xf32>
    %c0_201 = arith.constant 0 : index
    %c2_202 = arith.constant 2 : index
    %c1_203 = arith.constant 1 : index
    %c0_204 = arith.constant 0 : index
    %200 = vector.load %arg0[%c0_201, %c2_202, %c1_203, %c0_204] : memref<2x10x10x64xf32, #tpu.memory_space<vmem>>, vector<2x8x8x64xf32>
    %201 = arith.truncf %200 : vector<2x8x8x64xf32> to vector<2x8x8x64xbf16>
    %202 = vector.shape_cast %201 : vector<2x8x8x64xbf16> to vector<128x64xbf16>
    %c2_205 = arith.constant 2 : index
    %c0_206 = arith.constant 0 : index
    %c0_207 = arith.constant 0 : index
    %203 = vector.load %arg4[%c2_205, %c0_206, %c0_207] : memref<4x64x32xbf16, #tpu.memory_space<vmem>>, vector<1x64x32xbf16>
    %204 = vector.shape_cast %203 : vector<1x64x32xbf16> to vector<64x32xbf16>
    %cst_208 = arith.constant dense<0.000000e+00> : vector<128x32xf32>
    %205 = tpu.matmul %202, %204, %cst_208 {dimension_numbers = #tpu.dot_dimension_numbers<[1], [0], [0], [1], [0, 0, 1, 1], [], []>} : vector<128x64xbf16>, vector<64x32xbf16>, vector<128x32xf32> -> vector<128x32xf32>
    %206 = arith.addf %199, %205 : vector<128x32xf32>
    %c0_209 = arith.constant 0 : index
    %c2_210 = arith.constant 2 : index
    %c2_211 = arith.constant 2 : index
    %c0_212 = arith.constant 0 : index
    %207 = vector.load %arg0[%c0_209, %c2_210, %c2_211, %c0_212] : memref<2x10x10x64xf32, #tpu.memory_space<vmem>>, vector<2x8x8x64xf32>
    %208 = arith.truncf %207 : vector<2x8x8x64xf32> to vector<2x8x8x64xbf16>
    %209 = vector.shape_cast %208 : vector<2x8x8x64xbf16> to vector<128x64xbf16>
    %c3_213 = arith.constant 3 : index
    %c0_214 = arith.constant 0 : index
    %c0_215 = arith.constant 0 : index
    %210 = vector.load %arg4[%c3_213, %c0_214, %c0_215] : memref<4x64x32xbf16, #tpu.memory_space<vmem>>, vector<1x64x32xbf16>
    %211 = vector.shape_cast %210 : vector<1x64x32xbf16> to vector<64x32xbf16>
    %cst_216 = arith.constant dense<0.000000e+00> : vector<128x32xf32>
    %212 = tpu.matmul %209, %211, %cst_216 {dimension_numbers = #tpu.dot_dimension_numbers<[1], [0], [0], [1], [0, 0, 1, 1], [], []>} : vector<128x64xbf16>, vector<64x32xbf16>, vector<128x32xf32> -> vector<128x32xf32>
    %213 = arith.addf %206, %212 : vector<128x32xf32>
    %c3_217 = arith.constant 3 : index
    %c0_218 = arith.constant 0 : index
    %c0_219 = arith.constant 0 : index
    %214 = vector.load %arg8[%c3_217, %c0_218, %c0_219] : memref<4x128x32xf32, #tpu.memory_space<vmem>>, vector<1x128x32xf32>
    %215 = vector.shape_cast %214 : vector<1x128x32xf32> to vector<128x32xf32>
    %216 = vector.shape_cast %213 : vector<128x32xf32> to vector<1x128x32xf32>
    tpu.vector_store %arg8[%c3_217, %c0_218, %c0_219], %216 {strides = array<i32>} : memref<4x128x32xf32, #tpu.memory_space<vmem>>, vector<1x128x32xf32>,
    %cst_220 = arith.constant dense<0.000000e+00> : vector<32xf32>
    %217 = vector.multi_reduction <add>, %213, %cst_220 [0] : vector<128x32xf32> to vector<32xf32>
    %218 = vector.shape_cast %217 : vector<32xf32> to vector<1x32xf32>
    %219 = arith.addf %180, %218 : vector<1x32xf32>
    %220 = arith.mulf %213, %213 : vector<128x32xf32>
    %cst_221 = arith.constant dense<0.000000e+00> : vector<32xf32>
    %221 = vector.multi_reduction <add>, %220, %cst_221 [0] : vector<128x32xf32> to vector<32xf32>
    %222 = vector.shape_cast %221 : vector<32xf32> to vector<1x32xf32>
    %223 = arith.addf %184, %222 : vector<1x32xf32>
    %cst_222 = arith.constant 0.001953125 : f32
    %224 = vector.broadcast %cst_222 : f32 to vector<1x32xf32>
    %225 = arith.mulf %219, %224 : vector<1x32xf32>
    %cst_223 = arith.constant 0.001953125 : f32
    %226 = vector.broadcast %cst_223 : f32 to vector<1x32xf32>
    %227 = arith.mulf %223, %226 : vector<1x32xf32>
    %228 = arith.mulf %225, %225 : vector<1x32xf32>
    %229 = arith.subf %227, %228 : vector<1x32xf32>
    %cst_224 = arith.constant 0.000000e+00 : f32
    %230 = vector.broadcast %cst_224 : f32 to vector<1x32xf32>
    %231 = arith.maximumf %229, %230 : vector<1x32xf32>
    %cst_225 = arith.constant 9.99999974E-6 : f32
    %232 = vector.broadcast %cst_225 : f32 to vector<1x32xf32>
    %233 = arith.addf %231, %232 : vector<1x32xf32>
    %234 = math.rsqrt %233 : vector<1x32xf32>
    %235 = arith.mulf %0, %234 : vector<1x32xf32>
    %236 = arith.mulf %225, %235 : vector<1x32xf32>
    %237 = arith.subf %1, %236 : vector<1x32xf32>
    %c0_226 = arith.constant 0 : index
    %c0_227 = arith.constant 0 : index
    %c0_228 = arith.constant 0 : index
    %238 = vector.load %arg8[%c0_226, %c0_227, %c0_228] : memref<4x128x32xf32, #tpu.memory_space<vmem>>, vector<1x128x32xf32>
    %239 = vector.shape_cast %238 : vector<1x128x32xf32> to vector<128x32xf32>
    %240 = vector.broadcast %235 : vector<1x32xf32> to vector<128x32xf32>
    %241 = arith.mulf %239, %240 : vector<128x32xf32>
    %242 = vector.broadcast %237 : vector<1x32xf32> to vector<128x32xf32>
    %243 = arith.addf %241, %242 : vector<128x32xf32>
    %cst_229 = arith.constant 0.000000e+00 : f32
    %244 = vector.broadcast %cst_229 : f32 to vector<128x32xf32>
    %245 = arith.cmpf oge, %243, %244 : vector<128x32xf32>
    %246 = vector.broadcast %2 : vector<1x1xf32> to vector<128x32xf32>
    %247 = arith.mulf %243, %246 : vector<128x32xf32>
    %248 = arith.select %245, %243, %247 : vector<128x32xi1>, vector<128x32xf32>
    %c0_230 = arith.constant 0 : index
    %c0_231 = arith.constant 0 : index
    %c0_232 = arith.constant 0 : index
    %249 = vector.load %arg8[%c0_230, %c0_231, %c0_232] : memref<4x128x32xf32, #tpu.memory_space<vmem>>, vector<1x128x32xf32>
    %250 = vector.shape_cast %249 : vector<1x128x32xf32> to vector<128x32xf32>
    %251 = vector.shape_cast %248 : vector<128x32xf32> to vector<1x128x32xf32>
    tpu.vector_store %arg8[%c0_230, %c0_231, %c0_232], %251 {strides = array<i32>} : memref<4x128x32xf32, #tpu.memory_space<vmem>>, vector<1x128x32xf32>,
    %c1_233 = arith.constant 1 : index
    %c0_234 = arith.constant 0 : index
    %c0_235 = arith.constant 0 : index
    %252 = vector.load %arg8[%c1_233, %c0_234, %c0_235] : memref<4x128x32xf32, #tpu.memory_space<vmem>>, vector<1x128x32xf32>
    %253 = vector.shape_cast %252 : vector<1x128x32xf32> to vector<128x32xf32>
    %254 = vector.broadcast %235 : vector<1x32xf32> to vector<128x32xf32>
    %255 = arith.mulf %253, %254 : vector<128x32xf32>
    %256 = vector.broadcast %237 : vector<1x32xf32> to vector<128x32xf32>
    %257 = arith.addf %255, %256 : vector<128x32xf32>
    %cst_236 = arith.constant 0.000000e+00 : f32
    %258 = vector.broadcast %cst_236 : f32 to vector<128x32xf32>
    %259 = arith.cmpf oge, %257, %258 : vector<128x32xf32>
    %260 = vector.broadcast %2 : vector<1x1xf32> to vector<128x32xf32>
    %261 = arith.mulf %257, %260 : vector<128x32xf32>
    %262 = arith.select %259, %257, %261 : vector<128x32xi1>, vector<128x32xf32>
    %c1_237 = arith.constant 1 : index
    %c0_238 = arith.constant 0 : index
    %c0_239 = arith.constant 0 : index
    %263 = vector.load %arg8[%c1_237, %c0_238, %c0_239] : memref<4x128x32xf32, #tpu.memory_space<vmem>>, vector<1x128x32xf32>
    %264 = vector.shape_cast %263 : vector<1x128x32xf32> to vector<128x32xf32>
    %265 = vector.shape_cast %262 : vector<128x32xf32> to vector<1x128x32xf32>
    tpu.vector_store %arg8[%c1_237, %c0_238, %c0_239], %265 {strides = array<i32>} : memref<4x128x32xf32, #tpu.memory_space<vmem>>, vector<1x128x32xf32>,
    %c2_240 = arith.constant 2 : index
    %c0_241 = arith.constant 0 : index
    %c0_242 = arith.constant 0 : index
    %266 = vector.load %arg8[%c2_240, %c0_241, %c0_242] : memref<4x128x32xf32, #tpu.memory_space<vmem>>, vector<1x128x32xf32>
    %267 = vector.shape_cast %266 : vector<1x128x32xf32> to vector<128x32xf32>
    %268 = vector.broadcast %235 : vector<1x32xf32> to vector<128x32xf32>
    %269 = arith.mulf %267, %268 : vector<128x32xf32>
    %270 = vector.broadcast %237 : vector<1x32xf32> to vector<128x32xf32>
    %271 = arith.addf %269, %270 : vector<128x32xf32>
    %cst_243 = arith.constant 0.000000e+00 : f32
    %272 = vector.broadcast %cst_243 : f32 to vector<128x32xf32>
    %273 = arith.cmpf oge, %271, %272 : vector<128x32xf32>
    %274 = vector.broadcast %2 : vector<1x1xf32> to vector<128x32xf32>
    %275 = arith.mulf %271, %274 : vector<128x32xf32>
    %276 = arith.select %273, %271, %275 : vector<128x32xi1>, vector<128x32xf32>
    %c2_244 = arith.constant 2 : index
    %c0_245 = arith.constant 0 : index
    %c0_246 = arith.constant 0 : index
    %277 = vector.load %arg8[%c2_244, %c0_245, %c0_246] : memref<4x128x32xf32, #tpu.memory_space<vmem>>, vector<1x128x32xf32>
    %278 = vector.shape_cast %277 : vector<1x128x32xf32> to vector<128x32xf32>
    %279 = vector.shape_cast %276 : vector<128x32xf32> to vector<1x128x32xf32>
    tpu.vector_store %arg8[%c2_244, %c0_245, %c0_246], %279 {strides = array<i32>} : memref<4x128x32xf32, #tpu.memory_space<vmem>>, vector<1x128x32xf32>,
    %c3_247 = arith.constant 3 : index
    %c0_248 = arith.constant 0 : index
    %c0_249 = arith.constant 0 : index
    %280 = vector.load %arg8[%c3_247, %c0_248, %c0_249] : memref<4x128x32xf32, #tpu.memory_space<vmem>>, vector<1x128x32xf32>
    %281 = vector.shape_cast %280 : vector<1x128x32xf32> to vector<128x32xf32>
    %282 = vector.broadcast %235 : vector<1x32xf32> to vector<128x32xf32>
    %283 = arith.mulf %281, %282 : vector<128x32xf32>
    %284 = vector.broadcast %237 : vector<1x32xf32> to vector<128x32xf32>
    %285 = arith.addf %283, %284 : vector<128x32xf32>
    %cst_250 = arith.constant 0.000000e+00 : f32
    %286 = vector.broadcast %cst_250 : f32 to vector<128x32xf32>
    %287 = arith.cmpf oge, %285, %286 : vector<128x32xf32>
    %288 = vector.broadcast %2 : vector<1x1xf32> to vector<128x32xf32>
    %289 = arith.mulf %285, %288 : vector<128x32xf32>
    %290 = arith.select %287, %285, %289 : vector<128x32xi1>, vector<128x32xf32>
    %c3_251 = arith.constant 3 : index
    %c0_252 = arith.constant 0 : index
    %c0_253 = arith.constant 0 : index
    %291 = vector.load %arg8[%c3_251, %c0_252, %c0_253] : memref<4x128x32xf32, #tpu.memory_space<vmem>>, vector<1x128x32xf32>
    %292 = vector.shape_cast %291 : vector<1x128x32xf32> to vector<128x32xf32>
    %293 = vector.shape_cast %290 : vector<128x32xf32> to vector<1x128x32xf32>
    tpu.vector_store %arg8[%c3_251, %c0_252, %c0_253], %293 {strides = array<i32>} : memref<4x128x32xf32, #tpu.memory_space<vmem>>, vector<1x128x32xf32>,
    return
  }
}

</mosaic_0001>

<bundles_post_ra>
// kernel: tpu_custom_call.1
= control target key start
LH: loop header
LB: loop body
LE: loop exit
PB: predicated region body
PF: predicated region fallthrough
CT: control target
= control target key end

     0   :  { %vm180_vm0 = vcmask 523264   ;;  %vm12903_vm1 = vcmask 261120   ;;  %s12850_s1 = inlined_call_operand.vmem [shape: bf16[9,64,32], index: 1, kind: input, shape index: {}]   ;;  %s12851_s0 = inlined_call_operand.vmem [shape: f32[2,10,10,64], index: 0, kind: input, shape index: {}]   ;;  %s12852_s2 = inlined_call_operand.vmem [shape: bf16[6,64,32], index: 2, kind: input, shape index: {}]   ;;  %s12853_s3 = inlined_call_operand.vmem [shape: bf16[6,64,32], index: 3, kind: input, shape index: {}]   ;;  %s12854_s4 = inlined_call_operand.vmem [shape: bf16[4,64,32], index: 4, kind: input, shape index: {}]   ;;  %s12855_s8 = inlined_call_operand.vmem [shape: f32[4,128,32], index: 8, kind: output, shape index: {}]   ;;  %s12856_s7 = inlined_call_operand.<no memory space> [shape: f32[1,1], index: 7, kind: input, shape index: {}]   ;;  %s12857_s5 = inlined_call_operand.vmem [shape: f32[1,32], index: 5, kind: input, shape index: {}]   ;;  %s12858_s6 = inlined_call_operand.vmem [shape: f32[1,32], index: 6, kind: input, shape index: {}]  }
   0x1   :  { %v9118_v0 = vld [vmem:[%s12850_s1 + $0x38] sm:$0xff]   ;;  %v9119_v1 = vld [vmem:[%s12850_s1 + $0x30] sm:$0xff]   ;;  %v9120_v2 = vld [vmem:[%s12850_s1 + $0x28] sm:$0xff]  }
   0x2   :  { %8508 = vmatprep.subr.bf16.mxu0 %v9118_v0  ;;  %9108 = vmatprep.subr.bf16.mxu1 %v9118_v0  ;;  %v75_v3 = vld [vmem:[%s12851_s0 + $0x1] sm:$0xff]  ;;  %v9281_v4 = vld [vmem:[%s12851_s0 + $0x11] sm:$0xff] }
   0x3   :  { %8509 = vmatpush3.bf16.msra.mxu0 %v9118_v0  ;;  %9112 = vmatpush3.bf16.msra.mxu1 %v9118_v0  ;;  %v83_v5 = vld [vmem:[%s12851_s0 + $0xa1] sm:$0xff]  ;;  %v9287_v6 = vpack.c.bf16 %v9281_v4, %v75_v3  ;;  %v9292_v7 = vld [vmem:[%s12851_s0 + $0xb1] sm:$0xff] }
   0x4   :  { %8510 = vmatprep.subr.bf16.mxu0 %v9119_v1  ;;  %9109 = vmatprep.subr.bf16.mxu1 %v9119_v1  ;;  %v8012_v8 = vpack.c.bf16 %v9292_v7, %v83_v5  ;;  %v9121_v9 = vld [vmem:[%s12850_s1 + $0x20] sm:$0xff]   ;;  %v9309_v11 = vld [vmem:[%s12851_s0 + $0x31] sm:$0xff]  ;;  %v9126_v30 = vld [vmem:[%s12850_s1 + $0x8] sm:$0xff]  }
   0x5   :  { %12904 = vst [vmem:[#allocation3_spill] sm:$0xff] %v9287_v6  ;;  %8516 = vmatprep.mubr.msk.bf16.mxu0 %vm180_vm0, %v9287_v6  ;;  %v9304_v10 = vld [vmem:[%s12851_s0 + $0x21] sm:$0xff]  ;;  %v9319_v13 = vld [vmem:[%s12851_s0 + $0xd1] sm:$0xff] }
   0x6   :  { %8524 = vmatprep.mubr.msk.bf16.mxu1 %vm180_vm0, %v8012_v8  ;;  %v9314_v12 = vld [vmem:[%s12851_s0 + $0xc1] sm:$0xff]  ;;  %v9122_v14 = vld [vmem:[%s12850_s1 + $0x18] sm:$0xff]   ;;  %v9344_v19 = vpack.c.bf16 %v9309_v11, %v9304_v10  ;;  %v9124_v22 = vld [vmem:[%s12850_s1 + $0x10] sm:$0xff]  }
   0x7   :  { %8511 = vmatpush3.bf16.msra.mxu0 %v9119_v1  ;;  %9113 = vmatpush3.bf16.msra.mxu1 %v9119_v1  ;;  %v9123_v15 = vld [vmem:[%s12850_s1 + $0x58] sm:$0xff]   ;;  %v9330_v16 = vld [vmem:[%s12851_s0 + $0x41] sm:$0xff]  ;;  %v9348_v20 = vpack.c.bf16 %v9319_v13, %v9314_v12  ;;  %v9125_v23 = vld [vmem:[%s12850_s1 + $0x50] sm:$0xff]  }
   0x8   :  { %8512 = vmatprep.subr.bf16.mxu0 %v9120_v2  ;;  %9110 = vmatprep.subr.bf16.mxu1 %v9120_v2  ;;  %v9335_v17 = vld [vmem:[%s12851_s0 + $0x51] sm:$0xff]  ;;  %v9340_v18 = vld [vmem:[%s12851_s0 + $0xe1] sm:$0xff] }
   0x9   :  { %v9353_v21 = vld [vmem:[%s12851_s0 + $0xf1] sm:$0xff]  ;;  %v9363_v24 = vpack.c.bf16 %v9335_v17, %v9330_v16  ;;  %v9376_v26 = vld [vmem:[%s12851_s0 + $0x61] sm:$0xff] }
   0xa   :  { %v9367_v25 = vpack.c.bf16 %v9353_v21, %v9340_v18  ;;  %v9381_v27 = vld [vmem:[%s12851_s0 + $0x71] sm:$0xff]  ;;  %v9386_v28 = vld [vmem:[%s12851_s0 + $0x101] sm:$0xff] }
   0xb   :  { %8513 = vmatpush3.bf16.msra.mxu0 %v9120_v2  ;;  %9114 = vmatpush3.bf16.msra.mxu1 %v9120_v2  ;;  %v9391_v29 = vld [vmem:[%s12851_s0 + $0x111] sm:$0xff]  ;;  %v9127_v31 = vld [vmem:[%s12850_s1 + $0x48] sm:$0xff]   ;;  %v35_v32 = vld [vmem:[%s12851_s0] sm:$0xff]  ;;  %v9408_v33 = vpack.c.bf16 %v9381_v27, %v9376_v26 }
   0xc   :  { %8514 = vmatprep.subr.bf16.mxu0 %v9121_v9  ;;  %9111 = vmatprep.subr.bf16.mxu1 %v9121_v9  ;;  %v9412_v34 = vpack.c.bf16 %v9391_v29, %v9386_v28  ;;  %v9417_v35 = vld [vmem:[%s12851_s0 + $0x10] sm:$0xff]  ;;  %v487_v36 = vld [vmem:[%s12851_s0 + $0x2] sm:$0xff]  ;;  %v9130_v46 = vld [vmem:[%s12850_s1 + $0x78] sm:$0xff]  }
   0xd   :  { %v9425_v37 = vld [vmem:[%s12851_s0 + $0x12] sm:$0xff]  ;;  %v9128_v38 = vld [vmem:[%s12850_s1] sm:$0xff]   ;;  %v8016_v40 = vpack.c.bf16 %v9417_v35, %v35_v32  ;;  %v9134_v2 = vld [vmem:[%s12850_s1 + $0x68] sm:$0xff]  }
   0xe   :  { %12905 = vst [vmem:[#allocation4_spill] sm:$0xff] %v9412_v34  ;;  %v9129_v39 = vld [vmem:[%s12850_s1 + $0x40] sm:$0xff]   ;;  %v9435_v41 = vpack.c.bf16 %v9425_v37, %v487_v36  ;;  %v9449_v43 = vld [vmem:[%s12851_s0 + $0x30] sm:$0xff]  ;;  %v9131_v47 = vld [vmem:[%s12850_s1 + $0x98] sm:$0xff]  }
   0xf   :  { %8515 = vmatpush3.bf16.msra.mxu0 %v9121_v9  ;;  %9115 = vmatpush3.bf16.msra.mxu1 %v9121_v9  ;;  %v9440_v42 = vld [vmem:[%s12851_s0 + $0x20] sm:$0xff]  ;;  %v9459_v45 = vld [vmem:[%s12851_s0 + $0x32] sm:$0xff]  ;;  %v9135_v3 = vld [vmem:[%s12850_s1 + $0x88] sm:$0xff]  }
  0x10   :  { %8532 = vmatprep.subr.bf16.mxu1 %v9122_v14  ;;  %8556 = vmatprep.subr.bf16.mxu0 %v9123_v15  ;;  %12906 = vst [vmem:[#allocation5_spill] sm:$0xff] %v9435_v41  ;;  %v9454_v44 = vld [vmem:[%s12851_s0 + $0x22] sm:$0xff]  ;;  %v9475_v49 = vld [vmem:[%s12851_s0 + $0x50] sm:$0xff]  ;;  %v9492_v52 = vpack.c.bf16 %v9449_v43, %v9440_v42  ;;  %v8032_v6 = vpack.c.bf16 %v9440_v42, %v9417_v35 }
  0x11   :  { %v9470_v48 = vld [vmem:[%s12851_s0 + $0x40] sm:$0xff]  ;;  %v9488_v51 = vld [vmem:[%s12851_s0 + $0x52] sm:$0xff]  ;;  %v9496_v53 = vpack.c.bf16 %v9459_v45, %v9454_v44 }
  0x12   :  { %8517 = vmatmul.mubr.msk.bf16.vlgmr.msra.gmra.mxu0 %vm180_vm0, %v9344_v19  ;;  %8525 = vmatmul.mubr.msk.bf16.vlgmr.msra.gmra.mxu1 %vm180_vm0, %v9348_v20  ;;  %v9480_v50 = vld [vmem:[%s12851_s0 + $0x42] sm:$0xff]  ;;  %v9500_v54 = vpack.c.bf16 %v9475_v49, %v9470_v48  ;;  %v9514_v57 = vld [vmem:[%s12851_s0 + $0x70] sm:$0xff] }
  0x13   :  { %8533 = vmatpush3.bf16.msra.mxu1 %v9122_v14  ;;  %8557 = vmatpush3.bf16.msra.mxu0 %v9123_v15  ;;  %v9504_v55 = vpack.c.bf16 %v9488_v51, %v9480_v50  ;;  %v9509_v56 = vld [vmem:[%s12851_s0 + $0x60] sm:$0xff]  ;;  %v9524_v59 = vld [vmem:[%s12851_s0 + $0x72] sm:$0xff] }
  0x14   :  { %8534 = vmatprep.subr.bf16.mxu1 %v9124_v22  ;;  %8558 = vmatprep.subr.bf16.mxu0 %v9125_v23  ;;  %v9519_v58 = vld [vmem:[%s12851_s0 + $0x62] sm:$0xff]  ;;  %v9132_v60 = vld [vmem:[%s12850_s1 + $0x70] sm:$0xff]   ;;  %v9564_v5 = vpack.c.bf16 %v9514_v57, %v9509_v56  ;;  %v8034_v35 = vpack.c.bf16 %v9509_v56, %v9475_v49  ;;  %v8045_v56 = vpack.c.bf16 %v9340_v18, %v9319_v13 }
  0x15   :  { %8520 = vmatprep.mubr.msk.bf16.mxu0 %vm180_vm0, %v9363_v24  ;;  %8528 = vmatprep.mubr.msk.bf16.mxu1 %vm180_vm0, %v9367_v25  ;;  %v9133_v61 = vld [vmem:[%s12850_s1 + $0x90] sm:$0xff]   ;;  %v43_v62 = vld [vmem:[%s12851_s0 + $0xa0] sm:$0xff]  ;;  %v9568_v8 = vpack.c.bf16 %v9524_v59, %v9519_v58 }
  0x16   :  { %v9542_v63 = vld [vmem:[%s12851_s0 + $0xb0] sm:$0xff]  ;;  %v495_v0 = vld [vmem:[%s12851_s0 + $0xa2] sm:$0xff] }
  0x17   :  { %8535 = vmatpush3.bf16.msra.mxu1 %v9124_v22  ;;  %8559 = vmatpush3.bf16.msra.mxu0 %v9125_v23  ;;  %v9550_v1 = vld [vmem:[%s12851_s0 + $0xb2] sm:$0xff]  ;;  %v8020_v9 = vpack.c.bf16 %v9542_v63, %v43_v62  ;;  %v9136_v15 = vld [vmem:[%s12850_s1 + $0x60] sm:$0xff]  }
  0x18   :  { %8536 = vmatprep.subr.bf16.mxu1 %v9126_v30  ;;  %8560 = vmatprep.subr.bf16.mxu0 %v9127_v31  ;;  %v9572_v14 = vpack.c.bf16 %v9550_v1, %v495_v0  ;;  %v9580_v22 = vld [vmem:[%s12851_s0 + $0xc0] sm:$0xff]  ;;  %v9585_v23 = vld [vmem:[%s12851_s0 + $0xd0] sm:$0xff] }
  0x19   :  { %v9137_v32 = vld [vmem:[%s12850_s1 + $0x80] sm:$0xff]   ;;  %v8036_v42 = vpack.c.bf16 %v9580_v22, %v9542_v63  ;;  %v8046_v63 = vpack.c.bf16 %v9386_v28, %v9353_v21 }
  0x1a   :  { %8521 = vmatmul.mubr.msk.bf16.gmra.mxu0 %vm180_vm0, %v9408_v33  ;;  %8529 = vmatmul.mubr.msk.bf16.gmra.mxu1 %vm180_vm0, %v9412_v34  ;;  %12907 = vst [vmem:[#allocation6_spill] sm:$0xff] %v9572_v14  ;;  %v9607_v36 = vld [vmem:[%s12851_s0 + $0xe0] sm:$0xff]  ;;  %v8033_v34 = vpack.c.bf16 %v9470_v48, %v9449_v43  ;;  %v8044_v43 = vpack.c.bf16 %v9314_v12, %v9292_v7  ;;  %v9146_v7 = vld [vmem:[%s12850_s1 + $0xf8] sm:$0xff]  }
  0x1b   :  { %8537 = vmatpush3.bf16.msra.mxu1 %v9126_v30  ;;  %8561 = vmatpush3.bf16.msra.mxu0 %v9127_v31  ;;  %v9590_v30 = vld [vmem:[%s12851_s0 + $0xc2] sm:$0xff]  ;;  %v9595_v31 = vld [vmem:[%s12851_s0 + $0xd2] sm:$0xff] }
  0x1c   :  { %8538 = vmatprep.subr.bf16.mxu1 %v9128_v38  ;;  %8562 = vmatprep.subr.bf16.mxu0 %v9129_v39  ;;  %v9144_v48 = vld [vmem:[%s12850_s1 + $0xa0] sm:$0xff]   ;;  %v9147_v12 = vld [vmem:[%s12850_s1 + $0x118] sm:$0xff]  }
  0x1d   :  { %8540 = vmatprep.mubr.msk.bf16.mxu1 %vm180_vm0, %v8016_v40  ;;  %8564 = vmatprep.mubr.msk.bf16.mxu0 %vm180_vm0, %v9435_v41  ;;  %v9625_v40 = vld [vmem:[%s12851_s0 + $0xf2] sm:$0xff]  ;;  %v8040_v41 = vpack.c.bf16 %v9304_v10, %v9281_v4  ;;  %v8042_v4 = vpack.c.bf16 %v9376_v26, %v9335_v17  ;;  %v9142_v17 = vld [vmem:[%s12850_s1 + $0xa8] sm:$0xff]   ;;  %v9145_v49 = vld [vmem:[%s12850_s1 + $0xc0] sm:$0xff]  }
  0x1e   :  { %v9140_v10 = vld [vmem:[%s12850_s1 + $0xb0] sm:$0xff]   ;;  %v9143_v26 = vld [vmem:[%s12850_s1 + $0xc8] sm:$0xff]   ;;  %v6966_v13 = vld [vmem:[%s12851_s0 + $0x120] sm:$0xff] }
  0x1f   :  { %8539 = vmatpush3.bf16.msra.mxu1 %v9128_v38  ;;  %8563 = vmatpush3.bf16.msra.mxu0 %v9129_v39  ;;  %v9612_v38 = vld [vmem:[%s12851_s0 + $0xf0] sm:$0xff]  ;;  %v9617_v39 = vld [vmem:[%s12851_s0 + $0xe2] sm:$0xff] }
  0x20   :  { %8580 = vmatprep.subr.bf16.mxu1 %v9130_v46  ;;  %8604 = vmatprep.subr.bf16.mxu0 %v9131_v47  ;;  %v9643_v62 = vpack.c.bf16 %v9612_v38, %v9607_v36  ;;  %v9647_v0 = vpack.c.bf16 %v9625_v40, %v9617_v39  ;;  %v9771_v18 = vld [vmem:[%s12851_s0 + $0x121] sm:$0xff] }
  0x21   :  { %v8047_v28 = vpack.c.bf16 %v9771_v18, %v9391_v29  ;;  %v9148_v29 = vld [vmem:[%s12850_s1 + $0xf0] sm:$0xff]  }
  0x22   :  { %8541 = vmatmul.mubr.msk.bf16.vlgmr.msra.gmra.mxu1 %vm180_vm0, %v9492_v52  ;;  %8565 = vmatmul.mubr.msk.bf16.vlgmr.msra.gmra.mxu0 %vm180_vm0, %v9496_v53  ;;  %12908 = vst [vmem:[#allocation7_spill] sm:$0xff] %v9647_v0 }
  0x23   :  { %8581 = vmatpush3.bf16.msra.mxu1 %v9130_v46  ;;  %8605 = vmatpush3.bf16.msra.mxu0 %v9131_v47  ;;  %v9138_v46 = vld [vmem:[%s12850_s1 + $0xb8] sm:$0xff]  }
  0x24   :  { %8544 = vmatprep.mubr.msk.bf16.mxu1 %vm180_vm0, %v9500_v54  ;;  %8568 = vmatprep.mubr.msk.bf16.mxu0 %vm180_vm0, %v9504_v55  ;;  %v9139_v47 = vld [vmem:[%s12850_s1 + $0xd8] sm:$0xff]  }
  0x25   :  { %8582 = vmatprep.subr.bf16.mxu1 %v9132_v60  ;;  %8606 = vmatprep.subr.bf16.mxu0 %v9133_v61 }
  0x27   :  { %8583 = vmatpush3.bf16.msra.mxu1 %v9132_v60  ;;  %8607 = vmatpush3.bf16.msra.mxu0 %v9133_v61  ;;  %v9635_v60 = vpack.c.bf16 %v9585_v23, %v9580_v22  ;;  %v9639_v61 = vpack.c.bf16 %v9595_v31, %v9590_v30  ;;  %v8048_v22 = vpack.c.bf16 %v9454_v44, %v9425_v37  ;;  %v9149_v37 = vld [vmem:[%s12850_s1 + $0x110] sm:$0xff]   ;;  %v9799_v44 = vld [vmem:[%s12851_s0 + $0x82] sm:$0xff] }
  0x28   :  { %8584 = vmatprep.subr.bf16.mxu1 %v9134_v2  ;;  %8608 = vmatprep.subr.bf16.mxu0 %v9135_v3 }
  0x2a   :  { %8545 = vmatmul.mubr.msk.bf16.gmra.mxu1 %vm180_vm0, %v9564_v5  ;;  %8569 = vmatmul.mubr.msk.bf16.gmra.mxu0 %vm180_vm0, %v9568_v8 }
  0x2b   :  { %8548 = vmatprep.mubr.msk.bf16.mxu1 %vm180_vm0, %v8020_v9  ;;  %8572 = vmatprep.mubr.msk.bf16.mxu0 %vm180_vm0, %v9572_v14  ;;  %v9666_v9 = vld [vmem:[%s12851_s0 + $0x102] sm:$0xff] }
  0x2c   :  { %8585 = vmatpush3.bf16.msra.mxu1 %v9134_v2  ;;  %8609 = vmatpush3.bf16.msra.mxu0 %v9135_v3  ;;  %v9652_v2 = vld [vmem:[%s12851_s0 + $0x100] sm:$0xff]  ;;  %v9657_v3 = vld [vmem:[%s12851_s0 + $0x110] sm:$0xff] }
  0x2d   :  { %8586 = vmatprep.subr.bf16.mxu1 %v9136_v15  ;;  %8610 = vmatprep.subr.bf16.mxu0 %v9137_v32  ;;  %v8039_v21 = vpack.c.bf16 %v6966_v13, %v9657_v3 }
  0x30   :  { %8587 = vmatpush3.bf16.msra.mxu1 %v9136_v15  ;;  %8611 = vmatpush3.bf16.msra.mxu0 %v9137_v32  ;;  %v9675_v15 = vld [vmem:[%s12851_s0 + $0x112] sm:$0xff]  ;;  %v9679_v32 = vpack.c.bf16 %v9657_v3, %v9652_v2 }
  0x31   :  { %8628 = vmatprep.subr.bf16.mxu1 %v9138_v46  ;;  %8652 = vmatprep.subr.bf16.mxu0 %v9139_v47  ;;  %v9683_v14 = vpack.c.bf16 %v9675_v15, %v9666_v9  ;;  %v9874_v3 = vld [vmem:[%s12851_s0 + $0x91] sm:$0xff] }
  0x32   :  { %8549 = vmatmul.mubr.msk.bf16.gmra.mxu1 %vm180_vm0, %v9635_v60  ;;  %8573 = vmatmul.mubr.msk.bf16.gmra.mxu0 %vm180_vm0, %v9639_v61 }
  0x33   :  { %8552 = vmatprep.mubr.msk.bf16.mxu1 %vm180_vm0, %v9643_v62  ;;  %8576 = vmatprep.mubr.msk.bf16.mxu0 %vm180_vm0, %v9647_v0  ;;  %v8041_v0 = vpack.c.bf16 %v9330_v16, %v9309_v11  ;;  %v9714_v11 = vld [vmem:[%s12851_s0 + $0x80] sm:$0xff] }
  0x34   :  { %v9719_v16 = vld [vmem:[%s12851_s0 + $0x81] sm:$0xff] }
  0x3a   :  { %8553 = vmatmul.mubr.msk.bf16.gmra.mxu1 %vm180_vm0, %v9679_v32  ;;  %8577 = vmatmul.mubr.msk.bf16.gmra.mxu0 %vm180_vm0, %v9683_v14 }
  0x3b   :  { %8588 = vmatprep.mubr.msk.bf16.mxu1 %vm180_vm0, %v8032_v6  ;;  %8612 = vmatprep.mubr.msk.bf16.mxu0 %vm180_vm0, %v8040_v41  ;;  %v9141_v6 = vld [vmem:[%s12850_s1 + $0xd0] sm:$0xff]   ;;  %v8043_v41 = vpack.c.bf16 %v9719_v16, %v9381_v27  ;;  %v8037_v27 = vpack.c.bf16 %v9607_v36, %v9585_v23  ;;  %v8049_v23 = vpack.c.bf16 %v9480_v50, %v9459_v45 }
  0x3c   :  { %v8050_v36 = vpack.c.bf16 %v9519_v58, %v9488_v51  ;;  %v7090_v45 = vld [vmem:[%s12851_s0 + $0x90] sm:$0xff]  ;;  %v9150_v51 = vld [vmem:[%s12850_s1 + $0xe8] sm:$0xff]  }
  0x3d   :  { %v8059_v58 = vpack.c.bf16 %v7090_v45, %v9714_v11  ;;  %v7307_v45 = vld [vmem:[%s12851_s0 + $0x12] sm:$0xff] }
  0x42   :  { %8589 = vmatmul.mubr.msk.bf16.vlgmr.msra.gmra.mxu1 %vm180_vm0, %v8033_v34  ;;  %8613 = vmatmul.mubr.msk.bf16.vlgmr.msra.gmra.mxu0 %vm180_vm0, %v8041_v0  ;;  %v8035_v34 = vpack.c.bf16 %v9714_v11, %v9514_v57  ;;  %v8038_v57 = vpack.c.bf16 %v9652_v2, %v9612_v38  ;;  %v9152_v38 = vld [vmem:[%s12850_s1 + $0xe0] sm:$0xff]   ;;  %v7098_v0 = vld [vmem:[%s12851_s0 + $0x130] sm:$0xff]  ;;  %v9162_v11 = vld [vmem:[%s12852_s2 + $0x58] sm:$0xff]  }
  0x43   :  { %8629 = vmatpush3.bf16.msra.mxu1 %v9138_v46  ;;  %8653 = vmatpush3.bf16.msra.mxu0 %v9139_v47  ;;  %v9153_v46 = vld [vmem:[%s12850_s1 + $0x100] sm:$0xff]   ;;  %v8054_v47 = vpack.c.bf16 %v9666_v9, %v9625_v40  ;;  %v8063_v40 = vpack.c.bf16 %v7098_v0, %v6966_v13  ;;  %v9157_v2 = vld [vmem:[%s12852_s2 + $0x10] sm:$0xff]  }
  0x44   :  { %8592 = vmatprep.mubr.msk.bf16.mxu1 %vm180_vm0, %v8034_v35  ;;  %8616 = vmatprep.mubr.msk.bf16.mxu0 %vm180_vm0, %v8042_v4  ;;  %v7178_v9 = vld [vmem:[%s12851_s0 + $0x92] sm:$0xff]  ;;  %v8067_v35 = vpack.c.bf16 %v9874_v3, %v9719_v16 }
  0x45   :  { %8630 = vmatprep.subr.bf16.mxu1 %v9140_v10  ;;  %8654 = vmatprep.subr.bf16.mxu0 %v9141_v6  ;;  %v9892_v4 = vpack.c.bf16 %v7178_v9, %v9799_v44  ;;  %v9991_v13 = vld [vmem:[%s12851_s0 + $0xd1] sm:$0xff] }
  0x46   :  { %v10135_v9 = vld [vmem:[%s12851_s0 + $0x72] sm:$0xff] }
  0x47   :  { %8631 = vmatpush3.bf16.msra.mxu1 %v9140_v10  ;;  %8655 = vmatpush3.bf16.msra.mxu0 %v9141_v6  ;;  %v9160_v10 = vld [vmem:[%s12852_s2 + $0x20] sm:$0xff]  }
  0x48   :  { %8632 = vmatprep.subr.bf16.mxu1 %v9142_v17  ;;  %8656 = vmatprep.subr.bf16.mxu0 %v9143_v26  ;;  %v9161_v6 = vld [vmem:[%s12852_s2] sm:$0xff]  }
  0x4a   :  { %8593 = vmatmul.mubr.msk.bf16.gmra.mxu1 %vm180_vm0, %v8035_v34  ;;  %8617 = vmatmul.mubr.msk.bf16.gmra.mxu0 %vm180_vm0, %v8043_v41  ;;  %v9924_v34 = vld [vmem:[%s12851_s0 + $0x131] sm:$0xff] }
  0x4b   :  { %8596 = vmatprep.mubr.msk.bf16.mxu1 %vm180_vm0, %v8036_v42  ;;  %8620 = vmatprep.mubr.msk.bf16.mxu0 %vm180_vm0, %v8044_v43  ;;  %v7186_v41 = vld [vmem:[%s12851_s0 + $0x132] sm:$0xff] }
  0x4c   :  { %8633 = vmatpush3.bf16.msra.mxu1 %v9142_v17  ;;  %8657 = vmatpush3.bf16.msra.mxu0 %v9143_v26  ;;  %v9163_v17 = vld [vmem:[%s12852_s2 + $0x78] sm:$0xff]   ;;  %v12910_v26 = vld [vmem:[#allocation4_spill] sm:$0xff] }
  0x4d   :  { %8634 = vmatprep.subr.bf16.mxu1 %v9144_v48  ;;  %8658 = vmatprep.subr.bf16.mxu0 %v9145_v49  ;;  %v12911_v43 = vld [vmem:[#allocation5_spill] sm:$0xff] }
  0x50   :  { %8635 = vmatpush3.bf16.msra.mxu1 %v9144_v48  ;;  %8659 = vmatpush3.bf16.msra.mxu0 %v9145_v49  ;;  %v12912_v48 = vld [vmem:[#allocation3_spill] sm:$0xff]  ;;  %v9164_v49 = vld [vmem:[%s12852_s2 + $0x50] sm:$0xff]  }
  0x51   :  { %8676 = vmatprep.subr.bf16.mxu1 %v9146_v7  ;;  %8700 = vmatprep.subr.bf16.mxu0 %v9147_v12 }
  0x52   :  { %8597 = vmatmul.mubr.msk.bf16.gmra.mxu1 %vm180_vm0, %v8037_v27  ;;  %8621 = vmatmul.mubr.msk.bf16.gmra.mxu0 %vm180_vm0, %v8045_v56  ;;  %v9961_v27 = vld [vmem:[%s12851_s0 + $0xb1] sm:$0xff]  ;;  %v9169_v56 = vld [vmem:[%s12852_s2 + $0x60] sm:$0xff]  }
  0x53   :  { %8600 = vmatprep.mubr.msk.bf16.mxu1 %vm180_vm0, %v8038_v57  ;;  %8624 = vmatprep.mubr.msk.bf16.mxu0 %vm180_vm0, %v8046_v63  ;;  %v12913_v57 = vld [vmem:[#allocation6_spill] sm:$0xff]  ;;  %v9986_v63 = vld [vmem:[%s12851_s0 + $0xc1] sm:$0xff] }
  0x5a   :  { %8601 = vmatmul.mubr.msk.bf16.gmra.mxu1 %vm180_vm0, %v8039_v21  ;;  %8625 = vmatmul.mubr.msk.bf16.gmra.mxu0 %vm180_vm0, %v8047_v28  ;;  %v9170_v21 = vld [vmem:[%s12852_s2 + $0x98] sm:$0xff]  }
  0x5b   :  { %8636 = vmatprep.mubr.msk.bf16.mxu1 %vm180_vm0, %v8048_v22  ;;  %8660 = vmatprep.mubr.msk.bf16.mxu0 %vm180_vm0, %v9492_v52  ;;  %v9151_v52 = vld [vmem:[%s12850_s1 + $0x108] sm:$0xff]   ;;  %v9171_v28 = vld [vmem:[%s12852_s2 + $0xb8] sm:$0xff]   ;;  %v10011_v22 = vpack.c.bf16 %v9991_v13, %v9986_v63 }
  0x62   :  { %8637 = vmatmul.mubr.msk.bf16.vlgmr.msra.gmra.mxu1 %vm180_vm0, %v8049_v23  ;;  %8661 = vmatmul.mubr.msk.bf16.vlgmr.msra.gmra.mxu0 %vm180_vm0, %v9500_v54  ;;  %v8051_v54 = vpack.c.bf16 %v9799_v44, %v9524_v59  ;;  %v9154_v59 = vld [vmem:[%s12852_s2 + $0x38] sm:$0xff]  }
  0x63   :  { %8677 = vmatpush3.bf16.msra.mxu1 %v9146_v7  ;;  %8701 = vmatpush3.bf16.msra.mxu0 %v9147_v12  ;;  %v9165_v7 = vld [vmem:[%s12852_s2 + $0x70] sm:$0xff]   ;;  %v2300_v12 = vld [vmem:[%s12851_s0 + $0xa1] sm:$0xff] }
  0x64   :  { %8640 = vmatprep.mubr.msk.bf16.mxu1 %vm180_vm0, %v8050_v36  ;;  %8664 = vmatprep.mubr.msk.bf16.mxu0 %vm180_vm0, %v9564_v5  ;;  %v8052_v5 = vpack.c.bf16 %v9590_v30, %v9550_v1  ;;  %v9155_v1 = vld [vmem:[%s12852_s2 + $0x18] sm:$0xff]   ;;  %v8053_v30 = vpack.c.bf16 %v9617_v39, %v9595_v31  ;;  %v10028_v36 = vld [vmem:[%s12851_s0 + $0x101] sm:$0xff] }
  0x65   :  { %8678 = vmatprep.subr.bf16.mxu1 %v9148_v29  ;;  %8702 = vmatprep.subr.bf16.mxu0 %v9149_v37 }
  0x67   :  { %8679 = vmatpush3.bf16.msra.mxu1 %v9148_v29  ;;  %8703 = vmatpush3.bf16.msra.mxu0 %v9149_v37  ;;  %v10033_v29 = vld [vmem:[%s12851_s0 + $0x111] sm:$0xff]  ;;  %v10041_v37 = vld [vmem:[%s12851_s0 + $0x21] sm:$0xff] }
  0x68   :  { %8680 = vmatprep.subr.bf16.mxu1 %v9150_v51  ;;  %8704 = vmatprep.subr.bf16.mxu0 %v9151_v52 }
  0x6a   :  { %8641 = vmatmul.mubr.msk.bf16.gmra.mxu1 %vm180_vm0, %v8051_v54  ;;  %8665 = vmatmul.mubr.msk.bf16.gmra.mxu0 %vm180_vm0, %v8059_v58 }
  0x6b   :  { %8644 = vmatprep.mubr.msk.bf16.mxu1 %vm180_vm0, %v8052_v5  ;;  %8668 = vmatprep.mubr.msk.bf16.mxu0 %vm180_vm0, %v9635_v60  ;;  %v9842_v60 = vld [vmem:[%s12851_s0 + $0x122] sm:$0xff]  ;;  %v10072_v5 = vld [vmem:[%s12851_s0 + $0x31] sm:$0xff] }
  0x6c   :  { %8681 = vmatpush3.bf16.msra.mxu1 %v9150_v51  ;;  %8705 = vmatpush3.bf16.msra.mxu0 %v9151_v52  ;;  %v8055_v31 = vpack.c.bf16 %v9842_v60, %v9675_v15  ;;  %v9158_v15 = vld [vmem:[%s12852_s2 + $0x28] sm:$0xff]   ;;  %v9932_v42 = vpack.c.bf16 %v7186_v41, %v9842_v60  ;;  %v10053_v52 = vpack.c.bf16 %v10033_v29, %v10028_v36  ;;  %v10186_v41 = vld [vmem:[%s12851_s0 + $0xf2] sm:$0xff] }
  0x6d   :  { %8682 = vmatprep.subr.bf16.mxu1 %v9152_v38  ;;  %8706 = vmatprep.subr.bf16.mxu0 %v9153_v46  ;;  %v10049_v51 = vld [vmem:[%s12851_s0 + $0x22] sm:$0xff] }
  0x6e   :  { %v10059_v58 = vpack.c.bf16 %v10049_v51, %v7307_v45 }
  0x70   :  { %8683 = vmatpush3.bf16.msra.mxu1 %v9152_v38  ;;  %8707 = vmatpush3.bf16.msra.mxu0 %v9153_v46  ;;  %v10077_v38 = vld [vmem:[%s12851_s0 + $0x41] sm:$0xff]  ;;  %v10087_v46 = vld [vmem:[%s12851_s0 + $0x51] sm:$0xff] }
  0x71   :  { %8724 = vmatprep.subr.bf16.mxu1 %v9154_v59  ;;  %8748 = vmatprep.subr.bf16.mxu0 %v9155_v1 }
  0x72   :  { %8645 = vmatmul.mubr.msk.bf16.gmra.mxu1 %vm180_vm0, %v8053_v30  ;;  %8669 = vmatmul.mubr.msk.bf16.gmra.mxu0 %vm180_vm0, %v9643_v62  ;;  %v9156_v62 = vld [vmem:[%s12852_s2 + $0x30] sm:$0xff]   ;;  %v10102_v30 = vld [vmem:[%s12851_s0 + $0x62] sm:$0xff] }
  0x73   :  { %8648 = vmatprep.mubr.msk.bf16.mxu1 %vm180_vm0, %v8054_v47  ;;  %8672 = vmatprep.mubr.msk.bf16.mxu0 %vm180_vm0, %v9679_v32  ;;  %v9159_v32 = vld [vmem:[%s12852_s2 + $0x8] sm:$0xff]   ;;  %v10106_v47 = vpack.c.bf16 %v10077_v38, %v10072_v5 }
  0x7a   :  { %8649 = vmatmul.mubr.msk.bf16.gmra.mxu1 %vm180_vm0, %v8055_v31  ;;  %8673 = vmatmul.mubr.msk.bf16.gmra.mxu0 %vm180_vm0, %v8063_v40 }
  0x7b   :  { %8684 = vmatprep.mubr.msk.bf16.mxu1 %vm180_vm0, %v9344_v19  ;;  %8708 = vmatprep.mubr.msk.bf16.mxu0 %vm180_vm0, %v9496_v53 }
  0x82   :  { %8685 = vmatmul.mubr.msk.bf16.vlgmr.msra.gmra.mxu1 %vm180_vm0, %v9363_v24  ;;  %8709 = vmatmul.mubr.msk.bf16.vlgmr.msra.gmra.mxu0 %vm180_vm0, %v9504_v55 }
  0x83   :  { %8725 = vmatpush3.bf16.msra.mxu1 %v9154_v59  ;;  %8749 = vmatpush3.bf16.msra.mxu0 %v9155_v1  ;;  %v10092_v59 = vld [vmem:[%s12851_s0 + $0x61] sm:$0xff]  ;;  %v10097_v1 = vld [vmem:[%s12851_s0 + $0x52] sm:$0xff] }
  0x84   :  { %8688 = vmatprep.mubr.msk.bf16.mxu1 %vm180_vm0, %v9408_v33  ;;  %8712 = vmatprep.mubr.msk.bf16.mxu0 %vm180_vm0, %v9568_v8  ;;  %v10112_v31 = vpack.c.bf16 %v10092_v59, %v10087_v46  ;;  %v10116_v40 = vpack.c.bf16 %v10102_v30, %v10097_v1 }
  0x85   :  { %8726 = vmatprep.subr.bf16.mxu1 %v9156_v62  ;;  %8750 = vmatprep.subr.bf16.mxu0 %v9157_v2 }
  0x87   :  { %8727 = vmatpush3.bf16.msra.mxu1 %v9156_v62  ;;  %8751 = vmatpush3.bf16.msra.mxu0 %v9157_v2  ;;  %v9172_v62 = vld [vmem:[%s12852_s2 + $0x90] sm:$0xff]  }
  0x88   :  { %8728 = vmatprep.subr.bf16.mxu1 %v9158_v15  ;;  %8752 = vmatprep.subr.bf16.mxu0 %v9159_v32  ;;  %v9173_v2 = vld [vmem:[%s12852_s2 + $0xb0] sm:$0xff]  }
  0x8a   :  { %8689 = vmatmul.mubr.msk.bf16.gmra.mxu1 %vm180_vm0, %v8067_v35  ;;  %8713 = vmatmul.mubr.msk.bf16.gmra.mxu0 %vm180_vm0, %v9892_v4  ;;  %v9174_v35 = vld [vmem:[%s12852_s2 + $0x88] sm:$0xff]  }
  0x8b   :  { %8692 = vmatprep.mubr.msk.bf16.mxu1 %vm180_vm0, %v9348_v20  ;;  %8716 = vmatprep.mubr.msk.bf16.mxu0 %vm180_vm0, %v9639_v61  ;;  %v12909_v20 = vld [vmem:[#allocation7_spill] sm:$0xff] }
  0x8c   :  { %8729 = vmatpush3.bf16.msra.mxu1 %v9158_v15  ;;  %8753 = vmatpush3.bf16.msra.mxu0 %v9159_v32  ;;  %v7315_v15 = vld [vmem:[%s12851_s0 + $0xb2] sm:$0xff]  ;;  %v10147_v32 = vld [vmem:[%s12851_s0 + $0xc2] sm:$0xff] }
  0x8d   :  { %8730 = vmatprep.subr.bf16.mxu1 %v9160_v10  ;;  %8754 = vmatprep.subr.bf16.mxu0 %v9161_v6 }
  0x90   :  { %8731 = vmatpush3.bf16.msra.mxu1 %v9160_v10  ;;  %8755 = vmatpush3.bf16.msra.mxu0 %v9161_v6  ;;  %v9175_v10 = vld [vmem:[%s12852_s2 + $0xa8] sm:$0xff]  }
  0x91   :  { %8772 = vmatprep.subr.bf16.mxu1 %v9162_v11  ;;  %8796 = vmatprep.subr.bf16.mxu0 %v9163_v17 }
  0x92   :  { %8693 = vmatmul.mubr.msk.bf16.gmra.mxu1 %vm180_vm0, %v9367_v25  ;;  %8717 = vmatmul.mubr.msk.bf16.gmra.mxu0 %vm180_vm0, %v12909_v20  ;;  %v8071_v25 = vpack.c.bf16 %v9924_v34, %v9771_v18 }
  0x93   :  { %8696 = vmatprep.mubr.msk.bf16.mxu1 %vm180_vm0, %v12910_v26  ;;  %8720 = vmatprep.mubr.msk.bf16.mxu0 %vm180_vm0, %v9683_v14  ;;  %v9176_v26 = vld [vmem:[%s12852_s2 + $0x80] sm:$0xff]  }
  0x9a   :  { %8697 = vmatmul.mubr.msk.bf16.gmra.mxu1 %vm180_vm0, %v8071_v25  ;;  %8721 = vmatmul.mubr.msk.bf16.gmra.mxu0 %vm180_vm0, %v9932_v42  ;;  %v10191_v25 = vld [vmem:[%s12851_s0 + $0x102] sm:$0xff] }
  0x9b   :  { %8732 = vmatprep.mubr.msk.bf16.mxu1 %vm180_vm0, %v12911_v43  ;;  %8756 = vmatprep.mubr.msk.bf16.mxu0 %vm180_vm0, %v12912_v48  ;;  %v9178_v43 = vld [vmem:[%s12853_s3 + $0x38] sm:$0xff]  }
  0x9c   :  { %v9179_v48 = vld [vmem:[%s12853_s3 + $0x18] sm:$0xff]  }
  0xa2   :  { %8733 = vmatmul.mubr.msk.bf16.vlgmr.msra.gmra.mxu1 %vm180_vm0, %v9496_v53  ;;  %8757 = vmatmul.mubr.msk.bf16.vlgmr.msra.gmra.mxu0 %vm180_vm0, %v9344_v19  ;;  %v9166_v19 = vld [vmem:[%s12852_s2 + $0x48] sm:$0xff]  }
  0xa3   :  { %8773 = vmatpush3.bf16.msra.mxu1 %v9162_v11  ;;  %8797 = vmatpush3.bf16.msra.mxu0 %v9163_v17  ;;  %v9167_v53 = vld [vmem:[%s12852_s2 + $0x68] sm:$0xff]   ;;  %v8107_v11 = vpack.c.bf16 %v9799_v44, %v10135_v9  ;;  %v10161_v17 = vpack.c.bf16 %v9986_v63, %v9961_v27  ;;  %v10181_v44 = vld [vmem:[%s12851_s0 + $0xd2] sm:$0xff]  ;;  %v8103_v63 = vpack.c.bf16 %v9771_v18, %v10033_v29 }
  0xa4   :  { %8736 = vmatprep.mubr.msk.bf16.mxu1 %vm180_vm0, %v9504_v55  ;;  %8760 = vmatprep.mubr.msk.bf16.mxu0 %vm180_vm0, %v9363_v24  ;;  %v8092_v55 = vpack.c.bf16 %v9961_v27, %v2300_v12  ;;  %v9168_v24 = vld [vmem:[%s12852_s2 + $0x40] sm:$0xff]   ;;  %v10211_v27 = vpack.c.bf16 %v10191_v25, %v10186_v41 }
  0xa5   :  { %8774 = vmatprep.subr.bf16.mxu1 %v9164_v49  ;;  %8798 = vmatprep.subr.bf16.mxu0 %v9165_v7 }
  0xa7   :  { %8775 = vmatpush3.bf16.msra.mxu1 %v9164_v49  ;;  %8799 = vmatpush3.bf16.msra.mxu0 %v9165_v7  ;;  %v8109_v7 = vpack.c.bf16 %v9617_v39, %v10181_v44  ;;  %v10225_v39 = vld [vmem:[%s12851_s0 + $0x112] sm:$0xff] }
  0xa8   :  { %8776 = vmatprep.subr.bf16.mxu1 %v9166_v19  ;;  %8800 = vmatprep.subr.bf16.mxu0 %v9167_v53 }
  0xaa   :  { %8737 = vmatmul.mubr.msk.bf16.gmra.mxu1 %vm180_vm0, %v9568_v8  ;;  %8761 = vmatmul.mubr.msk.bf16.gmra.mxu0 %vm180_vm0, %v9408_v33  ;;  %v9996_v33 = vld [vmem:[%s12851_s0 + $0xe1] sm:$0xff]  ;;  %v10001_v8 = vld [vmem:[%s12851_s0 + $0xf1] sm:$0xff] }
  0xab   :  { %8740 = vmatprep.mubr.msk.bf16.mxu1 %vm180_vm0, %v12913_v57  ;;  %8764 = vmatprep.mubr.msk.bf16.mxu0 %vm180_vm0, %v8092_v55  ;;  %v10015_v23 = vpack.c.bf16 %v10001_v8, %v9996_v33  ;;  %v10201_v49 = vpack.c.bf16 %v9996_v33, %v9991_v13  ;;  %v10207_v12 = vpack.c.bf16 %v10028_v36, %v10001_v8  ;;  %v10244_v36 = vld [vmem:[%s12851_s0 + $0x42] sm:$0xff] }
  0xac   :  { %8777 = vmatpush3.bf16.msra.mxu1 %v9166_v19  ;;  %8801 = vmatpush3.bf16.msra.mxu0 %v9167_v53  ;;  %v8111_v13 = vpack.c.bf16 %v9842_v60, %v10225_v39  ;;  %v8112_v33 = vpack.c.bf16 %v10072_v5, %v10041_v37  ;;  %12914 = vst [vmem:[#allocation7_spill] sm:$0xff] %v10244_v36 }
  0xad   :  { %8778 = vmatprep.subr.bf16.mxu1 %v9168_v24  ;;  %8802 = vmatprep.subr.bf16.mxu0 %v9169_v56  ;;  %v8113_v5 = vpack.c.bf16 %v10087_v46, %v10077_v38  ;;  %v9181_v38 = vld [vmem:[%s12853_s3 + $0x10] sm:$0xff]  }
  0xb0   :  { %8779 = vmatpush3.bf16.msra.mxu1 %v9168_v24  ;;  %8803 = vmatpush3.bf16.msra.mxu0 %v9169_v56 }
  0xb1   :  { %8820 = vmatprep.subr.bf16.mxu1 %v9170_v21  ;;  %8844 = vmatprep.subr.bf16.mxu0 %v9171_v28 }
  0xb2   :  { %8741 = vmatmul.mubr.msk.bf16.gmra.mxu1 %vm180_vm0, %v9639_v61  ;;  %8765 = vmatmul.mubr.msk.bf16.gmra.mxu0 %vm180_vm0, %v10011_v22  ;;  %v7263_v61 = vld [vmem:[%s12851_s0 + $0x11] sm:$0xff] }
  0xb3   :  { %8744 = vmatprep.mubr.msk.bf16.mxu1 %vm180_vm0, %v12909_v20  ;;  %8768 = vmatprep.mubr.msk.bf16.mxu0 %vm180_vm0, %v10015_v23  ;;  %v10056_v54 = vpack.c.bf16 %v10041_v37, %v7263_v61  ;;  %v10164_v20 = vpack.c.bf16 %v10147_v32, %v7315_v15 }
  0xba   :  { %8745 = vmatmul.mubr.msk.bf16.gmra.mxu1 %vm180_vm0, %v9683_v14  ;;  %8769 = vmatmul.mubr.msk.bf16.gmra.mxu0 %vm180_vm0, %v10053_v52  ;;  %v10082_v14 = vld [vmem:[%s12851_s0 + $0x32] sm:$0xff] }
  0xbb   :  { %8780 = vmatprep.mubr.msk.bf16.mxu1 %vm180_vm0, %v10056_v54  ;;  %8804 = vmatprep.mubr.msk.bf16.mxu0 %vm180_vm0, %v10059_v58  ;;  %v8105_v0 = vpack.c.bf16 %v9480_v50, %v10082_v14  ;;  %v10130_v50 = vld [vmem:[%s12851_s0 + $0x71] sm:$0xff]  ;;  %v8120_v8 = vpack.c.bf16 %v10082_v14, %v10049_v51 }
  0xbc   :  { %v8099_v6 = vpack.c.bf16 %v9719_v16, %v10130_v50  ;;  %v9177_v16 = vld [vmem:[%s12852_s2 + $0xa0] sm:$0xff]  }
  0xc2   :  { %8781 = vmatmul.mubr.msk.bf16.vlgmr.msra.gmra.mxu1 %vm180_vm0, %v10106_v47  ;;  %8805 = vmatmul.mubr.msk.bf16.vlgmr.msra.gmra.mxu0 %vm180_vm0, %v8105_v0  ;;  %v8121_v0 = vpack.c.bf16 %v10097_v1, %v10244_v36 }
  0xc3   :  { %8821 = vmatpush3.bf16.msra.mxu1 %v9170_v21  ;;  %8845 = vmatpush3.bf16.msra.mxu0 %v9171_v28 }
  0xc4   :  { %8784 = vmatprep.mubr.msk.bf16.mxu1 %vm180_vm0, %v10112_v31  ;;  %8808 = vmatprep.mubr.msk.bf16.mxu0 %vm180_vm0, %v10116_v40 }
  0xc5   :  { %8822 = vmatprep.subr.bf16.mxu1 %v9172_v62  ;;  %8846 = vmatprep.subr.bf16.mxu0 %v9173_v2 }
  0xc7   :  { %8823 = vmatpush3.bf16.msra.mxu1 %v9172_v62  ;;  %8847 = vmatpush3.bf16.msra.mxu0 %v9173_v2  ;;  %v9180_v62 = vld [vmem:[%s12853_s3 + $0x30] sm:$0xff]  }
  0xc8   :  { %8824 = vmatprep.subr.bf16.mxu1 %v9174_v35  ;;  %8848 = vmatprep.subr.bf16.mxu0 %v9175_v10 }
  0xca   :  { %8785 = vmatmul.mubr.msk.bf16.gmra.mxu1 %vm180_vm0, %v8099_v6  ;;  %8809 = vmatmul.mubr.msk.bf16.gmra.mxu0 %vm180_vm0, %v8107_v11 }
  0xcb   :  { %8788 = vmatprep.mubr.msk.bf16.mxu1 %vm180_vm0, %v10161_v17  ;;  %8812 = vmatprep.mubr.msk.bf16.mxu0 %vm180_vm0, %v10164_v20 }
  0xcc   :  { %8825 = vmatpush3.bf16.msra.mxu1 %v9174_v35  ;;  %8849 = vmatpush3.bf16.msra.mxu0 %v9175_v10  ;;  %v8114_v35 = vpack.c.bf16 %v10130_v50, %v10092_v59  ;;  %v8122_v10 = vpack.c.bf16 %v10135_v9, %v10102_v30  ;;  %v10281_v59 = vld [vmem:[%s12851_s0 + $0x81] sm:$0xff] }
  0xcd   :  { %8826 = vmatprep.subr.bf16.mxu1 %v9176_v26  ;;  %8850 = vmatprep.subr.bf16.mxu0 %v9177_v16 }
  0xd0   :  { %8827 = vmatpush3.bf16.msra.mxu1 %v9176_v26  ;;  %8851 = vmatpush3.bf16.msra.mxu0 %v9177_v16  ;;  %v9182_v26 = vld [vmem:[%s12853_s3 + $0x28] sm:$0xff]  }
  0xd1   :  { %8868 = vmatprep.subr.bf16.mxu1 %v9178_v43  ;;  %8892 = vmatprep.subr.bf16.mxu0 %v9179_v48  ;;  %v9183_v16 = vld [vmem:[%s12853_s3 + $0x8] sm:$0xff]  }
  0xd2   :  { %v8518_v19 = vpop.f32.mrf.mxu0  ;;  %v10213_v53 = vpop.f32.mrf.mxu1  ;;  %8789 = vmatmul.mubr.msk.bf16.gmra.mxu1 %vm180_vm0, %v10201_v49  ;;  %8813 = vmatmul.mubr.msk.bf16.gmra.mxu0 %vm180_vm0, %v8109_v7 }
  0xd3   :  { %8792 = vmatprep.mubr.msk.bf16.mxu1 %vm180_vm0, %v10207_v12  ;;  %8816 = vmatprep.mubr.msk.bf16.mxu0 %vm180_vm0, %v10211_v27 }
  0xd4   :  { %v239_v55 = vpop.f32.mrf.mxu0  ;;  %v10227_v24 = vpop.f32.mrf.mxu1 }
  0xd6   :  { %v8519_v56 = vpop.f32.mrf.mxu0  ;;  %v10229_v57 = vpop.f32.mrf.mxu1 }
  0xd8   :  { %v242_v21 = vpop.f32.mrf.mxu0  ;;  %v10239_v28 = vpop.f32.mrf.mxu1 }
  0xda   :  { %v8522_v61 = vpop.f32.mrf.mxu0  ;;  %v10246_v45 = vpop.f32.mrf.mxu1  ;;  %8793 = vmatmul.mubr.msk.bf16.gmra.mxu1 %vm180_vm0, %v8103_v63  ;;  %8817 = vmatmul.mubr.msk.bf16.gmra.mxu0 %vm180_vm0, %v8111_v13  ;;  %v8115_v63 = vpack.c.bf16 %v9874_v3, %v10281_v59  ;;  %v9185_v3 = vld [vmem:[%s12853_s3] sm:$0xff]  }
  0xdb   :  { %8828 = vmatprep.mubr.msk.bf16.mxu1 %vm180_vm0, %v8112_v33  ;;  %8852 = vmatprep.mubr.msk.bf16.mxu0 %vm180_vm0, %v8120_v8  ;;  %v8124_v8 = vpack.c.bf16 %v10181_v44, %v10147_v32 }
  0xdc   :  { %v255_v18 = vpop.f32.mrf.mxu0  ;;  %v10252_v60 = vpop.f32.mrf.mxu1 }
  0xde   :  { %v10254_v37 = vpop.f32.mrf.mxu0  ;;  %v10256_v51 = vpop.f32.mrf.mxu1 }
  0xe0   :  { %v10265_v2 = vpop.f32.mrf.mxu0  ;;  %v10267_v15 = vpop.f32.mrf.mxu1 }
  0xe2   :  { %v8542_v46 = vpop.f32.mrf.mxu1  ;;  %v8566_v1 = vpop.f32.mrf.mxu0  ;;  %8829 = vmatmul.mubr.msk.bf16.vlgmr.msra.gmra.mxu1 %vm180_vm0, %v8113_v5  ;;  %8853 = vmatmul.mubr.msk.bf16.vlgmr.msra.gmra.mxu0 %vm180_vm0, %v8121_v0 }
  0xe3   :  { %v433_v6 = vadd.f32 %v8542_v46, %v8518_v19  ;;  %8869 = vmatpush3.bf16.msra.mxu1 %v9178_v43  ;;  %8893 = vmatpush3.bf16.msra.mxu0 %v9179_v48 }
  0xe4   :  { %v424_v11 = vpop.f32.mrf.mxu1  ;;  %v650_v30 = vpop.f32.mrf.mxu0  ;;  %8832 = vmatprep.mubr.msk.bf16.mxu1 %vm180_vm0, %v8114_v35  ;;  %8856 = vmatprep.mubr.msk.bf16.mxu0 %vm180_vm0, %v8122_v10  ;;  %v9184_v10 = vld [vmem:[%s12853_s3 + $0x20] sm:$0xff]  }
  0xe5   :  { %v10291_v43 = vadd.f32 %v8566_v1, %v433_v6  ;;  %v425_v48 = vadd.f32 %v424_v11, %v239_v55  ;;  %8870 = vmatprep.subr.bf16.mxu1 %v9180_v62  ;;  %8894 = vmatprep.subr.bf16.mxu0 %v9181_v38 }
  0xe6   :  { %v8543_v7 = vpop.f32.mrf.mxu1  ;;  %v8567_v19 = vpop.f32.mrf.mxu0 }
  0xe7   :  { %v10295_v13 = vadd.f32 %v650_v30, %v425_v48  ;;  %v436_v33 = vadd.f32 %v8543_v7, %v8519_v56  ;;  %8871 = vmatpush3.bf16.msra.mxu1 %v9180_v62  ;;  %8895 = vmatpush3.bf16.msra.mxu0 %v9181_v38  ;;  %v8126_v48 = vpack.c.bf16 %v10225_v39, %v10191_v25 }
  0xe8   :  { %v427_v5 = vpop.f32.mrf.mxu1  ;;  %v653_v0 = vpop.f32.mrf.mxu0  ;;  %8872 = vmatprep.subr.bf16.mxu1 %v9182_v26  ;;  %8896 = vmatprep.subr.bf16.mxu0 %v9183_v16 }
  0xe9   :  { %v10299_v55 = vadd.f32 %v8567_v19, %v436_v33  ;;  %v428_v35 = vadd.f32 %v427_v5, %v242_v21  ;;  %v10318_v21 = vld [vmem:[%s12851_s0 + $0xe2] sm:$0xff] }
  0xea   :  { %v8546_v56 = vpop.f32.mrf.mxu1  ;;  %v8570_v62 = vpop.f32.mrf.mxu0  ;;  %8833 = vmatmul.mubr.msk.bf16.gmra.mxu1 %vm180_vm0, %v8115_v63  ;;  %8857 = vmatmul.mubr.msk.bf16.gmra.mxu0 %vm180_vm0, %v9892_v4 }
  0xeb   :  { %v10310_v32 = vadd.f32 %v653_v0, %v428_v35  ;;  %v449_v38 = vadd.f32 %v8546_v56, %v8522_v61  ;;  %8836 = vmatprep.mubr.msk.bf16.mxu1 %vm180_vm0, %v10011_v22  ;;  %8860 = vmatprep.mubr.msk.bf16.mxu0 %vm180_vm0, %v8124_v8  ;;  %v10325_v22 = vld [vmem:[%s12853_s3 + $0x58] sm:$0xff]  }
  0xec   :  { %v440_v46 = vpop.f32.mrf.mxu1  ;;  %v666_v1 = vpop.f32.mrf.mxu0  ;;  %8873 = vmatpush3.bf16.msra.mxu1 %v9182_v26  ;;  %8897 = vmatpush3.bf16.msra.mxu0 %v9183_v16  ;;  %v10330_v61 = vld [vmem:[%s12853_s3 + $0x78] sm:$0xff]   ;;  %v8125_v26 = vpack.c.bf16 %v10186_v41, %v10318_v21 }
  0xed   :  { %v10320_v6 = vadd.f32 %v8570_v62, %v449_v38  ;;  %v441_v4 = vadd.f32 %v440_v46, %v255_v18  ;;  %8874 = vmatprep.subr.bf16.mxu1 %v9184_v10  ;;  %8898 = vmatprep.subr.bf16.mxu0 %v9185_v3 }
  0xee   :  { %v8547_v11 = vpop.f32.mrf.mxu1  ;;  %v8571_v30 = vpop.f32.mrf.mxu0 }
  0xef   :  { %v10334_v16 = vadd.f32 %v666_v1, %v441_v4  ;;  %v452_v18 = vadd.f32 %v8547_v11, %v10254_v37 }
  0xf0   :  { %v443_v7 = vpop.f32.mrf.mxu1  ;;  %v669_v19 = vpop.f32.mrf.mxu0  ;;  %8875 = vmatpush3.bf16.msra.mxu1 %v9184_v10  ;;  %8899 = vmatpush3.bf16.msra.mxu0 %v9185_v3 }
  0xf1   :  { %v10339_v63 = vadd.f32 %v8571_v30, %v452_v18  ;;  %v444_v33 = vadd.f32 %v443_v7, %v10265_v2  ;;  %8916 = vmatprep.subr.bf16.mxu1 %v10325_v22  ;;  %8940 = vmatprep.subr.bf16.mxu0 %v10330_v61  ;;  %v10356_v2 = vld [vmem:[%s12851_s0 + $0x121] sm:$0xff] }
  0xf2   :  { %v8550_v41 = vpop.f32.mrf.mxu1  ;;  %v8574_v8 = vpop.f32.mrf.mxu0  ;;  %8837 = vmatmul.mubr.msk.bf16.gmra.mxu1 %vm180_vm0, %v10015_v23  ;;  %8861 = vmatmul.mubr.msk.bf16.gmra.mxu0 %vm180_vm0, %v8125_v26  ;;  %v7455_v23 = vld [vmem:[%s12851_s0 + $0x10] sm:$0xff]  ;;  %v8119_v56 = vpack.c.bf16 %v9924_v34, %v10356_v2 }
  0xf3   :  { %v10347_v25 = vadd.f32 %v669_v19, %v444_v33  ;;  %v465_v37 = vadd.f32 %v8550_v41, %v10213_v53  ;;  %8840 = vmatprep.mubr.msk.bf16.mxu1 %vm180_vm0, %v10053_v52  ;;  %8864 = vmatprep.mubr.msk.bf16.mxu0 %vm180_vm0, %v8126_v48  ;;  %v10364_v53 = vld [vmem:[%s12851_s0 + $0x20] sm:$0xff] }
  0xf4   :  { %v456_v5 = vpop.f32.mrf.mxu1  ;;  %v682_v0 = vpop.f32.mrf.mxu0  ;;  %v8136_v46 = vpack.c.bf16 %v10364_v53, %v7455_v23  ;;  %v10408_v19 = vld [vmem:[%s12851_s0 + $0x60] sm:$0xff] }
  0xf5   :  { %v10366_v35 = vadd.f32 %v8574_v8, %v465_v37  ;;  %v457_v52 = vadd.f32 %v456_v5, %v10227_v24 }
  0xf6   :  { %v8551_v10 = vpop.f32.mrf.mxu1  ;;  %v8575_v3 = vpop.f32.mrf.mxu0 }
  0xf7   :  { %v10371_v62 = vadd.f32 %v682_v0, %v457_v52  ;;  %v468_v38 = vadd.f32 %v8551_v10, %v10229_v57  ;;  %v10390_v57 = vld [vmem:[%s12851_s0 + $0x30] sm:$0xff] }
  0xf8   :  { %v459_v1 = vpop.f32.mrf.mxu1  ;;  %v685_v4 = vpop.f32.mrf.mxu0 }
  0xf9   :  { %v10375_v11 = vadd.f32 %v8575_v3, %v468_v38  ;;  %v460_v30 = vadd.f32 %v459_v1, %v10239_v28  ;;  %v10395_v28 = vld [vmem:[%s12851_s0 + $0x40] sm:$0xff]  ;;  %v9188_v3 = vld [vmem:[%s12853_s3 + $0x50] sm:$0xff]  }
  0xfa   :  { %v8554_v26 = vpop.f32.mrf.mxu1  ;;  %v8578_v18 = vpop.f32.mrf.mxu0  ;;  %8841 = vmatmul.mubr.msk.bf16.gmra.mxu1 %vm180_vm0, %v8119_v56  ;;  %8865 = vmatmul.mubr.msk.bf16.gmra.mxu0 %vm180_vm0, %v9932_v42  ;;  %v8137_v8 = vpack.c.bf16 %v10395_v28, %v10390_v57  ;;  %v9189_v56 = vld [vmem:[%s12853_s3 + $0x70] sm:$0xff]   ;;  %v10445_v1 = vld [vmem:[%s12851_s0 + $0x80] sm:$0xff] }
  0xfb   :  { %v10381_v34 = vadd.f32 %v685_v4, %v460_v30  ;;  %v481_v24 = vadd.f32 %v8554_v26, %v10246_v45  ;;  %8876 = vmatprep.mubr.msk.bf16.mxu1 %vm180_vm0, %v10056_v54  ;;  %8900 = vmatprep.mubr.msk.bf16.mxu0 %vm180_vm0, %v8136_v46  ;;  %v10403_v54 = vld [vmem:[%s12851_s0 + $0x50] sm:$0xff]  ;;  %v9191_v26 = vld [vmem:[%s12853_s3 + $0x68] sm:$0xff]  }
  0xfc   :  { %v472_v42 = vpop.f32.mrf.mxu1  ;;  %v698_v48 = vpop.f32.mrf.mxu0  ;;  %v8138_v23 = vpack.c.bf16 %v10408_v19, %v10403_v54 }
  0xfd   :  { %v10397_v7 = vadd.f32 %v8578_v18, %v481_v24  ;;  %v473_v45 = vadd.f32 %v472_v42, %v10252_v60  ;;  %v8131_v24 = vpack.c.bf16 %v10281_v59, %v10130_v50  ;;  %v9193_v50 = vld [vmem:[%s12853_s3 + $0x60] sm:$0xff]  }
  0xfe   :  { %v8555_v33 = vpop.f32.mrf.mxu1  ;;  %v8579_v41 = vpop.f32.mrf.mxu0 }
  0xff   :  { %12915 = vst [vmem:[#allocation4_spill] sm:$0xff] %v10397_v7  ;;  %v10412_v37 = vadd.f32 %v698_v48, %v473_v45  ;;  %v484_v5 = vadd.f32 %v8555_v33, %v10256_v51  ;;  %v10874_v7 = vld [vmem:[%s12851_s0 + $0x121] sm:$0xff] }
 0x100   :  { %v475_v60 = vpop.f32.mrf.mxu1  ;;  %v701_v0 = vpop.f32.mrf.mxu0  ;;  %12985 = vst [vmem:[#allocation74_spill] sm:$0xff] %v10874_v7 }
 0x101   :  { %12916 = vst [vmem:[#allocation5_spill] sm:$0xff] %v10412_v37  ;;  %v10417_v52 = vadd.f32 %v8579_v41, %v484_v5  ;;  %v476_v10 = vadd.f32 %v475_v60, %v10267_v15  ;;  %v10440_v15 = vld [vmem:[%s12851_s0 + $0x70] sm:$0xff]  ;;  %v9192_v41 = vld [vmem:[%s12853_s3 + $0x40] sm:$0xff]  }
 0x102   :  { %v10426_v38 = vpop.f32.mrf.mxu1  ;;  %v10428_v51 = vpop.f32.mrf.mxu0  ;;  %8877 = vmatmul.mubr.msk.bf16.vlgmr.msra.gmra.mxu1 %vm180_vm0, %v10106_v47  ;;  %8901 = vmatmul.mubr.msk.bf16.vlgmr.msra.gmra.mxu0 %vm180_vm0, %v8137_v8  ;;  %v7463_v47 = vld [vmem:[%s12851_s0 + $0xb0] sm:$0xff]  ;;  %v8139_v42 = vpack.c.bf16 %v10445_v1, %v10440_v15  ;;  %v10504_v60 = vld [vmem:[%s12851_s0 + $0xe0] sm:$0xff] }
 0x103   :  { %12917 = vst [vmem:[#allocation3_spill] sm:$0xff] %v10417_v52  ;;  %v10433_v46 = vadd.f32 %v701_v0, %v476_v10  ;;  %8917 = vmatpush3.bf16.msra.mxu1 %v10325_v22  ;;  %8941 = vmatpush3.bf16.msra.mxu0 %v10330_v61  ;;  %v10460_v22 = vld [vmem:[%s12851_s0 + $0xc0] sm:$0xff]  ;;  %v9190_v61 = vld [vmem:[%s12853_s3 + $0x48] sm:$0xff]   ;;  %v10499_v5 = vld [vmem:[%s12851_s0 + $0xd0] sm:$0xff] }
 0x104   :  { %v10450_v4 = vpop.f32.mrf.mxu1  ;;  %v10452_v30 = vpop.f32.mrf.mxu0  ;;  %8880 = vmatprep.mubr.msk.bf16.mxu1 %vm180_vm0, %v10112_v31  ;;  %8904 = vmatprep.mubr.msk.bf16.mxu0 %vm180_vm0, %v8138_v23  ;;  %v8140_v48 = vpack.c.bf16 %v10460_v22, %v7463_v47  ;;  %v10518_v10 = vld [vmem:[%s12851_s0 + $0x100] sm:$0xff] }
 0x105   :  { %12918 = vst [vmem:[#allocation6_spill] sm:$0xff] %v10433_v46  ;;  %8918 = vmatprep.subr.bf16.mxu1 %v9188_v3  ;;  %8942 = vmatprep.subr.bf16.mxu0 %v9189_v56 }
 0x106   :  { %v10468_v18 = vpop.f32.mrf.mxu1  ;;  %v10470_v31 = vpop.f32.mrf.mxu0 }
 0x107   :  { %8919 = vmatpush3.bf16.msra.mxu1 %v9188_v3  ;;  %8943 = vmatpush3.bf16.msra.mxu0 %v9189_v56  ;;  %v9194_v3 = vld [vmem:[%s12853_s3 + $0x98] sm:$0xff]  }
 0x108   :  { %v10477_v45 = vpop.f32.mrf.mxu1  ;;  %v10479_v33 = vpop.f32.mrf.mxu0  ;;  %8920 = vmatprep.subr.bf16.mxu1 %v9190_v61  ;;  %8944 = vmatprep.subr.bf16.mxu0 %v9191_v26  ;;  %v9195_v56 = vld [vmem:[%s12853_s3 + $0xb8] sm:$0xff]  }
 0x109   :  { %12919 = vst [vmem:[#allocation8_spill] sm:$0xff] %v10479_v33 }
 0x10a   :  { %v10487_v59 = vpop.f32.mrf.mxu1  ;;  %v10489_v8 = vpop.f32.mrf.mxu0  ;;  %8881 = vmatmul.mubr.msk.bf16.gmra.mxu1 %vm180_vm0, %v8131_v24  ;;  %8905 = vmatmul.mubr.msk.bf16.gmra.mxu0 %vm180_vm0, %v8139_v42 }
 0x10b   :  { %12920 = vst [vmem:[#allocation9_spill] sm:$0xff] %v10489_v8  ;;  %8884 = vmatprep.mubr.msk.bf16.mxu1 %vm180_vm0, %v10161_v17  ;;  %8908 = vmatprep.mubr.msk.bf16.mxu0 %vm180_vm0, %v8140_v48  ;;  %v10513_v17 = vld [vmem:[%s12851_s0 + $0xf0] sm:$0xff] }
 0x10c   :  { %v10506_v0 = vpop.f32.mrf.mxu1  ;;  %v10508_v23 = vpop.f32.mrf.mxu0  ;;  %8921 = vmatpush3.bf16.msra.mxu1 %v9190_v61  ;;  %8945 = vmatpush3.bf16.msra.mxu0 %v9191_v26  ;;  %v8141_v26 = vpack.c.bf16 %v10504_v60, %v10499_v5  ;;  %v8142_v24 = vpack.c.bf16 %v10518_v10, %v10513_v17 }
 0x10d   :  { %12921 = vst [vmem:[#allocation10_spill] sm:$0xff] %v10508_v23  ;;  %8922 = vmatprep.subr.bf16.mxu1 %v9192_v41  ;;  %8946 = vmatprep.subr.bf16.mxu0 %v9193_v50 }
 0x10e   :  { %v10526_v47 = vpop.f32.mrf.mxu1  ;;  %v10528_v61 = vpop.f32.mrf.mxu0 }
 0x10f   :  { %12922 = vst [vmem:[#allocation11_spill] sm:$0xff] %v10528_v61 }
 0x110   :  { %v10534_v42 = vpop.f32.mrf.mxu1  ;;  %v10536_v48 = vpop.f32.mrf.mxu0  ;;  %8923 = vmatpush3.bf16.msra.mxu1 %v9192_v41  ;;  %8947 = vmatpush3.bf16.msra.mxu0 %v9193_v50  ;;  %v10551_v41 = vld [vmem:[%s12851_s0 + $0x110] sm:$0xff]  ;;  %v10556_v50 = vld [vmem:[%s12851_s0 + $0x120] sm:$0xff] }
 0x111   :  { %12923 = vst [vmem:[#allocation12_spill] sm:$0xff] %v10536_v48  ;;  %8964 = vmatprep.subr.bf16.mxu1 %v9194_v3  ;;  %8988 = vmatprep.subr.bf16.mxu0 %v9195_v56  ;;  %v8152_v48 = vpack.c.bf16 %v10390_v57, %v10364_v53 }
 0x112   :  { %v10538_v46 = vpop.f32.mrf.mxu1  ;;  %v10540_v52 = vpop.f32.mrf.mxu0  ;;  %8885 = vmatmul.mubr.msk.bf16.gmra.mxu1 %vm180_vm0, %v10201_v49  ;;  %8909 = vmatmul.mubr.msk.bf16.gmra.mxu0 %vm180_vm0, %v8141_v26 }
 0x113   :  { %12924 = vst [vmem:[#allocation13_spill] sm:$0xff] %v10540_v52  ;;  %8888 = vmatprep.mubr.msk.bf16.mxu1 %vm180_vm0, %v10207_v12  ;;  %8912 = vmatprep.mubr.msk.bf16.mxu0 %vm180_vm0, %v8142_v24  ;;  %v8135_v12 = vpack.c.bf16 %v10356_v2, %v10033_v29  ;;  %v8143_v24 = vpack.c.bf16 %v10556_v50, %v10551_v41 }
 0x114   :  { %v10558_v37 = vpop.f32.mrf.mxu1  ;;  %v10560_v49 = vpop.f32.mrf.mxu0 }
 0x115   :  { %12925 = vst [vmem:[#allocation14_spill] sm:$0xff] %v10560_v49 }
 0x116   :  { %v10562_v26 = vpop.f32.mrf.mxu1  ;;  %v10564_v52 = vpop.f32.mrf.mxu0 }
 0x117   :  { %12926 = vst [vmem:[#allocation15_spill] sm:$0xff] %v10564_v52  ;;  %v10824_v52 = vld [vmem:[%s12851_s0 + $0x101] sm:$0xff] }
 0x118   :  { %v10572_v61 = vpop.f32.mrf.mxu1  ;;  %v10574_v23 = vpop.f32.mrf.mxu0  ;;  %12974 = vst [vmem:[#allocation63_spill] sm:$0xff] %v10824_v52 }
 0x119   :  { %12927 = vst [vmem:[#allocation16_spill] sm:$0xff] %v10574_v23 }
 0x11a   :  { %v10576_v8 = vpop.f32.mrf.mxu1  ;;  %v10578_v49 = vpop.f32.mrf.mxu0  ;;  %8889 = vmatmul.mubr.msk.bf16.gmra.mxu1 %vm180_vm0, %v8135_v12  ;;  %8913 = vmatmul.mubr.msk.bf16.gmra.mxu0 %vm180_vm0, %v8143_v24  ;;  %v8153_v12 = vpack.c.bf16 %v10403_v54, %v10395_v28  ;;  %v10618_v28 = vld [vmem:[%s12851_s0 + $0x82] sm:$0xff]  ;;  %v7586_v54 = vld [vmem:[%s12851_s0 + $0x90] sm:$0xff] }
 0x11b   :  { %12928 = vst [vmem:[#allocation17_spill] sm:$0xff] %v10576_v8  ;;  %12929 = vst [vmem:[#allocation18_spill] sm:$0xff] %v10578_v49  ;;  %8924 = vmatprep.mubr.msk.bf16.mxu1 %vm180_vm0, %v10059_v58  ;;  %8948 = vmatprep.mubr.msk.bf16.mxu0 %vm180_vm0, %v8152_v48  ;;  %v8145_v49 = vpack.c.bf16 %v10244_v36, %v10082_v14  ;;  %v8154_v58 = vpack.c.bf16 %v10440_v15, %v10408_v19  ;;  %v9196_v48 = vld [vmem:[%s12853_s3 + $0x90] sm:$0xff]  }
 0x11c   :  { %v10585_v29 = vpop.f32.mrf.mxu1  ;;  %v10587_v2 = vpop.f32.mrf.mxu0 }
 0x11d   :  { %12930 = vst [vmem:[#allocation19_spill] sm:$0xff] %v10585_v29  ;;  %12931 = vst [vmem:[#allocation20_spill] sm:$0xff] %v10587_v2  ;;  %v10819_v29 = vld [vmem:[%s12851_s0 + $0xf2] sm:$0xff] }
 0x11e   :  { %v10589_v53 = vpop.f32.mrf.mxu1  ;;  %v10591_v57 = vpop.f32.mrf.mxu0  ;;  %12973 = vst [vmem:[#allocation62_spill] sm:$0xff] %v10819_v29 }
 0x11f   :  { %12932 = vst [vmem:[#allocation21_spill] sm:$0xff] %v10589_v53  ;;  %12933 = vst [vmem:[#allocation22_spill] sm:$0xff] %v10591_v57  ;;  %v9197_v57 = vld [vmem:[%s12853_s3 + $0xb0] sm:$0xff]  }
 0x120   :  { %v10597_v24 = vpop.f32.mrf.mxu1  ;;  %v10599_v23 = vpop.f32.mrf.mxu0 }
 0x121   :  { %12934 = vst [vmem:[#allocation23_spill] sm:$0xff] %v10597_v24  ;;  %12935 = vst [vmem:[#allocation24_spill] sm:$0xff] %v10599_v23  ;;  %v8147_v23 = vpack.c.bf16 %v10618_v28, %v10135_v9  ;;  %v9201_v9 = vld [vmem:[%s12853_s3 + $0xa0] sm:$0xff]  }
 0x122   :  { %v10609_v2 = vpop.f32.mrf.mxu1  ;;  %v10611_v14 = vpop.f32.mrf.mxu0  ;;  %8925 = vmatmul.mubr.msk.bf16.vlgmr.msra.gmra.mxu1 %vm180_vm0, %v8145_v49  ;;  %8949 = vmatmul.mubr.msk.bf16.vlgmr.msra.gmra.mxu0 %vm180_vm0, %v8153_v12 }
 0x123   :  { %12936 = vst [vmem:[#allocation25_spill] sm:$0xff] %v10609_v2  ;;  %12937 = vst [vmem:[#allocation26_spill] sm:$0xff] %v10611_v14  ;;  %8965 = vmatpush3.bf16.msra.mxu1 %v9194_v3  ;;  %8989 = vmatpush3.bf16.msra.mxu0 %v9195_v56  ;;  %v9198_v3 = vld [vmem:[%s12853_s3 + $0x88] sm:$0xff]  }
 0x124   :  { %v10623_v19 = vpop.f32.mrf.mxu1  ;;  %v10625_v15 = vpop.f32.mrf.mxu0  ;;  %8928 = vmatprep.mubr.msk.bf16.mxu1 %vm180_vm0, %v10116_v40  ;;  %8952 = vmatprep.mubr.msk.bf16.mxu0 %vm180_vm0, %v8154_v58  ;;  %v9199_v56 = vld [vmem:[%s12853_s3 + $0xa8] sm:$0xff]   ;;  %v8155_v40 = vpack.c.bf16 %v7586_v54, %v10445_v1  ;;  %v8156_v58 = vpack.c.bf16 %v10499_v5, %v10460_v22 }
 0x125   :  { %12938 = vst [vmem:[#allocation27_spill] sm:$0xff] %v10623_v19  ;;  %12939 = vst [vmem:[#allocation28_spill] sm:$0xff] %v10625_v15  ;;  %8966 = vmatprep.subr.bf16.mxu1 %v9196_v48  ;;  %8990 = vmatprep.subr.bf16.mxu0 %v9197_v57  ;;  %v10814_v14 = vld [vmem:[%s12851_s0 + $0xe2] sm:$0xff] }
 0x126   :  { %v10636_v49 = vpop.f32.mrf.mxu1  ;;  %v10638_v12 = vpop.f32.mrf.mxu0  ;;  %12972 = vst [vmem:[#allocation61_spill] sm:$0xff] %v10814_v14  ;;  %v10926_v36 = vpack.c.bf16 %v10819_v29, %v10814_v14  ;;  %v959_v29 = vadd.f32 %v10468_v18, %v10299_v55  ;;  %v962_v55 = vadd.f32 %v10487_v59, %v10320_v6  ;;  %v960_v18 = vadd.f32 %v10506_v0, %v10334_v16 }
 0x127   :  { %12940 = vst [vmem:[#allocation29_spill] sm:$0xff] %v10636_v49  ;;  %12941 = vst [vmem:[#allocation30_spill] sm:$0xff] %v10638_v12  ;;  %8967 = vmatpush3.bf16.msra.mxu1 %v9196_v48  ;;  %8991 = vmatpush3.bf16.msra.mxu0 %v9197_v57  ;;  %v9200_v12 = vld [vmem:[%s12853_s3 + $0x80] sm:$0xff]   ;;  %v10671_v48 = vld [vmem:[%s12854_s4 + $0x38] sm:$0xff]   ;;  %v964_v6 = vadd.f32 %v10558_v37, %v10371_v62  ;;  %v967_v16 = vadd.f32 %v10562_v26, %v10375_v11 }
 0x128   :  { %v10645_v15 = vpop.f32.mrf.mxu1  ;;  %v10647_v24 = vpop.f32.mrf.mxu0  ;;  %8968 = vmatprep.subr.bf16.mxu1 %v9198_v3  ;;  %8992 = vmatprep.subr.bf16.mxu0 %v9199_v56  ;;  %12948 = vst [vmem:[#allocation37_spill] sm:$0xff] %v10671_v48  ;;  %v1201_v59 = vadd.f32 %v10470_v31, %v959_v29  ;;  %v965_v0 = vadd.f32 %v10572_v61, %v10381_v34  ;;  %v12995_v34 = vld [vmem:[#allocation9_spill] sm:$0xff]  ;;  %v12996_v29 = vld [vmem:[#allocation10_spill] sm:$0xff]  ;;  %v13003_v31 = vld [vmem:[#allocation16_spill] sm:$0xff] }
 0x129   :  { %12942 = vst [vmem:[#allocation31_spill] sm:$0xff] %v10645_v15  ;;  %12943 = vst [vmem:[#allocation32_spill] sm:$0xff] %v10647_v24  ;;  %v10735_v24 = vld [vmem:[%s12851_s0 + $0x52] sm:$0xff]  ;;  %v1204_v61 = vadd.f32 %v12995_v34, %v962_v55 }
 0x12a   :  { %v10655_v1 = vpop.f32.mrf.mxu1  ;;  %v10657_v57 = vpop.f32.mrf.mxu0  ;;  %8929 = vmatmul.mubr.msk.bf16.gmra.mxu1 %vm180_vm0, %v8147_v23  ;;  %8953 = vmatmul.mubr.msk.bf16.gmra.mxu0 %vm180_vm0, %v8155_v40  ;;  %v10676_v23 = vld [vmem:[%s12854_s4 + $0x18] sm:$0xff]   ;;  %v8158_v40 = vpack.c.bf16 %v10551_v41, %v10518_v10  ;;  %12958 = vst [vmem:[#allocation47_spill] sm:$0xff] %v10735_v24  ;;  %v1207_v55 = vadd.f32 %v13003_v31, %v965_v0  ;;  %v13011_v31 = vld [vmem:[#allocation23_spill] sm:$0xff] }
 0x12b   :  { %12944 = vst [vmem:[#allocation33_spill] sm:$0xff] %v10655_v1  ;;  %12945 = vst [vmem:[#allocation34_spill] sm:$0xff] %v10657_v57  ;;  %8932 = vmatprep.mubr.msk.bf16.mxu1 %vm180_vm0, %v10164_v20  ;;  %8956 = vmatprep.mubr.msk.bf16.mxu0 %vm180_vm0, %v8156_v58  ;;  %v10691_v58 = vld [vmem:[%s12851_s0 + $0x122] sm:$0xff]  ;;  %v10730_v57 = vld [vmem:[%s12851_s0 + $0x51] sm:$0xff] }
 0x12c   :  { %v10664_v22 = vpop.f32.mrf.mxu1  ;;  %v10666_v5 = vpop.f32.mrf.mxu0  ;;  %8969 = vmatpush3.bf16.msra.mxu1 %v9198_v3  ;;  %8993 = vmatpush3.bf16.msra.mxu0 %v9199_v56  ;;  %12949 = vst [vmem:[#allocation38_spill] sm:$0xff] %v10676_v23  ;;  %v8149_v3 = vpack.c.bf16 %v10318_v21, %v10181_v44  ;;  %v8157_v56 = vpack.c.bf16 %v10513_v17, %v10504_v60  ;;  %v10701_v44 = vld [vmem:[%s12851_s0 + $0x21] sm:$0xff]  ;;  %v10706_v21 = vld [vmem:[%s12851_s0 + $0x31] sm:$0xff]  ;;  %12957 = vst [vmem:[#allocation46_spill] sm:$0xff] %v10730_v57 }
 0x12d   :  { %12946 = vst [vmem:[#allocation35_spill] sm:$0xff] %v10664_v22  ;;  %12947 = vst [vmem:[#allocation36_spill] sm:$0xff] %v10666_v5  ;;  %8970 = vmatprep.subr.bf16.mxu1 %v9200_v12  ;;  %8994 = vmatprep.subr.bf16.mxu0 %v9201_v9  ;;  %v10696_v5 = vld [vmem:[%s12851_s0 + $0x130] sm:$0xff]  ;;  %v10711_v60 = vld [vmem:[%s12851_s0 + $0x22] sm:$0xff]  ;;  %v10836_v33 = vpack.c.bf16 %v10706_v21, %v10701_v44 }
 0x12e   :  { %v10678_v20 = vpop.f32.mrf.mxu1  ;;  %v10680_v54 = vpop.f32.mrf.mxu0  ;;  %12952 = vst [vmem:[#allocation41_spill] sm:$0xff] %v10706_v21  ;;  %v10716_v17 = vld [vmem:[%s12851_s0 + $0x32] sm:$0xff]  ;;  %v8159_v19 = vpack.c.bf16 %v10696_v5, %v10556_v50  ;;  %v12993_v62 = vld [vmem:[#allocation27_spill] sm:$0xff] }
 0x12f   :  { %12950 = vst [vmem:[#allocation39_spill] sm:$0xff] %v10678_v20  ;;  %12951 = vst [vmem:[#allocation40_spill] sm:$0xff] %v10680_v54  ;;  %v10725_v54 = vld [vmem:[%s12851_s0 + $0x41] sm:$0xff]  ;;  %v7630_v22 = vld [vmem:[%s12851_s0 + $0x91] sm:$0xff]  ;;  %v10840_v2 = vpack.c.bf16 %v10716_v17, %v10711_v60 }
 0x130   :  { %12953 = vst [vmem:[#allocation42_spill] sm:$0xff] %v10716_v17  ;;  %v10718_v10 = vpop.f32.mrf.mxu1  ;;  %v10720_v41 = vpop.f32.mrf.mxu0  ;;  %8971 = vmatpush3.bf16.msra.mxu1 %v9200_v12  ;;  %8995 = vmatpush3.bf16.msra.mxu0 %v9201_v9  ;;  %12956 = vst [vmem:[#allocation45_spill] sm:$0xff] %v10725_v54  ;;  %v10740_v12 = vld [vmem:[%s12851_s0 + $0x61] sm:$0xff]  ;;  %v10745_v9 = vld [vmem:[%s12851_s0 + $0x71] sm:$0xff]  ;;  %v10859_v5 = vpack.c.bf16 %v10730_v57, %v10725_v54 }
 0x131   :  { %12954 = vst [vmem:[#allocation43_spill] sm:$0xff] %v10718_v10  ;;  %12955 = vst [vmem:[#allocation44_spill] sm:$0xff] %v10720_v41  ;;  %v10750_v41 = vld [vmem:[%s12851_s0 + $0x62] sm:$0xff]  ;;  %v10755_v10 = vld [vmem:[%s12851_s0 + $0x72] sm:$0xff]  ;;  %9012 = vmatprep.subr.bf16.mxu1 %v10671_v48  ;;  %9036 = vmatprep.subr.bf16.mxu0 %v10676_v23  ;;  %v10865_v21 = vpack.c.bf16 %v10745_v9, %v10740_v12 }
 0x132   :  { %12959 = vst [vmem:[#allocation48_spill] sm:$0xff] %v10740_v12  ;;  %12960 = vst [vmem:[#allocation49_spill] sm:$0xff] %v10745_v9  ;;  %v10762_v20 = vld [vmem:[%s12851_s0 + $0x81] sm:$0xff]  ;;  %v10770_v1 = vld [vmem:[%s12851_s0 + $0x92] sm:$0xff]  ;;  %v10772_v15 = vpop.f32.mrf.mxu1  ;;  %v10774_v53 = vpop.f32.mrf.mxu0  ;;  %8933 = vmatmul.mubr.msk.bf16.gmra.mxu1 %vm180_vm0, %v8149_v3  ;;  %8957 = vmatmul.mubr.msk.bf16.gmra.mxu0 %vm180_vm0, %v8157_v56  ;;  %v10869_v8 = vpack.c.bf16 %v10755_v10, %v10750_v41  ;;  %v958_v9 = vadd.f32 %v10426_v38, %v10291_v43 }
 0x133   :  { %12961 = vst [vmem:[#allocation50_spill] sm:$0xff] %v10750_v41  ;;  %12962 = vst [vmem:[#allocation51_spill] sm:$0xff] %v10755_v10  ;;  %v10781_v23 = vld [vmem:[%s12851_s0 + $0xc1] sm:$0xff]  ;;  %v10786_v48 = vld [vmem:[%s12851_s0 + $0xd1] sm:$0xff]  ;;  %8936 = vmatprep.mubr.msk.bf16.mxu1 %vm180_vm0, %v10211_v27  ;;  %8960 = vmatprep.mubr.msk.bf16.mxu0 %vm180_vm0, %v8158_v40  ;;  %v8151_v40 = vpack.c.bf16 %v10691_v58, %v10225_v39  ;;  %v956_v10 = vadd.f32 %v10450_v4, %v10295_v13 }
 0x134   :  { %12963 = vst [vmem:[#allocation52_spill] sm:$0xff] %v10762_v20  ;;  %12964 = vst [vmem:[#allocation53_spill] sm:$0xff] %v10772_v15  ;;  %v10791_v15 = vld [vmem:[%s12851_s0 + $0xc2] sm:$0xff]  ;;  %v10796_v3 = vld [vmem:[%s12851_s0 + $0xd2] sm:$0xff]  ;;  %v10826_v49 = vpop.f32.mrf.mxu1  ;;  %v10828_v27 = vpop.f32.mrf.mxu0  ;;  %v10914_v38 = vpack.c.bf16 %v10786_v48, %v10781_v23 }
 0x135   :  { %12965 = vst [vmem:[#allocation54_spill] sm:$0xff] %v10774_v53  ;;  %12966 = vst [vmem:[#allocation55_spill] sm:$0xff] %v10781_v23  ;;  %v10801_v56 = vld [vmem:[%s12851_s0 + $0xe1] sm:$0xff]  ;;  %v10806_v53 = vld [vmem:[%s12851_s0 + $0xf1] sm:$0xff]  ;;  %v10918_v4 = vpack.c.bf16 %v10796_v3, %v10791_v15 }
 0x136   :  { %12967 = vst [vmem:[#allocation56_spill] sm:$0xff] %v10786_v48  ;;  %12968 = vst [vmem:[#allocation57_spill] sm:$0xff] %v10791_v15  ;;  %v10850_v39 = vld [vmem:[%s12851_s0 + $0x102] sm:$0xff]  ;;  %v10855_v50 = vld [vmem:[%s12851_s0 + $0x112] sm:$0xff]  ;;  %v10888_v12 = vpop.f32.mrf.mxu1 }
 0x137   :  { %12969 = vst [vmem:[#allocation58_spill] sm:$0xff] %v10796_v3  ;;  %12970 = vst [vmem:[#allocation59_spill] sm:$0xff] %v10801_v56  ;;  %v7638_v57 = vld [vmem:[%s12851_s0 + $0x131] sm:$0xff]  ;;  %v10910_v13 = vld [vmem:[%s12851_s0 + $0x42] sm:$0xff]  ;;  %v10938_v3 = vpack.c.bf16 %v10855_v50, %v10850_v39 }
 0x138   :  { %12971 = vst [vmem:[#allocation60_spill] sm:$0xff] %v10806_v53  ;;  %12975 = vst [vmem:[#allocation64_spill] sm:$0xff] %v10826_v49  ;;  %v10845_v49 = vld [vmem:[%s12851_s0 + $0x111] sm:$0xff]  ;;  %v10941_v23 = vpack.c.bf16 %v7638_v57, %v10874_v7  ;;  %v1198_v57 = vadd.f32 %v10452_v30, %v956_v10  ;;  %v957_v7 = vadd.f32 %v10477_v45, %v10310_v32  ;;  %v13004_v34 = vld [vmem:[#allocation18_spill] sm:$0xff] }
 0x139   :  { %12976 = vst [vmem:[#allocation65_spill] sm:$0xff] %v10828_v27  ;;  %12977 = vst [vmem:[#allocation66_spill] sm:$0xff] %v10836_v33  ;;  %v10882_v27 = vld [vmem:[%s12851_s0 + $0x132] sm:$0xff]  ;;  %v10934_v48 = vpack.c.bf16 %v10845_v49, %v10824_v52  ;;  %v961_v32 = vadd.f32 %v10534_v42, %v10347_v25  ;;  %v966_v30 = vadd.f32 %v10538_v46, %v10366_v35  ;;  %v12992_v46 = vld [vmem:[#allocation8_spill] sm:$0xff] }
 0x13a   :  { %12978 = vst [vmem:[#allocation67_spill] sm:$0xff] %v10840_v2  ;;  %12979 = vst [vmem:[#allocation68_spill] sm:$0xff] %v10845_v49  ;;  %v10905_v43 = vld [vmem:[%s12851_s0 + $0x11] sm:$0xff]  ;;  %8937 = vmatmul.mubr.msk.bf16.gmra.mxu1 %vm180_vm0, %v8151_v40  ;;  %8961 = vmatmul.mubr.msk.bf16.gmra.mxu0 %vm180_vm0, %v8159_v19  ;;  %v1199_v10 = vadd.f32 %v12992_v46, %v957_v7  ;;  %v1440_v37 = vadd.f32 %v12993_v62, %v1198_v57  ;;  %v12999_v46 = vld [vmem:[#allocation12_spill] sm:$0xff] }
 0x13b   :  { %12980 = vst [vmem:[#allocation69_spill] sm:$0xff] %v10850_v39  ;;  %12981 = vst [vmem:[#allocation70_spill] sm:$0xff] %v10855_v50  ;;  %v1200_v50 = vadd.f32 %v10428_v51, %v958_v9  ;;  %v963_v51 = vadd.f32 %v10526_v47, %v10339_v63  ;;  %8972 = vmatprep.mubr.msk.bf16.mxu1 %vm180_vm0, %v10836_v33  ;;  %8996 = vmatprep.mubr.msk.bf16.mxu0 %vm180_vm0, %v10840_v2  ;;  %v12989_v47 = vld [vmem:[#allocation4_spill] sm:$0xff]  ;;  %v12990_v25 = vld [vmem:[#allocation17_spill] sm:$0xff] }
 0x13c   :  { %12982 = vst [vmem:[#allocation71_spill] sm:$0xff] %v10859_v5  ;;  %12983 = vst [vmem:[#allocation72_spill] sm:$0xff] %v10865_v21  ;;  %v10893_v21 = vpack.c.bf16 %v7630_v22, %v10762_v20  ;;  %v10900_v5 = vld [vmem:[%s12851_s0 + $0x12] sm:$0xff]  ;;  %v10922_v22 = vpack.c.bf16 %v10806_v53, %v10801_v56  ;;  %v10928_v20 = vpop.f32.mrf.mxu1  ;;  %v970_v42 = vadd.f32 %v12990_v25, %v12989_v47  ;;  %v12997_v25 = vld [vmem:[#allocation11_spill] sm:$0xff] }
 0x13d   :  { %12984 = vst [vmem:[#allocation73_spill] sm:$0xff] %v10869_v8  ;;  %v10890_v8 = vpop.f32.mrf.mxu0  ;;  %12987 = vst [vmem:[#allocation76_spill] sm:$0xff] %v10905_v43  ;;  %v12991_v19 = vld [vmem:[#allocation25_spill] sm:$0xff]  ;;  %v1202_v47 = vadd.f32 %v12996_v29, %v960_v18  ;;  %v1203_v57 = vadd.f32 %v12999_v46, %v961_v32  ;;  %v13001_v49 = vld [vmem:[#allocation14_spill] sm:$0xff] }
 0x13e   :  { %12986 = vst [vmem:[#allocation75_spill] sm:$0xff] %v10890_v8  ;;  %12988 = vst [vmem:[#allocation77_spill] sm:$0xff] %v10910_v13  ;;  %v10957_v53 = vpop.f32.mrf.mxu1  ;;  %v1442_v35 = vadd.f32 %v12991_v19, %v1200_v50  ;;  %v1205_v50 = vadd.f32 %v12997_v25, %v963_v51  ;;  %v12998_v19 = vld [vmem:[#allocation29_spill] sm:$0xff]  ;;  %v1206_v56 = vadd.f32 %v13001_v49, %v964_v6  ;;  %v13002_v2 = vld [vmem:[#allocation15_spill] sm:$0xff] }
 0x13f   :  { %v10930_v8 = vpop.f32.mrf.mxu0  ;;  %v1443_v7 = vadd.f32 %v12998_v19, %v1201_v59  ;;  %v13000_v62 = vld [vmem:[#allocation13_spill] sm:$0xff]  ;;  %v1209_v33 = vadd.f32 %v13002_v2, %v967_v16  ;;  %v11015_v18 = vadd.f32 %v13004_v34, %v970_v42  ;;  %v13006_v29 = vld [vmem:[#allocation19_spill] sm:$0xff]  ;;  %v13007_v25 = vld [vmem:[#allocation26_spill] sm:$0xff] }
 0x140   :  { %v10981_v45 = vpop.f32.mrf.mxu1  ;;  %v1208_v52 = vadd.f32 %v13000_v62, %v966_v30  ;;  %v13005_v51 = vld [vmem:[#allocation5_spill] sm:$0xff]  ;;  %v1685_v32 = vadd.f32 %v13007_v25, %v1442_v35  ;;  %v13008_v30 = vld [vmem:[#allocation3_spill] sm:$0xff]  ;;  %v13010_v0 = vld [vmem:[#allocation6_spill] sm:$0xff] }
 0x141   :  { %v10959_v39 = vpop.f32.mrf.mxu0  ;;  %v968_v59 = vadd.f32 %v13006_v29, %v13005_v51  ;;  %v9204_v49 = vld [vmem:[%s12854_s4 + $0x30] sm:$0xff]   ;;  %v969_v42 = vadd.f32 %v13011_v31, %v13010_v0  ;;  %v13014_v35 = vld [vmem:[#allocation7_spill] sm:$0xff]  ;;  %v13016_v25 = vld [vmem:[#allocation30_spill] sm:$0xff] }
 0x142   :  { %v10993_v9 = vpop.f32.mrf.mxu1  ;;  %v9205_v2 = vld [vmem:[%s12854_s4 + $0x10] sm:$0xff]   ;;  %v13015_v29 = vpack.c.bf16 %v10735_v24, %v13014_v35  ;;  %v1686_v15 = vadd.f32 %v13016_v25, %v1443_v7  ;;  %v13017_v41 = vld [vmem:[#allocation31_spill] sm:$0xff]  ;;  %v13019_v0 = vld [vmem:[#allocation38_spill] sm:$0xff] }
 0x143   :  { %v10983_v63 = vpop.f32.mrf.mxu0  ;;  %v13009_v6 = vld [vmem:[#allocation21_spill] sm:$0xff]  ;;  %v13012_v19 = vld [vmem:[#allocation28_spill] sm:$0xff]  ;;  %v13013_v51 = vld [vmem:[#allocation71_spill] sm:$0xff]  ;;  %v1441_v26 = vadd.f32 %v13017_v41, %v1199_v10 }
 0x144   :  { %v11009_v40 = vpop.f32.mrf.mxu1  ;;  %v971_v16 = vadd.f32 %v13009_v6, %v13008_v30  ;;  %v1683_v46 = vadd.f32 %v13012_v19, %v1440_v37  ;;  %8973 = vmatmul.mubr.msk.bf16.vlgmr.msra.gmra.mxu1 %vm180_vm0, %v13013_v51  ;;  %8997 = vmatmul.mubr.msk.bf16.vlgmr.msra.gmra.mxu0 %vm180_vm0, %v13015_v29  ;;  %v13018_v6 = vld [vmem:[#allocation37_spill] sm:$0xff]  ;;  %v13021_v19 = vld [vmem:[#allocation35_spill] sm:$0xff]  ;;  %v13023_v24 = vld [vmem:[#allocation72_spill] sm:$0xff] }
 0x145   :  { %v10995_v11 = vpop.f32.mrf.mxu0  ;;  %9013 = vmatpush3.bf16.msra.mxu1 %v13018_v6  ;;  %9037 = vmatpush3.bf16.msra.mxu0 %v13019_v0  ;;  %v13020_v37 = vld [vmem:[#allocation33_spill] sm:$0xff]  ;;  %v1444_v54 = vadd.f32 %v13021_v19, %v1202_v47  ;;  %v13022_v17 = vld [vmem:[#allocation39_spill] sm:$0xff]  ;;  %v13027_v29 = vld [vmem:[#allocation22_spill] sm:$0xff] }
 0x146   :  { %v8686_v62 = vpop.f32.mrf.mxu1  ;;  %v1446_v31 = vadd.f32 %v13020_v37, %v1204_v61  ;;  %v1447_v51 = vadd.f32 %v13022_v17, %v1205_v50  ;;  %8976 = vmatprep.mubr.msk.bf16.mxu1 %vm180_vm0, %v13023_v24  ;;  %v13024_v7 = vld [vmem:[#allocation73_spill] sm:$0xff]  ;;  %v9206_v41 = vld [vmem:[%s12854_s4 + $0x28] sm:$0xff]   ;;  %9014 = vmatprep.subr.bf16.mxu1 %v9204_v49  ;;  %v11061_v25 = vadd.f32 %v13027_v29, %v971_v16 }
 0x147   :  { %v11011_v14 = vpop.f32.mrf.mxu0  ;;  %v1927_v30 = vadd.f32 %v8686_v62, %v1685_v32  ;;  %9000 = vmatprep.mubr.msk.bf16.mxu0 %vm180_vm0, %v13024_v7  ;;  %v9207_v10 = vld [vmem:[%s12854_s4 + $0x8] sm:$0xff]   ;;  %9038 = vmatprep.subr.bf16.mxu0 %v9205_v2  ;;  %v13029_v37 = vld [vmem:[#allocation53_spill] sm:$0xff] }
 0x148   :  { %v1862_v13 = vpop.f32.mrf.mxu1  ;;  %v13025_v61 = vld [vmem:[#allocation43_spill] sm:$0xff]  ;;  %v13026_v32 = vld [vmem:[#allocation20_spill] sm:$0xff]  ;;  %v1450_v19 = vadd.f32 %v13029_v37, %v1208_v52  ;;  %v1451_v52 = vadd.f32 %v10888_v12, %v1209_v33 }
 0x149   :  { %v8710_v34 = vpop.f32.mrf.mxu0  ;;  %v1445_v47 = vadd.f32 %v13025_v61, %v1203_v57  ;;  %v1925_v50 = vadd.f32 %v1862_v13, %v1683_v46  ;;  %v11058_v62 = vadd.f32 %v13026_v32, %v968_v59  ;;  %v13028_v6 = vld [vmem:[#allocation24_spill] sm:$0xff]  ;;  %9015 = vmatpush3.bf16.msra.mxu1 %v9204_v49  ;;  %9039 = vmatpush3.bf16.msra.mxu0 %v9205_v2  ;;  %v9208_v33 = vld [vmem:[%s12854_s4 + $0x20] sm:$0xff]  }
 0x14a   :  { %v11055_v17 = vadd.f32 %v8710_v34, %v1927_v30  ;;  %v11064_v0 = vadd.f32 %v13028_v6, %v969_v42  ;;  %v8687_v7 = vpop.f32.mrf.mxu1  ;;  %v13030_v43 = vld [vmem:[#allocation64_spill] sm:$0xff]  ;;  %v13032_v42 = vld [vmem:[#allocation34_spill] sm:$0xff]  ;;  %9016 = vmatprep.subr.bf16.mxu1 %v9206_v41  ;;  %9040 = vmatprep.subr.bf16.mxu0 %v9207_v10  ;;  %v1449_v49 = vadd.f32 %v10928_v20, %v1207_v55  ;;  %v13039_v55 = vld [vmem:[#allocation75_spill] sm:$0xff] }
 0x14b   :  { %v2104_v35 = vpop.f32.mrf.mxu0  ;;  %v1448_v57 = vadd.f32 %v13030_v43, %v1206_v56  ;;  %v1928_v59 = vadd.f32 %v8687_v7, %v1686_v15  ;;  %v13031_v16 = vld [vmem:[#allocation32_spill] sm:$0xff]  ;;  %v1689_v34 = vadd.f32 %v13032_v42, %v1446_v31  ;;  %v9209_v12 = vld [vmem:[%s12854_s4] sm:$0xff]   ;;  %v11122_v42 = vld [vmem:[%s12854_s4 + $0x58] sm:$0xff]  }
 0x14c   :  { %2186 = vst.msk [vmem:[%s12855_s8 + $0x10] sm:$0xff] %vm12903_vm1, %v11055_v17  ;;  %v2167_v13 = vadd.f32 %v2104_v35, %v1925_v50  ;;  %v1684_v46 = vadd.f32 %v13031_v16, %v1441_v26  ;;  %v1865_v30 = vpop.f32.mrf.mxu1  ;;  %v13033_v56 = vld [vmem:[#allocation36_spill] sm:$0xff]  ;;  %v13036_v26 = vld [vmem:[#allocation54_spill] sm:$0xff]  ;;  %8977 = vmatmul.mubr.msk.bf16.gmra.mxu1 %vm180_vm0, %v10893_v21  ;;  %v13038_v35 = vld [vmem:[#allocation65_spill] sm:$0xff]  ;;  %v11113_v50 = vadd.f32 %v13039_v55, %v1451_v52 }
 0x14d   :  { %v8711_v24 = vpop.f32.mrf.mxu0  ;;  %v1687_v43 = vadd.f32 %v13033_v56, %v1444_v54  ;;  %v13034_v32 = vld [vmem:[#allocation40_spill] sm:$0xff]  ;;  %v11090_v54 = vadd.f32 %v13036_v26, %v1450_v19  ;;  %v11100_v7 = vadd.f32 %v13038_v35, %v1448_v57  ;;  %8980 = vmatprep.mubr.msk.bf16.mxu1 %vm180_vm0, %v10914_v38  ;;  %9017 = vmatpush3.bf16.msra.mxu1 %v9206_v41 }
 0x14e   :  { %v1690_v29 = vadd.f32 %v13034_v32, %v1447_v51  ;;  %v13035_v6 = vld [vmem:[#allocation44_spill] sm:$0xff]  ;;  %2184 = vst.msk [vmem:[%s12855_s8] sm:$0xff] %vm12903_vm1, %v2167_v13  ;;  %v2170_v15 = vadd.f32 %v8711_v24, %v1928_v59  ;;  %v1926_v2 = vadd.f32 %v1865_v30, %v1684_v46  ;;  %v8690_v51 = vpop.f32.mrf.mxu1  ;;  %v13037_v24 = vpack.c.bf16 %v10770_v1, %v10618_v28 }
 0x14f   :  { %v2107_v61 = vpop.f32.mrf.mxu0  ;;  %v1688_v37 = vadd.f32 %v13035_v6, %v1445_v47  ;;  %v1454_v47 = vadd.f32 %v10957_v53, %v11015_v18  ;;  %v1931_v20 = vadd.f32 %v8690_v51, %v1689_v34  ;;  %v2238_v19 = vmul.f32 %v2167_v13, %v2167_v13  ;;  %9041 = vmatpush3.bf16.msra.mxu0 %v9207_v10  ;;  %v11127_v34 = vld [vmem:[%s12854_s4 + $0x78] sm:$0xff]  }
 0x150   :  { %9001 = vmatmul.mubr.msk.bf16.gmra.mxu0 %vm180_vm0, %v13037_v24  ;;  %2187 = vst.msk [vmem:[%s12855_s8 + $0x18] sm:$0xff] %vm12903_vm1, %v2170_v15  ;;  %v2168_v57 = vadd.f32 %v2107_v61, %v1926_v2  ;;  %v1878_v59 = vpop.f32.mrf.mxu1  ;;  %v2240_v53 = vmul.f32 %v11055_v17, %v11055_v17  ;;  %9018 = vmatprep.subr.bf16.mxu1 %v9208_v33  ;;  %v2200_v10 = vsel %vm12903_vm1, %v2167_v13, 0.0  ;;  %v2203_v32 = vsel %vm12903_vm1, %v11055_v17, 0.0 }
 0x151   :  { %v8714_v31 = vpop.f32.mrf.mxu0  ;;  %9004 = vmatprep.mubr.msk.bf16.mxu0 %vm180_vm0, %v10918_v4  ;;  %v1929_v46 = vadd.f32 %v1878_v59, %v1687_v43  ;;  %9042 = vmatprep.subr.bf16.mxu0 %v9209_v12  ;;  %v11130_v41 = vadd.f32 %v10930_v8, %v1449_v49  ;;  %v11139_v43 = vadd.f32 %v10959_v39, %v1454_v47  ;;  %v2254_v6 = vsel %vm12903_vm1, %v2238_v19, 0.0 }
 0x152   :  { %v11117_v18 = vadd.f32 %v8714_v31, %v1931_v20  ;;  %2185 = vst.msk [vmem:[%s12855_s8 + $0x8] sm:$0xff] %vm12903_vm1, %v2168_v57  ;;  %v2201_v52 = vsel %vm12903_vm1, %v2168_v57, 0.0  ;;  %v2239_v30 = vmul.f32 %v2168_v57, %v2168_v57  ;;  %v8691_v61 = vpop.f32.mrf.mxu1  ;;  %v2241_v26 = vmul.f32 %v2170_v15, %v2170_v15  ;;  %9019 = vmatpush3.bf16.msra.mxu1 %v9208_v33 }
 0x153   :  { %v2120_v16 = vpop.f32.mrf.mxu0  ;;  %v2202_v8 = vadd.f32 %v2201_v52, %v2200_v10  ;;  %v1932_v2 = vadd.f32 %v8691_v61, %v1690_v29  ;;  %9043 = vmatpush3.bf16.msra.mxu0 %v9209_v12  ;;  %v1452_v17 = vadd.f32 %v10981_v45, %v11058_v62  ;;  %v2257_v31 = vsel %vm12903_vm1, %v2240_v53, 0.0  ;;  %9060 = vmatprep.subr.bf16.mxu1 %v11122_v42 }
 0x154   :  { %2190 = vst.msk [vmem:[%s12855_s8 + $0x30] sm:$0xff] %vm12903_vm1, %v11117_v18  ;;  %v2171_v13 = vadd.f32 %v2120_v16, %v1929_v46  ;;  %v2255_v49 = vsel %vm12903_vm1, %v2239_v30, 0.0  ;;  %v1881_v51 = vpop.f32.mrf.mxu1  ;;  %9084 = vmatprep.subr.bf16.mxu0 %v11127_v34  ;;  %v2205_v29 = vsel %vm12903_vm1, %v2170_v15, 0.0  ;;  %8981 = vmatmul.mubr.msk.bf16.gmra.mxu1 %vm180_vm0, %v10922_v22  ;;  %v2259_v15 = vsel %vm12903_vm1, %v2241_v26, 0.0 }
 0x155   :  { %v8715_v56 = vpop.f32.mrf.mxu0  ;;  %v2204_v24 = vadd.f32 %v2203_v32, %v2202_v8  ;;  %v2256_v35 = vadd.f32 %v2255_v49, %v2254_v6  ;;  %v1930_v47 = vadd.f32 %v1881_v51, %v1688_v37  ;;  %8984 = vmatprep.mubr.msk.bf16.mxu1 %vm180_vm0, %v10934_v48  ;;  %v1455_v37 = vadd.f32 %v10993_v9, %v11061_v25 }
 0x156   :  { %2188 = vst.msk [vmem:[%s12855_s8 + $0x20] sm:$0xff] %vm12903_vm1, %v2171_v13  ;;  %v2242_v33 = vmul.f32 %v2171_v13, %v2171_v13  ;;  %v2174_v12 = vadd.f32 %v8715_v56, %v1932_v2  ;;  %v8694_v20 = vpop.f32.mrf.mxu1  ;;  %v2207_v57 = vsel %vm12903_vm1, %v2171_v13, 0.0  ;;  %v2244_v9 = vmul.f32 %v11117_v18, %v11117_v18 }
 0x157   :  { %v2123_v39 = vpop.f32.mrf.mxu0  ;;  %v2258_v62 = vadd.f32 %v2257_v31, %v2256_v35  ;;  %v2206_v55 = vadd.f32 %v2205_v29, %v2204_v24  ;;  %v1935_v19 = vadd.f32 %v8694_v20, %v11090_v54  ;;  %v1453_v8 = vadd.f32 %v11009_v40, %v11064_v0 }
 0x158   :  { %9005 = vmatmul.mubr.msk.bf16.gmra.mxu0 %vm180_vm0, %v10926_v36  ;;  %2191 = vst.msk [vmem:[%s12855_s8 + $0x38] sm:$0xff] %vm12903_vm1, %v2174_v12  ;;  %v2172_v59 = vadd.f32 %v2123_v39, %v1930_v47  ;;  %v1894_v54 = vpop.f32.mrf.mxu1  ;;  %v2261_v25 = vsel %vm12903_vm1, %v2242_v33, 0.0  ;;  %v2245_v26 = vmul.f32 %v2174_v12, %v2174_v12  ;;  %v1695_v40 = vadd.f32 %v10983_v63, %v1452_v17 }
 0x159   :  { %v8718_v45 = vpop.f32.mrf.mxu0  ;;  %9008 = vmatprep.mubr.msk.bf16.mxu0 %vm180_vm0, %v10938_v3  ;;  %v2208_v53 = vadd.f32 %v2207_v57, %v2206_v55  ;;  %v2260_v46 = vadd.f32 %v2259_v15, %v2258_v62  ;;  %v1933_v52 = vadd.f32 %v1894_v54, %v11100_v7  ;;  %v2211_v7 = vsel %vm12903_vm1, %v11117_v18, 0.0  ;;  %v13042_v54 = vld [vmem:[#allocation76_spill] sm:$0xff] }
 0x15a   :  { %v2177_v10 = vadd.f32 %v8718_v45, %v1935_v19  ;;  %2189 = vst.msk [vmem:[%s12855_s8 + $0x28] sm:$0xff] %vm12903_vm1, %v2172_v59  ;;  %v2209_v30 = vsel %vm12903_vm1, %v2172_v59, 0.0  ;;  %v2243_v61 = vmul.f32 %v2172_v59, %v2172_v59  ;;  %v8695_v56 = vpop.f32.mrf.mxu1  ;;  %v2265_v35 = vsel %vm12903_vm1, %v2244_v9, 0.0 }
 0x15b   :  { %v2136_v16 = vpop.f32.mrf.mxu0  ;;  %v2262_v13 = vadd.f32 %v2261_v25, %v2260_v46  ;;  %v2210_v6 = vadd.f32 %v2209_v30, %v2208_v53  ;;  %v1936_v51 = vadd.f32 %v8695_v56, %v11113_v50  ;;  %v2213_v29 = vsel %vm12903_vm1, %v2174_v12, 0.0 }
 0x15c   :  { %2194 = vst.msk [vmem:[%s12855_s8 + $0x50] sm:$0xff] %vm12903_vm1, %v2177_v10  ;;  %v2263_v49 = vsel %vm12903_vm1, %v2243_v61, 0.0  ;;  %v2175_v2 = vadd.f32 %v2136_v16, %v1933_v52  ;;  %v1897_v39 = vpop.f32.mrf.mxu1  ;;  %8985 = vmatmul.mubr.msk.bf16.gmra.mxu1 %vm180_vm0, %v10941_v23  ;;  %v13040_v63 = vpack.c.bf16 %v10882_v27, %v10691_v58  ;;  %v13041_v62 = vpack.c.bf16 %v10711_v60, %v10900_v5 }
 0x15d   :  { %v8719_v32 = vpop.f32.mrf.mxu0  ;;  %v2212_v0 = vadd.f32 %v2211_v7, %v2210_v6  ;;  %v2264_v24 = vadd.f32 %v2263_v49, %v2262_v13  ;;  %v1934_v18 = vadd.f32 %v1897_v39, %v11130_v41  ;;  %v1698_v55 = vadd.f32 %v10995_v11, %v1455_v37  ;;  %v13045_v49 = vld [vmem:[#allocation48_spill] sm:$0xff] }
 0x15e   :  { %2192 = vst.msk [vmem:[%s12855_s8 + $0x40] sm:$0xff] %vm12903_vm1, %v2175_v2  ;;  %v2246_v33 = vmul.f32 %v2175_v2, %v2175_v2  ;;  %v2178_v47 = vadd.f32 %v8719_v32, %v1936_v51  ;;  %v8698_v50 = vpop.f32.mrf.mxu1  ;;  %9020 = vmatprep.mubr.msk.bf16.mxu1 %vm180_vm0, %v13041_v62  ;;  %v1696_v19 = vadd.f32 %v11011_v14, %v1453_v8  ;;  %v2267_v15 = vsel %vm12903_vm1, %v2245_v26, 0.0  ;;  %v13044_v26 = vld [vmem:[#allocation46_spill] sm:$0xff] }
 0x15f   :  { %v2139_v31 = vpop.f32.mrf.mxu0  ;;  %v2266_v41 = vadd.f32 %v2265_v35, %v2264_v24  ;;  %v2214_v17 = vadd.f32 %v2213_v29, %v2212_v0  ;;  %v1939_v45 = vadd.f32 %v8698_v50, %v11139_v43  ;;  %v2215_v57 = vsel %vm12903_vm1, %v2175_v2, 0.0  ;;  %v9213_v0 = vld [vmem:[%s12854_s4 + $0x70] sm:$0xff]  }
 0x160   :  { %9009 = vmatmul.mubr.msk.bf16.gmra.mxu0 %vm180_vm0, %v13040_v63  ;;  %v2176_v12 = vadd.f32 %v2139_v31, %v1934_v18  ;;  %2195 = vst.msk [vmem:[%s12855_s8 + $0x58] sm:$0xff] %vm12903_vm1, %v2178_v47  ;;  %v1910_v59 = vpop.f32.mrf.mxu1  ;;  %v13043_v60 = vpack.c.bf16 %v10701_v44, %v13042_v54  ;;  %v2248_v16 = vmul.f32 %v2177_v10, %v2177_v10  ;;  %v2269_v53 = vsel %vm12903_vm1, %v2246_v33, 0.0  ;;  %v13046_v50 = vld [vmem:[#allocation77_spill] sm:$0xff] }
 0x161   :  { %v8722_v20 = vpop.f32.mrf.mxu0  ;;  %v2216_v5 = vadd.f32 %v2215_v57, %v2214_v17  ;;  %v2268_v11 = vadd.f32 %v2267_v15, %v2266_v41  ;;  %v1937_v52 = vadd.f32 %v1910_v59, %v1695_v40  ;;  %v2219_v32 = vsel %vm12903_vm1, %v2177_v10, 0.0  ;;  %v9212_v10 = vld [vmem:[%s12854_s4 + $0x50] sm:$0xff]  }
 0x162   :  { %9044 = vmatprep.mubr.msk.bf16.mxu0 %vm180_vm0, %v13043_v60  ;;  %2193 = vst.msk [vmem:[%s12855_s8 + $0x48] sm:$0xff] %vm12903_vm1, %v2176_v12  ;;  %v2217_v14 = vsel %vm12903_vm1, %v2176_v12, 0.0  ;;  %v2247_v37 = vmul.f32 %v2176_v12, %v2176_v12  ;;  %v11233_v46 = vadd.f32 %v8722_v20, %v1939_v45  ;;  %v8699_v9 = vpop.f32.mrf.mxu1  ;;  %v2249_v8 = vmul.f32 %v2178_v47, %v2178_v47  ;;  %v13047_v20 = vld [vmem:[#allocation42_spill] sm:$0xff]  ;;  %v13049_v41 = vld [vmem:[#allocation45_spill] sm:$0xff] }
 0x163   :  { %v2152_v43 = vpop.f32.mrf.mxu0  ;;  %v2270_v25 = vadd.f32 %v2269_v53, %v2268_v11  ;;  %v2218_v30 = vadd.f32 %v2217_v14, %v2216_v5  ;;  %v1940_v56 = vadd.f32 %v8699_v9, %v1698_v55  ;;  %v8186_v2 = vpack.c.bf16 %v13045_v49, %v13044_v26  ;;  %v13050_v17 = vld [vmem:[#allocation41_spill] sm:$0xff]  ;;  %v13052_v55 = vld [vmem:[#allocation51_spill] sm:$0xff]  ;;  %v13053_v60 = vld [vmem:[#allocation50_spill] sm:$0xff] }
 0x164   :  { %v2271_v61 = vsel %vm12903_vm1, %v2247_v37, 0.0  ;;  %2198 = vst.msk [vmem:[%s12855_s8 + $0x70] sm:$0xff] %vm12903_vm1, %v11233_v46  ;;  %v2179_v7 = vadd.f32 %v2152_v43, %v1937_v52  ;;  %v1913_v13 = vpop.f32.mrf.mxu1  ;;  %v2273_v24 = vsel %vm12903_vm1, %v2248_v16, 0.0  ;;  %v2221_v18 = vsel %vm12903_vm1, %v2178_v47, 0.0  ;;  %v7751_v47 = vld [vmem:[%s12851_s0 + $0xb2] sm:$0xff]  ;;  %v13054_v5 = vld [vmem:[#allocation47_spill] sm:$0xff] }
 0x165   :  { %v8723_v44 = vpop.f32.mrf.mxu0  ;;  %v2220_v51 = vadd.f32 %v2219_v32, %v2218_v30  ;;  %v2272_v39 = vadd.f32 %v2271_v61, %v2270_v25  ;;  %v1938_v40 = vadd.f32 %v1913_v13, %v1696_v19  ;;  %v13048_v63 = vpack.c.bf16 %v13046_v50, %v13047_v20  ;;  %v9214_v37 = vld [vmem:[%s12854_s4 + $0x48] sm:$0xff]   ;;  %v13058_v9 = vld [vmem:[#allocation57_spill] sm:$0xff] }
 0x166   :  { %v2182_v31 = vadd.f32 %v8723_v44, %v1940_v56  ;;  %2196 = vst.msk [vmem:[%s12855_s8 + $0x60] sm:$0xff] %vm12903_vm1, %v2179_v7  ;;  %v2250_v35 = vmul.f32 %v2179_v7, %v2179_v7  ;;  %v11256_v29 = vpop.f32.mrf.mxu1  ;;  %v13051_v12 = vpack.c.bf16 %v13049_v41, %v13050_v17  ;;  %v8179_v19 = vpack.c.bf16 %v10618_v28, %v13052_v55  ;;  %v7735_v28 = vld [vmem:[%s12851_s0 + $0xb1] sm:$0xff]  ;;  %v9215_v16 = vld [vmem:[%s12854_s4 + $0x68] sm:$0xff]  }
 0x167   :  { %v2155_v6 = vpop.f32.mrf.mxu0  ;;  %9021 = vmatmul.mubr.msk.bf16.vlgmr.msra.gmra.mxu1 %vm180_vm0, %v13048_v63  ;;  %v2274_v45 = vadd.f32 %v2273_v24, %v2272_v39  ;;  %v2222_v62 = vadd.f32 %v2221_v18, %v2220_v51  ;;  %v2275_v15 = vsel %vm12903_vm1, %v2249_v8, 0.0  ;;  %v2223_v57 = vsel %vm12903_vm1, %v2179_v7, 0.0 }
 0x168   :  { %9045 = vmatmul.mubr.msk.bf16.vlgmr.msra.gmra.mxu0 %vm180_vm0, %v13051_v12  ;;  %2199 = vst.msk [vmem:[%s12855_s8 + $0x78] sm:$0xff] %vm12903_vm1, %v2182_v31  ;;  %9061 = vmatpush3.bf16.msra.mxu1 %v11122_v42  ;;  %v2180_v59 = vadd.f32 %v2155_v6, %v1938_v40  ;;  %v11281_v43 = vpop.f32.mrf.mxu1  ;;  %v13055_v11 = vpack.c.bf16 %v13053_v60, %v13054_v5  ;;  %v13056_v42 = vld [vmem:[#allocation49_spill] sm:$0xff]  ;;  %v2277_v30 = vsel %vm12903_vm1, %v2250_v35, 0.0  ;;  %v13059_v6 = vld [vmem:[#allocation55_spill] sm:$0xff]  ;;  %v2227_v49 = vsel %vm12903_vm1, %v11233_v46, 0.0 }
 0x169   :  { %v11258_v33 = vpop.f32.mrf.mxu0  ;;  %9085 = vmatpush3.bf16.msra.mxu0 %v11127_v34  ;;  %9048 = vmatprep.mubr.msk.bf16.mxu0 %vm180_vm0, %v8186_v2  ;;  %v13057_v34 = vld [vmem:[#allocation52_spill] sm:$0xff]  ;;  %v2224_v53 = vadd.f32 %v2223_v57, %v2222_v62  ;;  %v2276_v52 = vadd.f32 %v2275_v15, %v2274_v45  ;;  %v8180_v44 = vpack.c.bf16 %v13058_v9, %v7751_v47  ;;  %v2229_v35 = vsel %vm12903_vm1, %v2182_v31, 0.0  ;;  %v13063_v15 = vld [vmem:[#allocation61_spill] sm:$0xff]  ;;  %v13065_v60 = vld [vmem:[#allocation59_spill] sm:$0xff] }
 0x16a   :  { %9024 = vmatprep.mubr.msk.bf16.mxu1 %vm180_vm0, %v13055_v11  ;;  %v8187_v14 = vpack.c.bf16 %v13057_v34, %v13056_v42  ;;  %9062 = vmatprep.subr.bf16.mxu1 %v9212_v10  ;;  %v2252_v25 = vmul.f32 %v11233_v46, %v11233_v46  ;;  %2197 = vst.msk [vmem:[%s12855_s8 + $0x68] sm:$0xff] %vm12903_vm1, %v2180_v59  ;;  %v2225_v61 = vsel %vm12903_vm1, %v2180_v59, 0.0  ;;  %v11310_v32 = vpop.f32.mrf.mxu1  ;;  %v13066_v42 = vld [vmem:[#allocation62_spill] sm:$0xff]  ;;  %v13067_v34 = vld [vmem:[#allocation69_spill] sm:$0xff] }
 0x16b   :  { %v11283_v54 = vpop.f32.mrf.mxu0  ;;  %9086 = vmatprep.subr.bf16.mxu0 %v9213_v0  ;;  %v2251_v56 = vmul.f32 %v2180_v59, %v2180_v59  ;;  %v2278_v7 = vadd.f32 %v2277_v30, %v2276_v52  ;;  %v2226_v13 = vadd.f32 %v2225_v61, %v2224_v53  ;;  %v8188_v26 = vpack.c.bf16 %v13059_v6, %v7735_v28  ;;  %v13064_v59 = vld [vmem:[#allocation56_spill] sm:$0xff] }
 0x16c   :  { %9063 = vmatpush3.bf16.msra.mxu1 %v9212_v10  ;;  %v2253_v2 = vmul.f32 %v2182_v31, %v2182_v31  ;;  %v11318_v39 = vpop.f32.mrf.mxu1  ;;  %v9216_v10 = vld [vmem:[%s12854_s4 + $0x40] sm:$0xff]   ;;  %v2281_v46 = vsel %vm12903_vm1, %v2252_v25, 0.0  ;;  %v8189_v11 = vpack.c.bf16 %v13065_v60, %v13064_v59  ;;  %v13068_v28 = vld [vmem:[#allocation60_spill] sm:$0xff] }
 0x16d   :  { %v11312_v8 = vpop.f32.mrf.mxu0  ;;  %9087 = vmatpush3.bf16.msra.mxu0 %v9213_v0  ;;  %v2279_v51 = vsel %vm12903_vm1, %v2251_v56, 0.0  ;;  %9064 = vmatprep.subr.bf16.mxu1 %v9214_v37  ;;  %v2228_v24 = vadd.f32 %v2227_v49, %v2226_v13  ;;  %v9217_v0 = vld [vmem:[%s12854_s4 + $0x60] sm:$0xff]   ;;  %v13071_v6 = vld [vmem:[#allocation68_spill] sm:$0xff] }
 0x16e   :  { %9088 = vmatprep.subr.bf16.mxu0 %v9215_v16  ;;  %v2280_v18 = vadd.f32 %v2279_v51, %v2278_v7  ;;  %v11330_v20 = vpop.f32.mrf.mxu1  ;;  %v2283_v12 = vsel %vm12903_vm1, %v2253_v2, 0.0  ;;  %v13070_v7 = vld [vmem:[#allocation70_spill] sm:$0xff]  ;;  %v13075_v60 = vld [vmem:[#allocation71_spill] sm:$0xff] }
 0x16f   :  { %v11320_v40 = vpop.f32.mrf.mxu0  ;;  %9025 = vmatmul.mubr.msk.bf16.gmra.mxu1 %vm180_vm0, %v8179_v19  ;;  %v11336_v41 = vadd.f32 %v2229_v35, %v2228_v24  ;;  %v13062_v19 = vld [vmem:[#allocation58_spill] sm:$0xff]  ;;  %v8183_v13 = vpack.c.bf16 %v10691_v58, %v13070_v7 }
 0x170   :  { %9049 = vmatmul.mubr.msk.bf16.gmra.mxu0 %vm180_vm0, %v8187_v14  ;;  %v2282_v17 = vadd.f32 %v2281_v46, %v2280_v18  ;;  %9028 = vmatprep.mubr.msk.bf16.mxu1 %vm180_vm0, %v8180_v44  ;;  %v11341_v47 = vpop.f32.mrf.mxu1  ;;  %v8181_v57 = vpack.c.bf16 %v13063_v15, %v13062_v19  ;;  %v8182_v14 = vpack.c.bf16 %v13067_v34, %v13066_v42  ;;  %v13077_v42 = vld [vmem:[#allocation73_spill] sm:$0xff] }
 0x171   :  { %v11332_v63 = vpop.f32.mrf.mxu0  ;;  %13060 = vst [vmem:[#allocation4_spill] sm:$0xff] %v11336_v41  ;;  %9052 = vmatprep.mubr.msk.bf16.mxu0 %vm180_vm0, %v8188_v26  ;;  %9065 = vmatpush3.bf16.msra.mxu1 %v9214_v37  ;;  %v13069_v37 = vld [vmem:[#allocation63_spill] sm:$0xff]  ;;  %v13072_v26 = vld [vmem:[#allocation74_spill] sm:$0xff] }
 0x172   :  { %9089 = vmatpush3.bf16.msra.mxu0 %v9215_v16  ;;  %v11345_v45 = vadd.f32 %v2283_v12, %v2282_v17  ;;  %9066 = vmatprep.subr.bf16.mxu1 %v9216_v10  ;;  %v11347_v62 = vpop.f32.mrf.mxu1  ;;  %v8190_v16 = vpack.c.bf16 %v13069_v37, %v13068_v28  ;;  %v8191_v49 = vpack.c.bf16 %v13072_v26, %v13071_v6 }
 0x173   :  { %v11343_v31 = vpop.f32.mrf.mxu0  ;;  %9090 = vmatprep.subr.bf16.mxu0 %v9217_v0  ;;  %v8201_v12 = vpack.c.bf16 %v13054_v5, %v13046_v50  ;;  %v7857_v50 = vld [vmem:[%s12851_s0 + $0x82] sm:$0xff] }
 0x174   :  { %13061 = vst [vmem:[#allocation17_spill] sm:$0xff] %v11345_v45  ;;  %v11359_v53 = vpop.f32.mrf.mxu1  ;;  %v8203_v37 = vpack.c.bf16 %v10770_v1, %v7857_v50 }
 0x175   :  { %v11349_v55 = vpop.f32.mrf.mxu0  ;;  %9067 = vmatpush3.bf16.msra.mxu1 %v9216_v10  ;;  %v13073_v10 = vld [vmem:[#allocation66_spill] sm:$0xff] }
 0x176   :  { %9091 = vmatpush3.bf16.msra.mxu0 %v9217_v0  ;;  %v11363_v9 = vpop.f32.mrf.mxu1  ;;  %v13074_v0 = vld [vmem:[#allocation67_spill] sm:$0xff] }
 0x177   :  { %v11361_v52 = vpop.f32.mrf.mxu0  ;;  %9029 = vmatmul.mubr.msk.bf16.gmra.mxu1 %vm180_vm0, %v8181_v57 }
 0x178   :  { %9053 = vmatmul.mubr.msk.bf16.gmra.mxu0 %vm180_vm0, %v8189_v11  ;;  %9032 = vmatprep.mubr.msk.bf16.mxu1 %vm180_vm0, %v8182_v14  ;;  %v11371_v25 = vpop.f32.mrf.mxu1  ;;  %v13076_v11 = vld [vmem:[#allocation72_spill] sm:$0xff] }
 0x179   :  { %v11365_v44 = vpop.f32.mrf.mxu0  ;;  %9056 = vmatprep.mubr.msk.bf16.mxu0 %vm180_vm0, %v8190_v16 }
 0x17a   :  { %v11375_v61 = vpop.f32.mrf.mxu1 }
 0x17b   :  { %v11373_v30 = vpop.f32.mrf.mxu0 }
 0x17c   :  { %v11383_v2 = vpop.f32.mrf.mxu1 }
 0x17d   :  { %v11377_v56 = vpop.f32.mrf.mxu0 }
 0x17e   :  { %v11387_v24 = vpop.f32.mrf.mxu1 }
 0x17f   :  { %v11385_v51 = vpop.f32.mrf.mxu0  ;;  %9033 = vmatmul.mubr.msk.bf16.gmra.mxu1 %vm180_vm0, %v8183_v13 }
 0x180   :  { %9057 = vmatmul.mubr.msk.bf16.gmra.mxu0 %vm180_vm0, %v8191_v49  ;;  %9068 = vmatprep.mubr.msk.bf16.mxu1 %vm180_vm0, %v13073_v10  ;;  %v11397_v58 = vpop.f32.mrf.mxu1 }
 0x181   :  { %v11389_v18 = vpop.f32.mrf.mxu0  ;;  %9092 = vmatprep.mubr.msk.bf16.mxu0 %vm180_vm0, %v13074_v0 }
 0x182   :  { %v11401_v35 = vpop.f32.mrf.mxu1 }
 0x183   :  { %v11399_v46 = vpop.f32.mrf.mxu0 }
 0x184   :  { %v11407_v19 = vpop.f32.mrf.mxu1 }
 0x185   :  { %v11403_v17 = vpop.f32.mrf.mxu0 }
 0x186   :  { %v8782_v57 = vpop.f32.mrf.mxu1 }
 0x187   :  { %v11409_v15 = vpop.f32.mrf.mxu0  ;;  %9069 = vmatmul.mubr.msk.bf16.vlgmr.msra.gmra.mxu1 %vm180_vm0, %v13075_v60 }
 0x188   :  { %9093 = vmatmul.mubr.msk.bf16.vlgmr.msra.gmra.mxu0 %vm180_vm0, %v8201_v12  ;;  %9072 = vmatprep.mubr.msk.bf16.mxu1 %vm180_vm0, %v13076_v11  ;;  %v2906_v5 = vpop.f32.mrf.mxu1 }
 0x189   :  { %v8806_v59 = vpop.f32.mrf.mxu0  ;;  %9096 = vmatprep.mubr.msk.bf16.mxu0 %vm180_vm0, %v13077_v42 }
 0x18a   :  { %v8783_v14 = vpop.f32.mrf.mxu1 }
 0x18b   :  { %v3148_v34 = vpop.f32.mrf.mxu0 }
 0x18c   :  { %v2909_v16 = vpop.f32.mrf.mxu1 }
 0x18d   :  { %v11421_v28 = vpop.f32.mrf.mxu0 }
 0x18e   :  { %v11426_v13 = vpop.f32.mrf.mxu1 }
 0x18f   :  { %v11424_v7 = vpop.f32.mrf.mxu0  ;;  %9073 = vmatmul.mubr.msk.bf16.gmra.mxu1 %vm180_vm0, %v10893_v21 }
 0x190   :  { %9097 = vmatmul.mubr.msk.bf16.gmra.mxu0 %vm180_vm0, %v8203_v37  ;;  %9076 = vmatprep.mubr.msk.bf16.mxu1 %vm180_vm0, %v10914_v38  ;;  %v11437_v26 = vpop.f32.mrf.mxu1  ;;  %v7865_v38 = vld [vmem:[%s12851_s0 + $0x122] sm:$0xff] }
 0x191   :  { %v11428_v6 = vpop.f32.mrf.mxu0  ;;  %9100 = vmatprep.mubr.msk.bf16.mxu0 %vm180_vm0, %v10918_v4 }
 0x192   :  { %v11441_v49 = vpop.f32.mrf.mxu1 }
 0x193   :  { %v11439_v1 = vpop.f32.mrf.mxu0 }
 0x194   :  { %v11445_v0 = vpop.f32.mrf.mxu1 }
 0x195   :  { %v11443_v10 = vpop.f32.mrf.mxu0 }
 0x196   :  { %v11449_v21 = vpop.f32.mrf.mxu1 }
 0x197   :  { %v11447_v12 = vpop.f32.mrf.mxu0  ;;  %9077 = vmatmul.mubr.msk.bf16.gmra.mxu1 %vm180_vm0, %v10922_v22  ;;  %v8207_v22 = vpack.c.bf16 %v10882_v27, %v7865_v38  ;;  %v2689_v27 = vadd.f32 %v11258_v33, %v11256_v29  ;;  %v9220_v29 = vmov 0  }
 0x198   :  { %9101 = vmatmul.mubr.msk.bf16.gmra.mxu0 %vm180_vm0, %v10926_v36  ;;  %9080 = vmatprep.mubr.msk.bf16.mxu1 %vm180_vm0, %v10934_v48  ;;  %v2938_v4 = vpop.f32.mrf.mxu1  ;;  %v13_v48 = vstv %s12856_s7 }
 0x199   :  { %v11451_v60 = vpop.f32.mrf.mxu0  ;;  %9104 = vmatprep.mubr.msk.bf16.mxu0 %vm180_vm0, %v10938_v3  ;;  %14 = vst [vmem:[#allocation2] sm:$0x1] %v13_v48  ;;  %v2971_v48 = vadd.f32 %v8782_v57, %v2689_v27  ;;  %9117 = vset.pattern.permute.xlu0 %v9220_v29  ;;  %v2705_v27 = vadd.f32 %v11332_v63, %v11330_v20 }
 0x19a   :  { %v11466_v42 = vpop.f32.mrf.mxu1 }
 0x19b   :  { %v11464_v11 = vpop.f32.mrf.mxu0  ;;  %v2975_v20 = vadd.f32 %v11426_v13, %v2705_v27 }
 0x19c   :  { %13078 = vst [vmem:[#allocation25_spill] sm:$0xff] %v11464_v11  ;;  %v11471_v36 = vpop.f32.mrf.mxu1 }
 0x19d   :  { %v11468_v50 = vpop.f32.mrf.mxu0  ;;  %v3217_v13 = vadd.f32 %v11428_v6, %v2975_v20 }
 0x19e   :  { %13079 = vst [vmem:[#allocation8_spill] sm:$0xff] %v11468_v50  ;;  %v11478_v3 = vpop.f32.mrf.mxu1 }
 0x19f   :  { %v11473_v37 = vpop.f32.mrf.mxu0  ;;  %13081 = vst [vmem:[#allocation9_spill] sm:$0xff] %v11478_v3  ;;  %9081 = vmatmul.mubr.msk.bf16.gmra.mxu1 %vm180_vm0, %v10941_v23  ;;  %v2692_v23 = vadd.f32 %v11312_v8, %v11310_v32  ;;  %v2697_v32 = vadd.f32 %v11343_v31, %v11341_v47  ;;  %v2724_v31 = vadd.f32 %v11377_v56, %v11375_v61 }
 0x1a0   :  { %13080 = vst [vmem:[#allocation27_spill] sm:$0xff] %v11473_v37  ;;  %9105 = vmatmul.mubr.msk.bf16.gmra.mxu0 %vm180_vm0, %v8207_v22  ;;  %v11487_v38 = vpop.f32.mrf.mxu1  ;;  %v2681_v37 = vadd.f32 %v11283_v54, %v11281_v43  ;;  %v7911_v33 = vld [vmem:[#allocation2] ss:$0 sm:$0xff]  ;;  %v2684_v43 = vadd.f32 %v11320_v40, %v11318_v39 }
 0x1a1   :  { %v11480_v45 = vpop.f32.mrf.mxu0  ;;  %13083 = vst [vmem:[#allocation11_spill] sm:$0xff] %v11487_v38  ;;  %v2972_v38 = vadd.f32 %v8783_v14, %v2692_v23  ;;  %6484 = vperm.xlu0 %9117, %v7911_v33   ;;  %v2721_v14 = vadd.f32 %v11365_v44, %v11363_v9 }
 0x1a2   :  { %13082 = vst [vmem:[#allocation10_spill] sm:$0xff] %v11480_v45  ;;  %v11493_v50 = vpop.f32.mrf.mxu1  ;;  %v2969_v45 = vadd.f32 %v2906_v5, %v2681_v37  ;;  %v2708_v37 = vadd.f32 %v11349_v55, %v11347_v62  ;;  %v2970_v39 = vadd.f32 %v2909_v16, %v2684_v43  ;;  %v2973_v62 = vadd.f32 %v11437_v26, %v2697_v32 }
 0x1a3   :  { %v11489_v41 = vpop.f32.mrf.mxu0  ;;  %v3214_v23 = vadd.f32 %v11421_v28, %v2972_v38  ;;  %v2979_v56 = vadd.f32 %v11449_v21, %v2721_v14  ;;  %v2729_v28 = vadd.f32 %v11399_v46, %v11397_v58  ;;  %v2740_v16 = vadd.f32 %v11403_v17, %v11401_v35 }
 0x1a4   :  { %13084 = vst [vmem:[#allocation29_spill] sm:$0xff] %v11489_v41  ;;  %v11499_v22 = vpop.f32.mrf.mxu1  ;;  %v3213_v41 = vadd.f32 %v8806_v59, %v2971_v48  ;;  %v3211_v8 = vadd.f32 %v3148_v34, %v2969_v45  ;;  %v2700_v59 = vadd.f32 %v11361_v52, %v11359_v53  ;;  %v2716_v45 = vadd.f32 %v11385_v51, %v11383_v2 }
 0x1a5   :  { %v11495_v3 = vpop.f32.mrf.mxu0  ;;  %v2976_v52 = vadd.f32 %v11441_v49, %v2708_v37  ;;  %v3212_v61 = vadd.f32 %v11424_v7, %v2970_v39  ;;  %v3215_v7 = vadd.f32 %v11439_v1, %v2973_v62  ;;  %v2980_v26 = vadd.f32 %v11466_v42, %v2724_v31  ;;  %v13085_v1 = vld [vmem:[#allocation25_spill] sm:$0xff] }
 0x1a6   :  { %v8830_v54 = vpop.f32.mrf.mxu1  ;;  %v2974_v9 = vadd.f32 %v11445_v0, %v2700_v59  ;;  %v2978_v6 = vadd.f32 %v11471_v36, %v2716_v45  ;;  %v13086_v29 = vld [vmem:[#allocation9_spill] sm:$0xff]  ;;  %v13087_v36 = vld [vmem:[#allocation8_spill] sm:$0xff] }
 0x1a7   :  { %v11501_v11 = vpop.f32.mrf.mxu0  ;;  %v3455_v5 = vadd.f32 %v8830_v54, %v3213_v41  ;;  %v2713_v41 = vadd.f32 %v11373_v30, %v11371_v25  ;;  %v2737_v30 = vadd.f32 %v11389_v18, %v11387_v24  ;;  %v11545_v18 = vadd.f32 %v11409_v15, %v11407_v19 }
 0x1a8   :  { %v3390_v40 = vpop.f32.mrf.mxu1  ;;  %v3218_v35 = vadd.f32 %v11443_v10, %v2976_v52  ;;  %v3216_v17 = vadd.f32 %v11447_v12, %v2974_v9  ;;  %v3221_v15 = vadd.f32 %v11451_v60, %v2979_v56  ;;  %v3222_v54 = vadd.f32 %v13087_v36, %v2980_v26 }
 0x1a9   :  { %v8854_v57 = vpop.f32.mrf.mxu0  ;;  %v3453_v47 = vadd.f32 %v3390_v40, %v3211_v8  ;;  %v2977_v2 = vadd.f32 %v2938_v4, %v2713_v41  ;;  %v2983_v10 = vadd.f32 %v13086_v29, %v2737_v30  ;;  %v13089_v31 = vld [vmem:[#allocation10_spill] sm:$0xff] }
 0x1aa   :  { %v3697_v63 = vadd.f32 %v8854_v57, %v3455_v5  ;;  %v8831_v55 = vpop.f32.mrf.mxu1  ;;  %v13088_v5 = vld [vmem:[#allocation27_spill] sm:$0xff] }
 0x1ab   :  { %v3632_v48 = vpop.f32.mrf.mxu0  ;;  %v3456_v25 = vadd.f32 %v8831_v55, %v3214_v23  ;;  %v3219_v0 = vadd.f32 %v13085_v1, %v2977_v2  ;;  %v3220_v37 = vadd.f32 %v13088_v5, %v2978_v6  ;;  %v3225_v45 = vadd.f32 %v13089_v31, %v2983_v10 }
 0x1ac   :  { %7441 = vst.msk [vmem:[%s12855_s8 + $0x90] sm:$0xff] %vm12903_vm1, %v3697_v63  ;;  %v3695_v44 = vadd.f32 %v3632_v48, %v3453_v47  ;;  %v3393_v51 = vpop.f32.mrf.mxu1  ;;  %v3768_v33 = vmul.f32 %v3697_v63, %v3697_v63  ;;  %v3731_v59 = vsel %vm12903_vm1, %v3697_v63, 0.0 }
 0x1ad   :  { %v8855_v53 = vpop.f32.mrf.mxu0  ;;  %v3454_v58 = vadd.f32 %v3393_v51, %v3212_v61  ;;  %v13090_v61 = vld [vmem:[#allocation11_spill] sm:$0xff] }
 0x1ae   :  { %7439 = vst.msk [vmem:[%s12855_s8 + $0x80] sm:$0xff] %vm12903_vm1, %v3695_v44  ;;  %v3698_v24 = vadd.f32 %v8855_v53, %v3456_v25  ;;  %v8834_v46 = vpop.f32.mrf.mxu1  ;;  %v3766_v21 = vmul.f32 %v3695_v44, %v3695_v44  ;;  %v3728_v57 = vsel %vm12903_vm1, %v3695_v44, 0.0  ;;  %v3785_v62 = vsel %vm12903_vm1, %v3768_v33, 0.0 }
 0x1af   :  { %v3635_v34 = vpop.f32.mrf.mxu0  ;;  %v3459_v19 = vadd.f32 %v8834_v46, %v3217_v13  ;;  %v2981_v56 = vadd.f32 %v13090_v61, %v2729_v28  ;;  %v2984_v13 = vadd.f32 %v11493_v50, %v2740_v16 }
 0x1b0   :  { %7442 = vst.msk [vmem:[%s12855_s8 + $0x98] sm:$0xff] %vm12903_vm1, %v3698_v24  ;;  %v3696_v4 = vadd.f32 %v3635_v34, %v3454_v58  ;;  %v3406_v42 = vpop.f32.mrf.mxu1  ;;  %v3782_v40 = vsel %vm12903_vm1, %v3766_v21, 0.0  ;;  %v3769_v48 = vmul.f32 %v3698_v24, %v3698_v24  ;;  %v3733_v53 = vsel %vm12903_vm1, %v3698_v24, 0.0 }
 0x1b1   :  { %v8858_v49 = vpop.f32.mrf.mxu0  ;;  %v3457_v43 = vadd.f32 %v3406_v42, %v3215_v7  ;;  %v2982_v21 = vadd.f32 %v11499_v22, %v11545_v18 }
 0x1b2   :  { %v3701_v12 = vadd.f32 %v8858_v49, %v3459_v19  ;;  %7440 = vst.msk [vmem:[%s12855_s8 + $0x88] sm:$0xff] %vm12903_vm1, %v3696_v4  ;;  %v3729_v60 = vsel %vm12903_vm1, %v3696_v4, 0.0  ;;  %v3767_v27 = vmul.f32 %v3696_v4, %v3696_v4  ;;  %v8835_v32 = vpop.f32.mrf.mxu1  ;;  %v3787_v7 = vsel %vm12903_vm1, %v3769_v48, 0.0 }
 0x1b3   :  { %v3648_v38 = vpop.f32.mrf.mxu0  ;;  %v3730_v14 = vadd.f32 %v3729_v60, %v3728_v57  ;;  %v3460_v20 = vadd.f32 %v8835_v32, %v3218_v35  ;;  %v13091_v57 = vld [vmem:[#allocation29_spill] sm:$0xff] }
 0x1b4   :  { %7445 = vst.msk [vmem:[%s12855_s8 + $0xb0] sm:$0xff] %vm12903_vm1, %v3701_v12  ;;  %v3699_v39 = vadd.f32 %v3648_v38, %v3457_v43  ;;  %v3783_v23 = vsel %vm12903_vm1, %v3767_v27, 0.0  ;;  %v3409_v47 = vpop.f32.mrf.mxu1  ;;  %v3772_v6 = vmul.f32 %v3701_v12, %v3701_v12  ;;  %v3739_v4 = vsel %vm12903_vm1, %v3701_v12, 0.0 }
 0x1b5   :  { %v8859_v8 = vpop.f32.mrf.mxu0  ;;  %v3732_v63 = vadd.f32 %v3731_v59, %v3730_v14  ;;  %v3784_v55 = vadd.f32 %v3783_v23, %v3782_v40  ;;  %v3458_v44 = vadd.f32 %v3409_v47, %v3216_v17  ;;  %v3223_v60 = vadd.f32 %v13091_v57, %v2981_v56 }
 0x1b6   :  { %7443 = vst.msk [vmem:[%s12855_s8 + $0xa0] sm:$0xff] %vm12903_vm1, %v3699_v39  ;;  %v3770_v52 = vmul.f32 %v3699_v39, %v3699_v39  ;;  %v3702_v9 = vadd.f32 %v8859_v8, %v3460_v20  ;;  %v8838_v25 = vpop.f32.mrf.mxu1  ;;  %v3735_v26 = vsel %vm12903_vm1, %v3699_v39, 0.0  ;;  %v3793_v12 = vsel %vm12903_vm1, %v3772_v6, 0.0 }
 0x1b7   :  { %v3651_v41 = vpop.f32.mrf.mxu0  ;;  %v3786_v2 = vadd.f32 %v3785_v62, %v3784_v55  ;;  %v3734_v51 = vadd.f32 %v3733_v53, %v3732_v63  ;;  %v3463_v34 = vadd.f32 %v8838_v25, %v3221_v15  ;;  %v3226_v23 = vadd.f32 %v11495_v3, %v2984_v13 }
 0x1b8   :  { %7446 = vst.msk [vmem:[%s12855_s8 + $0xb8] sm:$0xff] %vm12903_vm1, %v3702_v9  ;;  %v3700_v24 = vadd.f32 %v3651_v41, %v3458_v44  ;;  %v3422_v58 = vpop.f32.mrf.mxu1  ;;  %v3789_v19 = vsel %vm12903_vm1, %v3770_v52, 0.0  ;;  %v3773_v38 = vmul.f32 %v3702_v9, %v3702_v9  ;;  %v3741_v32 = vsel %vm12903_vm1, %v3702_v9, 0.0 }
 0x1b9   :  { %v8862_v30 = vpop.f32.mrf.mxu0  ;;  %v3736_v49 = vadd.f32 %v3735_v26, %v3734_v51  ;;  %v3788_v35 = vadd.f32 %v3787_v7, %v3786_v2  ;;  %v3461_v17 = vadd.f32 %v3422_v58, %v3219_v0 }
 0x1ba   :  { %v3705_v28 = vadd.f32 %v8862_v30, %v3463_v34  ;;  %7444 = vst.msk [vmem:[%s12855_s8 + $0xa8] sm:$0xff] %vm12903_vm1, %v3700_v24  ;;  %v3737_v50 = vsel %vm12903_vm1, %v3700_v24, 0.0  ;;  %v3771_v16 = vmul.f32 %v3700_v24, %v3700_v24  ;;  %v8839_v15 = vpop.f32.mrf.mxu1  ;;  %v3795_v20 = vsel %vm12903_vm1, %v3773_v38, 0.0  ;;  %v13093_v38 = vld [vmem:[#allocation17_spill] sm:$0xff] }
 0x1bb   :  { %v3664_v46 = vpop.f32.mrf.mxu0  ;;  %v3790_v42 = vadd.f32 %v3789_v19, %v3788_v35  ;;  %v3738_v0 = vadd.f32 %v3737_v50, %v3736_v49  ;;  %v3464_v33 = vadd.f32 %v8839_v15, %v3222_v54  ;;  %v13092_v19 = vld [vmem:[#allocation4_spill] sm:$0xff] }
 0x1bc   :  { %7449 = vst.msk [vmem:[%s12855_s8 + $0xd0] sm:$0xff] %vm12903_vm1, %v3705_v28  ;;  %v3791_v29 = vsel %vm12903_vm1, %v3771_v16, 0.0  ;;  %v3703_v10 = vadd.f32 %v3664_v46, %v3461_v17  ;;  %v3425_v43 = vpop.f32.mrf.mxu1  ;;  %v3747_v2 = vsel %vm12903_vm1, %v3705_v28, 0.0  ;;  %v2231_v50 = vrot.slane %v13092_v19, 4 }
 0x1bd   :  { %v8863_v1 = vpop.f32.mrf.mxu0  ;;  %v3740_v27 = vadd.f32 %v3739_v4, %v3738_v0  ;;  %v3792_v22 = vadd.f32 %v3791_v29, %v3790_v42  ;;  %v3462_v18 = vadd.f32 %v3425_v43, %v3220_v37  ;;  %v3224_v37 = vadd.f32 %v11501_v11, %v2982_v21 }
 0x1be   :  { %7447 = vst.msk [vmem:[%s12855_s8 + $0xc0] sm:$0xff] %vm12903_vm1, %v3703_v10  ;;  %v3774_v8 = vmul.f32 %v3703_v10, %v3703_v10  ;;  %v3706_v5 = vadd.f32 %v8863_v1, %v3464_v33  ;;  %v8842_v59 = vpop.f32.mrf.mxu1  ;;  %v3743_v47 = vsel %vm12903_vm1, %v3703_v10, 0.0  ;;  %v2285_v29 = vrot.slane %v13093_v38, 4 }
 0x1bf   :  { %v3667_v36 = vpop.f32.mrf.mxu0  ;;  %v3794_v14 = vadd.f32 %v3793_v12, %v3792_v22  ;;  %v3742_v39 = vadd.f32 %v3741_v32, %v3740_v27  ;;  %v3467_v48 = vadd.f32 %v8842_v59, %v3225_v45  ;;  %v3776_v45 = vmul.f32 %v3705_v28, %v3705_v28 }
 0x1c0   :  { %v3704_v40 = vadd.f32 %v3667_v36, %v3462_v18  ;;  %7450 = vst.msk [vmem:[%s12855_s8 + $0xd8] sm:$0xff] %vm12903_vm1, %v3706_v5  ;;  %v3438_v41 = vpop.f32.mrf.mxu1  ;;  %v3797_v55 = vsel %vm12903_vm1, %v3774_v8, 0.0  ;;  %v3777_v51 = vmul.f32 %v3706_v5, %v3706_v5  ;;  %v3749_v35 = vsel %vm12903_vm1, %v3706_v5, 0.0 }
 0x1c1   :  { %v8866_v54 = vpop.f32.mrf.mxu0  ;;  %v3744_v62 = vadd.f32 %v3743_v47, %v3742_v39  ;;  %v3796_v63 = vadd.f32 %v3795_v20, %v3794_v14  ;;  %v3465_v52 = vadd.f32 %v3438_v41, %v3223_v60  ;;  %v3801_v49 = vsel %vm12903_vm1, %v3776_v45, 0.0 }
 0x1c2   :  { %7448 = vst.msk [vmem:[%s12855_s8 + $0xc8] sm:$0xff] %vm12903_vm1, %v3704_v40  ;;  %v3745_v11 = vsel %vm12903_vm1, %v3704_v40, 0.0  ;;  %v3775_v3 = vmul.f32 %v3704_v40, %v3704_v40  ;;  %v3709_v53 = vadd.f32 %v8866_v54, %v3467_v48  ;;  %v8843_v9 = vpop.f32.mrf.mxu1  ;;  %v3803_v1 = vsel %vm12903_vm1, %v3777_v51, 0.0 }
 0x1c3   :  { %v3680_v31 = vpop.f32.mrf.mxu0  ;;  %v3798_v25 = vadd.f32 %v3797_v55, %v3796_v63  ;;  %v3746_v30 = vadd.f32 %v3745_v11, %v3744_v62  ;;  %v3468_v56 = vadd.f32 %v8843_v9, %v3226_v23  ;;  %v2232_v18 = vadd.f32 %v2231_v50, %v13092_v19 }
 0x1c4   :  { %v3799_v61 = vsel %vm12903_vm1, %v3775_v3, 0.0  ;;  %7453 = vst.msk [vmem:[%s12855_s8 + $0xf0] sm:$0xff] %vm12903_vm1, %v3709_v53  ;;  %v3707_v34 = vadd.f32 %v3680_v31, %v3465_v52  ;;  %v3441_v13 = vpop.f32.mrf.mxu1  ;;  %v3780_v43 = vmul.f32 %v3709_v53, %v3709_v53  ;;  %v3755_v8 = vsel %vm12903_vm1, %v3709_v53, 0.0 }
 0x1c5   :  { %v8867_v44 = vpop.f32.mrf.mxu0  ;;  %v3748_v26 = vadd.f32 %v3747_v2, %v3746_v30  ;;  %v3800_v24 = vadd.f32 %v3799_v61, %v3798_v25  ;;  %v3466_v46 = vadd.f32 %v3441_v13, %v3224_v37  ;;  %v2286_v39 = vadd.f32 %v2285_v29, %v13093_v38 }
 0x1c6   :  { %v3710_v58 = vadd.f32 %v8867_v44, %v3468_v56  ;;  %7451 = vst.msk [vmem:[%s12855_s8 + $0xe0] sm:$0xff] %vm12903_vm1, %v3707_v34  ;;  %v3778_v28 = vmul.f32 %v3707_v34, %v3707_v34  ;;  %v11636_v17 = vpop.f32.mrf.mxu1  ;;  %v3751_v21 = vsel %vm12903_vm1, %v3707_v34, 0.0  ;;  %v3809_v23 = vsel %vm12903_vm1, %v3780_v43, 0.0 }
 0x1c7   :  { %v3683_v7 = vpop.f32.mrf.mxu0  ;;  %v3802_v16 = vadd.f32 %v3801_v49, %v3800_v24  ;;  %v3750_v15 = vadd.f32 %v3749_v35, %v3748_v26  ;;  %v2233_v41 = vrot.slane %v2232_v18, 2  ;;  %v2287_v45 = vrot.slane %v2286_v39, 2 }
 0x1c8   :  { %7454 = vst.msk [vmem:[%s12855_s8 + $0xf8] sm:$0xff] %vm12903_vm1, %v3710_v58  ;;  %v3708_v4 = vadd.f32 %v3683_v7, %v3466_v46  ;;  %v11647_v42 = vpop.f32.mrf.mxu1  ;;  %v3805_v36 = vsel %vm12903_vm1, %v3778_v28, 0.0  ;;  %v3781_v5 = vmul.f32 %v3710_v58, %v3710_v58  ;;  %v3757_v37 = vsel %vm12903_vm1, %v3710_v58, 0.0 }
 0x1c9   :  { %v11638_v6 = vpop.f32.mrf.mxu0  ;;  %v3752_v10 = vadd.f32 %v3751_v21, %v3750_v15  ;;  %v3804_v33 = vadd.f32 %v3803_v1, %v3802_v16  ;;  %v2234_v44 = vadd.f32 %v2233_v41, %v2232_v18  ;;  %v2288_v2 = vadd.f32 %v2287_v45, %v2286_v39 }
 0x1ca   :  { %7452 = vst.msk [vmem:[%s12855_s8 + $0xe8] sm:$0xff] %vm12903_vm1, %v3708_v4  ;;  %v3753_v57 = vsel %vm12903_vm1, %v3708_v4, 0.0  ;;  %v3779_v60 = vmul.f32 %v3708_v4, %v3708_v4  ;;  %v11658_v27 = vpop.f32.mrf.mxu1  ;;  %v3811_v63 = vsel %vm12903_vm1, %v3781_v5, 0.0 }
 0x1cb   :  { %v11649_v0 = vpop.f32.mrf.mxu0  ;;  %v3806_v12 = vadd.f32 %v3805_v36, %v3804_v33  ;;  %v3754_v32 = vadd.f32 %v3753_v57, %v3752_v10  ;;  %v2235_v26 = vrot.slane %v2234_v44, 1  ;;  %v2289_v35 = vrot.slane %v2288_v2, 1 }
 0x1cc   :  { %v3807_v59 = vsel %vm12903_vm1, %v3779_v60, 0.0  ;;  %v11665_v54 = vpop.f32.mrf.mxu1 }
 0x1cd   :  { %v11660_v22 = vpop.f32.mrf.mxu0  ;;  %v3756_v40 = vadd.f32 %v3755_v8, %v3754_v32  ;;  %v3808_v48 = vadd.f32 %v3807_v59, %v3806_v12  ;;  %v2236_v15 = vadd.f32 %v2235_v26, %v2234_v44  ;;  %v2290_v29 = vadd.f32 %v2289_v35, %v2288_v2 }
 0x1ce   :  { %v11672_v20 = vpop.f32.mrf.mxu1 }
 0x1cf   :  { %v11667_v14 = vpop.f32.mrf.mxu0  ;;  %v3758_v31 = vadd.f32 %v3757_v37, %v3756_v40  ;;  %v3810_v62 = vadd.f32 %v3809_v23, %v3808_v48 }
 0x1d0   :  { %v11677_v11 = vpop.f32.mrf.mxu1 }
 0x1d1   :  { %v11674_v47 = vpop.f32.mrf.mxu0  ;;  %v3759_v55 = vrot.slane %v3758_v31, 4  ;;  %v3812_v53 = vadd.f32 %v3811_v63, %v3810_v62 }
 0x1d2   :  { %v11681_v52 = vpop.f32.mrf.mxu1 }
 0x1d3   :  { %v11679_v3 = vpop.f32.mrf.mxu0  ;;  %v3760_v25 = vadd.f32 %v3759_v55, %v3758_v31  ;;  %v3813_v30 = vrot.slane %v3812_v53, 4 }
 0x1d4   :  { %v11685_v61 = vpop.f32.mrf.mxu1 }
 0x1d5   :  { %v11683_v9 = vpop.f32.mrf.mxu0  ;;  %v3761_v51 = vrot.slane %v3760_v25, 2  ;;  %v3814_v34 = vadd.f32 %v3813_v30, %v3812_v53 }
 0x1d6   :  { %v11689_v13 = vpop.f32.mrf.mxu1 }
 0x1d7   :  { %v11687_v56 = vpop.f32.mrf.mxu0  ;;  %v3762_v24 = vadd.f32 %v3761_v51, %v3760_v25  ;;  %v3815_v58 = vrot.slane %v3814_v34, 2 }
 0x1d8   :  { %v11693_v46 = vpop.f32.mrf.mxu1 }
 0x1d9   :  { %v11691_v7 = vpop.f32.mrf.mxu0  ;;  %v3763_v28 = vrot.slane %v3762_v24, 1  ;;  %v3816_v19 = vadd.f32 %v3815_v58, %v3814_v34 }
 0x1da   :  { %v11697_v50 = vpop.f32.mrf.mxu1 }
 0x1db   :  { %v11695_v49 = vpop.f32.mrf.mxu0  ;;  %v3764_v1 = vadd.f32 %v3763_v28, %v3762_v24  ;;  %v3817_v21 = vrot.slane %v3816_v19, 1 }
 0x1dc   :  { %v11701_v4 = vpop.f32.mrf.mxu1 }
 0x1dd   :  { %v11699_v16 = vpop.f32.mrf.mxu0  ;;  %v11705_v10 = vadd.f32 %v3764_v1, %v2236_v15  ;;  %v3818_v33 = vadd.f32 %v3817_v21, %v3816_v19  ;;  %v4217_v1 = vadd.f32 %v11638_v6, %v11636_v17 }
 0x1de   :  { %v11707_v43 = vpop.f32.mrf.mxu1 }
 0x1df   :  { %v11703_v38 = vpop.f32.mrf.mxu0  ;;  %13094 = vst [vmem:[#allocation12_spill] sm:$0xff] %v11705_v10  ;;  %v11711_v57 = vadd.f32 %v3818_v33, %v2290_v29  ;;  %v4209_v33 = vadd.f32 %v11649_v0, %v11647_v42  ;;  %v4233_v0 = vadd.f32 %v11674_v47, %v11672_v20 }
 0x1e0   :  { %v11713_v60 = vpop.f32.mrf.mxu1 }
 0x1e1   :  { %v11709_v36 = vpop.f32.mrf.mxu0  ;;  %13095 = vst [vmem:[#allocation13_spill] sm:$0xff] %v11711_v57 }
 0x1e2   :  { %v11717_v12 = vpop.f32.mrf.mxu1 }
 0x1e3   :  { %v11715_v18 = vpop.f32.mrf.mxu0 }
 0x1e4   :  { %v11721_v8 = vpop.f32.mrf.mxu1 }
 0x1e5   :  { %v11719_v32 = vpop.f32.mrf.mxu0 }
 0x1e6   :  { %v8926_v59 = vpop.f32.mrf.mxu1 }
 0x1e7   :  { %v11723_v5 = vpop.f32.mrf.mxu0  ;;  %v4499_v57 = vadd.f32 %v8926_v59, %v4217_v1  ;;  %v4225_v59 = vadd.f32 %v11679_v3, %v11677_v11  ;;  %v4241_v11 = vadd.f32 %v11695_v49, %v11693_v46  ;;  %v4252_v3 = vadd.f32 %v11699_v16, %v11697_v50 }
 0x1e8   :  { %v4434_v40 = vpop.f32.mrf.mxu1  ;;  %v4265_v46 = vadd.f32 %v11709_v36, %v11707_v43  ;;  %v11800_v43 = vadd.f32 %v11723_v5, %v11721_v8 }
 0x1e9   :  { %v8950_v39 = vpop.f32.mrf.mxu0 }
 0x1ea   :  { %v8927_v23 = vpop.f32.mrf.mxu1  ;;  %v4741_v17 = vadd.f32 %v8950_v39, %v4499_v57  ;;  %v4228_v57 = vadd.f32 %v11687_v56, %v11685_v61  ;;  %v4249_v39 = vadd.f32 %v11691_v7, %v11689_v13 }
 0x1eb   :  { %v4676_v48 = vpop.f32.mrf.mxu0 }
 0x1ec   :  { %v4437_v41 = vpop.f32.mrf.mxu1 }
 0x1ed   :  { %v8951_v37 = vpop.f32.mrf.mxu0 }
 0x1ee   :  { %v8930_v62 = vpop.f32.mrf.mxu1 }
 0x1ef   :  { %v4679_v31 = vpop.f32.mrf.mxu0 }
 0x1f0   :  { %v4450_v45 = vpop.f32.mrf.mxu1 }
 0x1f1   :  { %v11725_v63 = vpop.f32.mrf.mxu0 }
 0x1f2   :  { %v8931_v53 = vpop.f32.mrf.mxu1 }
 0x1f3   :  { %v11727_v55 = vpop.f32.mrf.mxu0 }
 0x1f4   :  { %v4453_v25 = vpop.f32.mrf.mxu1 }
 0x1f5   :  { %v11729_v44 = vpop.f32.mrf.mxu0  ;;  %v4502_v7 = vadd.f32 %v4453_v25, %v4228_v57 }
 0x1f6   :  { %v8934_v2 = vpop.f32.mrf.mxu1 }
 0x1f7   :  { %v11731_v30 = vpop.f32.mrf.mxu0  ;;  %v4507_v50 = vadd.f32 %v8934_v2, %v4249_v39 }
 0x1f8   :  { %v4466_v34 = vpop.f32.mrf.mxu1 }
 0x1f9   :  { %v11733_v51 = vpop.f32.mrf.mxu0  ;;  %v4505_v16 = vadd.f32 %v4466_v34, %v4241_v11 }
 0x1fa   :  { %v8935_v24 = vpop.f32.mrf.mxu1  ;;  %v4749_v8 = vadd.f32 %v11733_v51, %v4507_v50 }
 0x1fb   :  { %v11735_v26 = vpop.f32.mrf.mxu0 }
 0x1fc   :  { %13096 = vst [vmem:[#allocation14_spill] sm:$0xff] %v11735_v26  ;;  %v11739_v35 = vpop.f32.mrf.mxu1 }
 0x1fd   :  { %v11737_v58 = vpop.f32.mrf.mxu0 }
 0x1fe   :  { %13097 = vst [vmem:[#allocation15_spill] sm:$0xff] %v11737_v58  ;;  %v11743_v19 = vpop.f32.mrf.mxu1 }
 0x1ff   :  { %v11741_v28 = vpop.f32.mrf.mxu0  ;;  %13099 = vst [vmem:[#allocation18_spill] sm:$0xff] %v11743_v19  ;;  %v4497_v19 = vadd.f32 %v4434_v40, %v4209_v33 }
 0x200   :  { %13098 = vst [vmem:[#allocation16_spill] sm:$0xff] %v11741_v28  ;;  %v11749_v21 = vpop.f32.mrf.mxu1  ;;  %v4220_v28 = vadd.f32 %v11660_v22, %v11658_v27  ;;  %v4236_v22 = vadd.f32 %v11683_v9, %v11681_v52  ;;  %v4244_v52 = vadd.f32 %v11703_v38, %v11701_v4  ;;  %v4501_v9 = vadd.f32 %v4450_v45, %v4225_v59 }
 0x201   :  { %v11745_v15 = vpop.f32.mrf.mxu0  ;;  %13101 = vst [vmem:[#allocation19_spill] sm:$0xff] %v11749_v21  ;;  %v4739_v1 = vadd.f32 %v4676_v48, %v4497_v19  ;;  %v4257_v38 = vadd.f32 %v11715_v18, %v11713_v60 }
 0x202   :  { %13100 = vst [vmem:[#allocation5_spill] sm:$0xff] %v11745_v15  ;;  %v11755_v10 = vpop.f32.mrf.mxu1  ;;  %v4500_v6 = vadd.f32 %v8927_v23, %v4220_v28  ;;  %v4503_v28 = vadd.f32 %v8930_v62, %v4233_v0  ;;  %v4504_v13 = vadd.f32 %v8931_v53, %v4236_v22  ;;  %v4268_v62 = vadd.f32 %v11719_v32, %v11717_v12 }
 0x203   :  { %v11751_v29 = vpop.f32.mrf.mxu0  ;;  %v4743_v36 = vadd.f32 %v11727_v55, %v4501_v9  ;;  %v4744_v32 = vadd.f32 %v11731_v30, %v4502_v7  ;;  %v13103_v5 = vld [vmem:[#allocation14_spill] sm:$0xff] }
 0x204   :  { %13102 = vst [vmem:[#allocation26_spill] sm:$0xff] %v11751_v29  ;;  %v11761_v15 = vpop.f32.mrf.mxu1  ;;  %v4212_v29 = vadd.f32 %v11667_v14, %v11665_v54  ;;  %v4742_v23 = vadd.f32 %v8951_v37, %v4500_v6  ;;  %v4745_v45 = vadd.f32 %v11725_v63, %v4503_v28  ;;  %v4746_v12 = vadd.f32 %v11729_v44, %v4504_v13 }
 0x205   :  { %v11757_v58 = vpop.f32.mrf.mxu0  ;;  %v4506_v63 = vadd.f32 %v11739_v35, %v4244_v52  ;;  %v4747_v55 = vadd.f32 %v13103_v5, %v4505_v16  ;;  %v13105_v35 = vld [vmem:[#allocation15_spill] sm:$0xff] }
 0x206   :  { %v8974_v21 = vpop.f32.mrf.mxu1  ;;  %v4498_v54 = vadd.f32 %v4437_v41, %v4212_v29  ;;  %v13104_v29 = vld [vmem:[#allocation18_spill] sm:$0xff] }
 0x207   :  { %v11763_v26 = vpop.f32.mrf.mxu0  ;;  %v4983_v27 = vadd.f32 %v8974_v21, %v4741_v17  ;;  %v4511_v44 = vadd.f32 %v13104_v29, %v4265_v46 }
 0x208   :  { %v4918_v14 = vpop.f32.mrf.mxu1  ;;  %v4740_v49 = vadd.f32 %v4679_v31, %v4498_v54  ;;  %v4508_v31 = vadd.f32 %v8935_v24, %v4252_v3 }
 0x209   :  { %v8998_v42 = vpop.f32.mrf.mxu0  ;;  %v4981_v47 = vadd.f32 %v4918_v14, %v4739_v1  ;;  %v13107_v3 = vld [vmem:[#allocation5_spill] sm:$0xff] }
 0x20a   :  { %v5225_v20 = vadd.f32 %v8998_v42, %v4983_v27  ;;  %v8975_v61 = vpop.f32.mrf.mxu1  ;;  %v4750_v6 = vadd.f32 %v13105_v35, %v4508_v31  ;;  %v13106_v27 = vld [vmem:[#allocation16_spill] sm:$0xff]  ;;  %v4753_v52 = vadd.f32 %v13107_v3, %v4511_v44 }
 0x20b   :  { %v5160_v40 = vpop.f32.mrf.mxu0  ;;  %v4984_v37 = vadd.f32 %v8975_v61, %v4742_v23  ;;  %v4748_v22 = vadd.f32 %v13106_v27, %v4506_v63 }
 0x20c   :  { %7713 = vst.msk [vmem:[%s12855_s8 + $0x110] sm:$0xff] %vm12903_vm1, %v5225_v20  ;;  %v5223_v48 = vadd.f32 %v5160_v40, %v4981_v47  ;;  %v4921_v41 = vpop.f32.mrf.mxu1  ;;  %v5296_v33 = vmul.f32 %v5225_v20, %v5225_v20  ;;  %v5259_v57 = vsel %vm12903_vm1, %v5225_v20, 0.0 }
 0x20d   :  { %v8999_v56 = vpop.f32.mrf.mxu0  ;;  %v4982_v25 = vadd.f32 %v4921_v41, %v4740_v49  ;;  %v13108_v49 = vld [vmem:[#allocation19_spill] sm:$0xff] }
 0x20e   :  { %7711 = vst.msk [vmem:[%s12855_s8 + $0x100] sm:$0xff] %vm12903_vm1, %v5223_v48  ;;  %v5226_v53 = vadd.f32 %v8999_v56, %v4984_v37  ;;  %v8978_v60 = vpop.f32.mrf.mxu1  ;;  %v5294_v34 = vmul.f32 %v5223_v48, %v5223_v48  ;;  %v5256_v42 = vsel %vm12903_vm1, %v5223_v48, 0.0  ;;  %v5313_v9 = vsel %vm12903_vm1, %v5296_v33, 0.0 }
 0x20f   :  { %v5163_v4 = vpop.f32.mrf.mxu0  ;;  %v4987_v2 = vadd.f32 %v8978_v60, %v4745_v45  ;;  %v4509_v50 = vadd.f32 %v13108_v49, %v4257_v38  ;;  %v4512_v45 = vadd.f32 %v11755_v10, %v4268_v62 }
 0x210   :  { %7714 = vst.msk [vmem:[%s12855_s8 + $0x118] sm:$0xff] %vm12903_vm1, %v5226_v53  ;;  %v5224_v24 = vadd.f32 %v5163_v4, %v4982_v25  ;;  %v4934_v19 = vpop.f32.mrf.mxu1  ;;  %v5310_v14 = vsel %vm12903_vm1, %v5294_v34, 0.0  ;;  %v5297_v40 = vmul.f32 %v5226_v53, %v5226_v53  ;;  %v5261_v56 = vsel %vm12903_vm1, %v5226_v53, 0.0 }
 0x211   :  { %v9002_v18 = vpop.f32.mrf.mxu0  ;;  %v4985_v17 = vadd.f32 %v4934_v19, %v4743_v36  ;;  %v4510_v34 = vadd.f32 %v11761_v15, %v11800_v43 }
 0x212   :  { %v5229_v30 = vadd.f32 %v9002_v18, %v4987_v2  ;;  %7712 = vst.msk [vmem:[%s12855_s8 + $0x108] sm:$0xff] %vm12903_vm1, %v5224_v24  ;;  %v5257_v51 = vsel %vm12903_vm1, %v5224_v24, 0.0  ;;  %v5295_v0 = vmul.f32 %v5224_v24, %v5224_v24  ;;  %v8979_v59 = vpop.f32.mrf.mxu1  ;;  %v5315_v36 = vsel %vm12903_vm1, %v5297_v40, 0.0 }
 0x213   :  { %v5176_v21 = vpop.f32.mrf.mxu0  ;;  %v5258_v39 = vadd.f32 %v5257_v51, %v5256_v42  ;;  %v4988_v28 = vadd.f32 %v8979_v59, %v4746_v12  ;;  %v13109_v42 = vld [vmem:[#allocation26_spill] sm:$0xff] }
 0x214   :  { %7717 = vst.msk [vmem:[%s12855_s8 + $0x130] sm:$0xff] %vm12903_vm1, %v5229_v30  ;;  %v5227_v54 = vadd.f32 %v5176_v21, %v4985_v17  ;;  %v5311_v23 = vsel %vm12903_vm1, %v5295_v0, 0.0  ;;  %v4937_v47 = vpop.f32.mrf.mxu1  ;;  %v5300_v63 = vmul.f32 %v5229_v30, %v5229_v30  ;;  %v5267_v24 = vsel %vm12903_vm1, %v5229_v30, 0.0 }
 0x215   :  { %v9003_v1 = vpop.f32.mrf.mxu0  ;;  %v5260_v20 = vadd.f32 %v5259_v57, %v5258_v39  ;;  %v5312_v61 = vadd.f32 %v5311_v23, %v5310_v14  ;;  %v4986_v48 = vadd.f32 %v4937_v47, %v4744_v32  ;;  %v4751_v51 = vadd.f32 %v13109_v42, %v4509_v50 }
 0x216   :  { %7715 = vst.msk [vmem:[%s12855_s8 + $0x120] sm:$0xff] %vm12903_vm1, %v5227_v54  ;;  %v5298_v13 = vmul.f32 %v5227_v54, %v5227_v54  ;;  %v5230_v7 = vadd.f32 %v9003_v1, %v4988_v28  ;;  %v8982_v37 = vpop.f32.mrf.mxu1  ;;  %v5263_v31 = vsel %vm12903_vm1, %v5227_v54, 0.0  ;;  %v5321_v30 = vsel %vm12903_vm1, %v5300_v63, 0.0 }
 0x217   :  { %v5179_v11 = vpop.f32.mrf.mxu0  ;;  %v5314_v16 = vadd.f32 %v5313_v9, %v5312_v61  ;;  %v5262_v41 = vadd.f32 %v5261_v56, %v5260_v20  ;;  %v4991_v4 = vadd.f32 %v8982_v37, %v4749_v8  ;;  %v4754_v23 = vadd.f32 %v11757_v58, %v4512_v45 }
 0x218   :  { %7718 = vst.msk [vmem:[%s12855_s8 + $0x138] sm:$0xff] %vm12903_vm1, %v5230_v7  ;;  %v5228_v53 = vadd.f32 %v5179_v11, %v4986_v48  ;;  %v4950_v25 = vpop.f32.mrf.mxu1  ;;  %v5317_v2 = vsel %vm12903_vm1, %v5298_v13, 0.0  ;;  %v5301_v21 = vmul.f32 %v5230_v7, %v5230_v7  ;;  %v5269_v59 = vsel %vm12903_vm1, %v5230_v7, 0.0 }
 0x219   :  { %v9006_v46 = vpop.f32.mrf.mxu0  ;;  %v5264_v18 = vadd.f32 %v5263_v31, %v5262_v41  ;;  %v5316_v12 = vadd.f32 %v5315_v36, %v5314_v16  ;;  %v4989_v32 = vadd.f32 %v4950_v25, %v4747_v55 }
 0x21a   :  { %v5233_v38 = vadd.f32 %v9006_v46, %v4991_v4  ;;  %7716 = vst.msk [vmem:[%s12855_s8 + $0x128] sm:$0xff] %vm12903_vm1, %v5228_v53  ;;  %v5265_v10 = vsel %vm12903_vm1, %v5228_v53, 0.0  ;;  %v5299_v62 = vmul.f32 %v5228_v53, %v5228_v53  ;;  %v8983_v8 = vpop.f32.mrf.mxu1  ;;  %v5323_v28 = vsel %vm12903_vm1, %v5301_v21, 0.0 }
 0x21b   :  { %v5192_v60 = vpop.f32.mrf.mxu0  ;;  %v5318_v19 = vadd.f32 %v5317_v2, %v5316_v12  ;;  %v5266_v55 = vadd.f32 %v5265_v10, %v5264_v18  ;;  %v4992_v33 = vadd.f32 %v8983_v8, %v4750_v6 }
 0x21c   :  { %7721 = vst.msk [vmem:[%s12855_s8 + $0x150] sm:$0xff] %vm12903_vm1, %v5233_v38  ;;  %v5319_v29 = vsel %vm12903_vm1, %v5299_v62, 0.0  ;;  %v5231_v44 = vadd.f32 %v5192_v60, %v4989_v32  ;;  %v4953_v17 = vpop.f32.mrf.mxu1  ;;  %v5275_v16 = vsel %vm12903_vm1, %v5233_v38, 0.0 }
 0x21d   :  { %v9007_v5 = vpop.f32.mrf.mxu0  ;;  %v5268_v0 = vadd.f32 %v5267_v24, %v5266_v55  ;;  %v5320_v15 = vadd.f32 %v5319_v29, %v5318_v19  ;;  %v4990_v43 = vadd.f32 %v4953_v17, %v4748_v22  ;;  %v4752_v22 = vadd.f32 %v11763_v26, %v4510_v34 }
 0x21e   :  { %7719 = vst.msk [vmem:[%s12855_s8 + $0x140] sm:$0xff] %vm12903_vm1, %v5231_v44  ;;  %v5302_v1 = vmul.f32 %v5231_v44, %v5231_v44  ;;  %v5234_v27 = vadd.f32 %v9007_v5, %v4992_v33  ;;  %v8986_v57 = vpop.f32.mrf.mxu1  ;;  %v5271_v47 = vsel %vm12903_vm1, %v5231_v44, 0.0 }
 0x21f   :  { %v5195_v35 = vpop.f32.mrf.mxu0  ;;  %v5322_v39 = vadd.f32 %v5321_v30, %v5320_v15  ;;  %v5270_v54 = vadd.f32 %v5269_v59, %v5268_v0  ;;  %v4995_v40 = vadd.f32 %v8986_v57, %v4753_v52  ;;  %v5304_v52 = vmul.f32 %v5233_v38, %v5233_v38 }
 0x220   :  { %v5232_v14 = vadd.f32 %v5195_v35, %v4990_v43  ;;  %7722 = vst.msk [vmem:[%s12855_s8 + $0x158] sm:$0xff] %vm12903_vm1, %v5234_v27  ;;  %v4966_v11 = vpop.f32.mrf.mxu1  ;;  %v5325_v61 = vsel %vm12903_vm1, %v5302_v1, 0.0  ;;  %v5305_v41 = vmul.f32 %v5234_v27, %v5234_v27  ;;  %v5277_v12 = vsel %vm12903_vm1, %v5234_v27, 0.0 }
 0x221   :  { %v9010_v6 = vpop.f32.mrf.mxu0  ;;  %v5272_v9 = vadd.f32 %v5271_v47, %v5270_v54  ;;  %v5324_v20 = vadd.f32 %v5323_v28, %v5322_v39  ;;  %v4993_v13 = vadd.f32 %v4966_v11, %v4751_v51  ;;  %v5329_v18 = vsel %vm12903_vm1, %v5304_v52, 0.0 }
 0x222   :  { %7720 = vst.msk [vmem:[%s12855_s8 + $0x148] sm:$0xff] %vm12903_vm1, %v5232_v14  ;;  %v5273_v26 = vsel %vm12903_vm1, %v5232_v14, 0.0  ;;  %v5303_v58 = vmul.f32 %v5232_v14, %v5232_v14  ;;  %v5237_v56 = vadd.f32 %v9010_v6, %v4995_v40  ;;  %v8987_v7 = vpop.f32.mrf.mxu1  ;;  %v5331_v62 = vsel %vm12903_vm1, %v5305_v41, 0.0 }
 0x223   :  { %v5208_v3 = vpop.f32.mrf.mxu0  ;;  %v5326_v37 = vadd.f32 %v5325_v61, %v5324_v20  ;;  %v5274_v46 = vadd.f32 %v5273_v26, %v5272_v9  ;;  %v4996_v50 = vadd.f32 %v8987_v7, %v4754_v23 }
 0x224   :  { %v5327_v49 = vsel %vm12903_vm1, %v5303_v58, 0.0  ;;  %7725 = vst.msk [vmem:[%s12855_s8 + $0x170] sm:$0xff] %vm12903_vm1, %v5237_v56  ;;  %v5235_v4 = vadd.f32 %v5208_v3, %v4993_v13  ;;  %v4969_v45 = vpop.f32.mrf.mxu1  ;;  %v5308_v21 = vmul.f32 %v5237_v56, %v5237_v56  ;;  %v5283_v0 = vsel %vm12903_vm1, %v5237_v56, 0.0 }
 0x225   :  { %v9011_v48 = vpop.f32.mrf.mxu0  ;;  %v5276_v31 = vadd.f32 %v5275_v16, %v5274_v46  ;;  %v5328_v53 = vadd.f32 %v5327_v49, %v5326_v37  ;;  %v4994_v60 = vadd.f32 %v4969_v45, %v4752_v22 }
 0x226   :  { %v5238_v25 = vadd.f32 %v9011_v48, %v4996_v50  ;;  %7723 = vst.msk [vmem:[%s12855_s8 + $0x160] sm:$0xff] %vm12903_vm1, %v5235_v4  ;;  %v5306_v38 = vmul.f32 %v5235_v4, %v5235_v4  ;;  %v5279_v8 = vsel %vm12903_vm1, %v5235_v4, 0.0  ;;  %v5337_v57 = vsel %vm12903_vm1, %v5308_v21, 0.0 }
 0x227   :  { %v5211_v36 = vpop.f32.mrf.mxu0  ;;  %v11890_v32 = vpop.f32.mrf.mxu1  ;;  %v5330_v2 = vadd.f32 %v5329_v18, %v5328_v53  ;;  %v5278_v10 = vadd.f32 %v5277_v12, %v5276_v31 }
 0x228   :  { %7726 = vst.msk [vmem:[%s12855_s8 + $0x178] sm:$0xff] %vm12903_vm1, %v5238_v25  ;;  %v5236_v5 = vadd.f32 %v5211_v36, %v4994_v60  ;;  %v5333_v29 = vsel %vm12903_vm1, %v5306_v38, 0.0  ;;  %v5309_v15 = vmul.f32 %v5238_v25, %v5238_v25  ;;  %v5285_v6 = vsel %vm12903_vm1, %v5238_v25, 0.0  ;;  %v13110_v25 = vld [vmem:[#allocation12_spill] sm:$0xff] }
 0x229   :  { %v11892_v63 = vpop.f32.mrf.mxu0  ;;  %v11900_v34 = vpop.f32.mrf.mxu1  ;;  %v5280_v19 = vadd.f32 %v5279_v8, %v5278_v10  ;;  %v5332_v55 = vadd.f32 %v5331_v62, %v5330_v2  ;;  %v13111_v2 = vld [vmem:[#allocation13_spill] sm:$0xff] }
 0x22a   :  { %7724 = vst.msk [vmem:[%s12855_s8 + $0x168] sm:$0xff] %vm12903_vm1, %v5236_v5  ;;  %v5281_v44 = vsel %vm12903_vm1, %v5236_v5, 0.0  ;;  %v5307_v33 = vmul.f32 %v5236_v5, %v5236_v5  ;;  %v5339_v23 = vsel %vm12903_vm1, %v5309_v15, 0.0 }
 0x22b   :  { %v11902_v24 = vpop.f32.mrf.mxu0  ;;  %v9023_v17 = vpop.f32.mrf.mxu1  ;;  %v5334_v42 = vadd.f32 %v5333_v29, %v5332_v55  ;;  %v5282_v51 = vadd.f32 %v5281_v44, %v5280_v19  ;;  %v5745_v29 = vadd.f32 %v11892_v63, %v11890_v32 }
 0x22c   :  { %v5335_v43 = vsel %vm12903_vm1, %v5307_v33, 0.0 }
 0x22d   :  { %v9047_v35 = vpop.f32.mrf.mxu0  ;;  %v11912_v30 = vpop.f32.mrf.mxu1  ;;  %v5284_v1 = vadd.f32 %v5283_v0, %v5282_v51  ;;  %v5336_v27 = vadd.f32 %v5335_v43, %v5334_v42  ;;  %v5737_v42 = vadd.f32 %v11902_v24, %v11900_v34 }
 0x22e   :  { %v5748_v43 = vadd.f32 %v9047_v35, %v9023_v17 }
 0x22f   :  { %v5739_v59 = vpop.f32.mrf.mxu0  ;;  %v9026_v39 = vpop.f32.mrf.mxu1  ;;  %v5286_v14 = vadd.f32 %v5285_v6, %v5284_v1  ;;  %v5338_v40 = vadd.f32 %v5337_v57, %v5336_v27 }
 0x230   :  { %v5740_v63 = vadd.f32 %v5739_v59, %v11912_v30 }
 0x231   :  { %v9050_v54 = vpop.f32.mrf.mxu0  ;;  %v5567_v22 = vpop.f32.mrf.mxu1  ;;  %v5287_v47 = vrot.slane %v5286_v14, 4  ;;  %v5340_v11 = vadd.f32 %v5339_v23, %v5338_v40 }
 0x232   :  { %v5761_v34 = vadd.f32 %v9050_v54, %v9026_v39 }
 0x233   :  { %v5752_v28 = vpop.f32.mrf.mxu0  ;;  %v11917_v3 = vpop.f32.mrf.mxu1  ;;  %v5288_v20 = vadd.f32 %v5287_v47, %v5286_v14  ;;  %v5341_v26 = vrot.slane %v5340_v11, 4 }
 0x235   :  { %v11919_v9 = vpop.f32.mrf.mxu0  ;;  %v11921_v58 = vpop.f32.mrf.mxu1  ;;  %v5289_v61 = vrot.slane %v5288_v20, 2  ;;  %v5342_v56 = vadd.f32 %v5341_v26, %v5340_v11  ;;  %v5753_v11 = vadd.f32 %v5752_v28, %v5567_v22 }
 0x236   :  { %v5764_v54 = vadd.f32 %v11919_v9, %v11917_v3 }
 0x237   :  { %v11923_v52 = vpop.f32.mrf.mxu0  ;;  %v11925_v13 = vpop.f32.mrf.mxu1  ;;  %v5290_v48 = vadd.f32 %v5289_v61, %v5288_v20  ;;  %v5343_v37 = vrot.slane %v5342_v56, 2 }
 0x239   :  { %v11927_v7 = vpop.f32.mrf.mxu0  ;;  %v11929_v46 = vpop.f32.mrf.mxu1  ;;  %v5291_v50 = vrot.slane %v5290_v48, 1  ;;  %v5344_v16 = vadd.f32 %v5343_v37, %v5342_v56  ;;  %v5756_v37 = vadd.f32 %v11923_v52, %v11921_v58 }
 0x23a   :  { %v5777_v3 = vadd.f32 %v11927_v7, %v11925_v13 }
 0x23b   :  { %v11931_v49 = vpop.f32.mrf.mxu0  ;;  %v11933_v41 = vpop.f32.mrf.mxu1  ;;  %v5292_v45 = vadd.f32 %v5291_v50, %v5290_v48  ;;  %v5345_v36 = vrot.slane %v5344_v16, 1 }
 0x23c   :  { %v5769_v13 = vadd.f32 %v11931_v49, %v11929_v46 }
 0x23d   :  { %v11935_v4 = vpop.f32.mrf.mxu0  ;;  %v11937_v31 = vpop.f32.mrf.mxu1  ;;  %v11942_v60 = vadd.f32 %v5292_v45, %v13110_v25  ;;  %v5346_v18 = vadd.f32 %v5345_v36, %v5344_v16 }
 0x23f   :  { %v11939_v53 = vpop.f32.mrf.mxu0  ;;  %v11944_v12 = vpop.f32.mrf.mxu1  ;;  %v11949_v10 = vadd.f32 %v5346_v18, %v13111_v2 }
 0x241   :  { %v11946_v38 = vpop.f32.mrf.mxu0  ;;  %v11951_v62 = vpop.f32.mrf.mxu1 }
 0x243   :  { %v11953_v8 = vpop.f32.mrf.mxu0  ;;  %v11955_v5 = vpop.f32.mrf.mxu1 }
 0x245   :  { %v11957_v19 = vpop.f32.mrf.mxu0  ;;  %v11959_v55 = vpop.f32.mrf.mxu1 }
 0x247   :  { %v11961_v21 = vpop.f32.mrf.mxu0  ;;  %v9070_v44 = vpop.f32.mrf.mxu1 }
 0x248   :  { %v6027_v51 = vadd.f32 %v9070_v44, %v5745_v29 }
 0x249   :  { %v9094_v33 = vpop.f32.mrf.mxu0  ;;  %v5962_v0 = vpop.f32.mrf.mxu1 }
 0x24a   :  { %v6269_v1 = vadd.f32 %v9094_v33, %v6027_v51  ;;  %v6025_v27 = vadd.f32 %v5962_v0, %v5737_v42 }
 0x24b   :  { %v6204_v15 = vpop.f32.mrf.mxu0  ;;  %v9071_v57 = vpop.f32.mrf.mxu1 }
 0x24c   :  { %7897 = vst.msk [vmem:[%s12855_s8 + $0x190] sm:$0xff] %vm12903_vm1, %v6269_v1  ;;  %v6267_v14 = vadd.f32 %v6204_v15, %v6025_v27  ;;  %v6028_v32 = vadd.f32 %v9071_v57, %v5748_v43  ;;  %v6340_v61 = vmul.f32 %v6269_v1, %v6269_v1  ;;  %v6303_v9 = vsel %vm12903_vm1, %v6269_v1, 0.0 }
 0x24d   :  { %v9095_v6 = vpop.f32.mrf.mxu0  ;;  %v5965_v40 = vpop.f32.mrf.mxu1  ;;  %v5780_v57 = vadd.f32 %v11935_v4, %v11933_v41 }
 0x24e   :  { %7895 = vst.msk [vmem:[%s12855_s8 + $0x180] sm:$0xff] %vm12903_vm1, %v6267_v14  ;;  %v6270_v24 = vadd.f32 %v9095_v6, %v6028_v32  ;;  %v6026_v17 = vadd.f32 %v5965_v40, %v5740_v63  ;;  %v6338_v30 = vmul.f32 %v6267_v14, %v6267_v14  ;;  %v6300_v22 = vsel %vm12903_vm1, %v6267_v14, 0.0 }
 0x24f   :  { %v6207_v23 = vpop.f32.mrf.mxu0  ;;  %v9074_v35 = vpop.f32.mrf.mxu1  ;;  %v6357_v7 = vsel %vm12903_vm1, %v6340_v61, 0.0  ;;  %v5772_v14 = vadd.f32 %v11939_v53, %v11937_v31 }
 0x250   :  { %7898 = vst.msk [vmem:[%s12855_s8 + $0x198] sm:$0xff] %vm12903_vm1, %v6270_v24  ;;  %v6031_v20 = vadd.f32 %v9074_v35, %v5761_v34  ;;  %v6268_v59 = vadd.f32 %v6207_v23, %v6026_v17  ;;  %v6354_v52 = vsel %vm12903_vm1, %v6338_v30, 0.0  ;;  %v6341_v25 = vmul.f32 %v6270_v24, %v6270_v24 }
 0x251   :  { %v9098_v47 = vpop.f32.mrf.mxu0  ;;  %v5978_v26 = vpop.f32.mrf.mxu1  ;;  %v6305_v51 = vsel %vm12903_vm1, %v6270_v24, 0.0  ;;  %v5793_v30 = vadd.f32 %v11946_v38, %v11944_v12 }
 0x252   :  { %v6273_v56 = vadd.f32 %v9098_v47, %v6031_v20  ;;  %v6029_v48 = vadd.f32 %v5978_v26, %v5753_v11  ;;  %7896 = vst.msk [vmem:[%s12855_s8 + $0x188] sm:$0xff] %vm12903_vm1, %v6268_v59  ;;  %v6301_v28 = vsel %vm12903_vm1, %v6268_v59, 0.0  ;;  %v6339_v50 = vmul.f32 %v6268_v59, %v6268_v59 }
 0x253   :  { %v6220_v39 = vpop.f32.mrf.mxu0  ;;  %v9075_v16 = vpop.f32.mrf.mxu1  ;;  %v6302_v36 = vadd.f32 %v6301_v28, %v6300_v22  ;;  %v6359_v32 = vsel %vm12903_vm1, %v6341_v25, 0.0 }
 0x254   :  { %7901 = vst.msk [vmem:[%s12855_s8 + $0x1b0] sm:$0xff] %vm12903_vm1, %v6273_v56  ;;  %v6271_v58 = vadd.f32 %v6220_v39, %v6029_v48  ;;  %v6355_v18 = vsel %vm12903_vm1, %v6339_v50, 0.0  ;;  %v6032_v2 = vadd.f32 %v9075_v16, %v5764_v54  ;;  %v6344_v35 = vmul.f32 %v6273_v56, %v6273_v56 }
 0x255   :  { %v9099_v45 = vpop.f32.mrf.mxu0  ;;  %v5981_v29 = vpop.f32.mrf.mxu1  ;;  %v6304_v33 = vadd.f32 %v6303_v9, %v6302_v36  ;;  %v6356_v42 = vadd.f32 %v6355_v18, %v6354_v52  ;;  %v6311_v59 = vsel %vm12903_vm1, %v6273_v56, 0.0  ;;  %v5785_v50 = vadd.f32 %v11953_v8, %v11951_v62 }
 0x256   :  { %7899 = vst.msk [vmem:[%s12855_s8 + $0x1a0] sm:$0xff] %vm12903_vm1, %v6271_v58  ;;  %v6342_v0 = vmul.f32 %v6271_v58, %v6271_v58  ;;  %v6274_v15 = vadd.f32 %v9099_v45, %v6032_v2  ;;  %v6030_v43 = vadd.f32 %v5981_v29, %v5756_v37  ;;  %v6307_v63 = vsel %vm12903_vm1, %v6271_v58, 0.0 }
 0x257   :  { %v6223_v44 = vpop.f32.mrf.mxu0  ;;  %v9078_v1 = vpop.f32.mrf.mxu1  ;;  %v6358_v46 = vadd.f32 %v6357_v7, %v6356_v42  ;;  %v6306_v49 = vadd.f32 %v6305_v51, %v6304_v33  ;;  %v6365_v16 = vsel %vm12903_vm1, %v6344_v35, 0.0  ;;  %v5796_v8 = vadd.f32 %v11957_v19, %v11955_v5 }
 0x258   :  { %v6035_v6 = vadd.f32 %v9078_v1, %v5777_v3  ;;  %7902 = vst.msk [vmem:[%s12855_s8 + $0x1b8] sm:$0xff] %vm12903_vm1, %v6274_v15  ;;  %v6272_v40 = vadd.f32 %v6223_v44, %v6030_v43  ;;  %v6361_v47 = vsel %vm12903_vm1, %v6342_v0, 0.0  ;;  %v6345_v54 = vmul.f32 %v6274_v15, %v6274_v15 }
 0x259   :  { %v9102_v27 = vpop.f32.mrf.mxu0  ;;  %v5994_v23 = vpop.f32.mrf.mxu1  ;;  %v6308_v24 = vadd.f32 %v6307_v63, %v6306_v49  ;;  %v6360_v41 = vadd.f32 %v6359_v32, %v6358_v46  ;;  %v6313_v45 = vsel %vm12903_vm1, %v6274_v15, 0.0  ;;  %v5788_v2 = vadd.f32 %v11961_v21, %v11959_v55 }
 0x25a   :  { %v6277_v4 = vadd.f32 %v9102_v27, %v6035_v6  ;;  %v6033_v17 = vadd.f32 %v5994_v23, %v5769_v13  ;;  %7900 = vst.msk [vmem:[%s12855_s8 + $0x1a8] sm:$0xff] %vm12903_vm1, %v6272_v40  ;;  %v6309_v31 = vsel %vm12903_vm1, %v6272_v40, 0.0  ;;  %v6343_v53 = vmul.f32 %v6272_v40, %v6272_v40 }
 0x25b   :  { %v6236_v34 = vpop.f32.mrf.mxu0  ;;  %v9079_v11 = vpop.f32.mrf.mxu1  ;;  %v6362_v26 = vadd.f32 %v6361_v47, %v6360_v41  ;;  %v6310_v39 = vadd.f32 %v6309_v31, %v6308_v24  ;;  %v6367_v29 = vsel %vm12903_vm1, %v6345_v54, 0.0 }
 0x25c   :  { %7905 = vst.msk [vmem:[%s12855_s8 + $0x1d0] sm:$0xff] %vm12903_vm1, %v6277_v4  ;;  %v6363_v61 = vsel %vm12903_vm1, %v6343_v53, 0.0  ;;  %v6275_v48 = vadd.f32 %v6236_v34, %v6033_v17  ;;  %v6036_v37 = vadd.f32 %v9079_v11, %v5780_v57  ;;  %v6348_v55 = vmul.f32 %v6277_v4, %v6277_v4 }
 0x25d   :  { %v9103_v20 = vpop.f32.mrf.mxu0  ;;  %v5997_v22 = vpop.f32.mrf.mxu1  ;;  %v6312_v12 = vadd.f32 %v6311_v59, %v6310_v39  ;;  %v6364_v38 = vadd.f32 %v6363_v61, %v6362_v26  ;;  %v6319_v49 = vsel %vm12903_vm1, %v6277_v4, 0.0 }
 0x25e   :  { %v6034_v56 = vadd.f32 %v5997_v22, %v5772_v14  ;;  %7903 = vst.msk [vmem:[%s12855_s8 + $0x1c0] sm:$0xff] %vm12903_vm1, %v6275_v48  ;;  %v6346_v3 = vmul.f32 %v6275_v48, %v6275_v48  ;;  %v6278_v9 = vadd.f32 %v9103_v20, %v6036_v37  ;;  %v6315_v44 = vsel %vm12903_vm1, %v6275_v48, 0.0 }
 0x25f   :  { %v6239_v28 = vpop.f32.mrf.mxu0  ;;  %v9082_v36 = vpop.f32.mrf.mxu1  ;;  %v6366_v52 = vadd.f32 %v6365_v16, %v6364_v38  ;;  %v6314_v25 = vadd.f32 %v6313_v45, %v6312_v12  ;;  %v6373_v24 = vsel %vm12903_vm1, %v6348_v55, 0.0 }
 0x260   :  { %v6276_v18 = vadd.f32 %v6239_v28, %v6034_v56  ;;  %v6039_v62 = vadd.f32 %v9082_v36, %v5793_v30  ;;  %7906 = vst.msk [vmem:[%s12855_s8 + $0x1d8] sm:$0xff] %vm12903_vm1, %v6278_v9  ;;  %v6369_v21 = vsel %vm12903_vm1, %v6346_v3, 0.0  ;;  %v6349_v6 = vmul.f32 %v6278_v9, %v6278_v9 }
 0x261   :  { %v9106_v58 = vpop.f32.mrf.mxu0  ;;  %v6010_v13 = vpop.f32.mrf.mxu1  ;;  %v6316_v33 = vadd.f32 %v6315_v44, %v6314_v25  ;;  %v6368_v42 = vadd.f32 %v6367_v29, %v6366_v52  ;;  %v6321_v41 = vsel %vm12903_vm1, %v6278_v9, 0.0 }
 0x262   :  { %7904 = vst.msk [vmem:[%s12855_s8 + $0x1c8] sm:$0xff] %vm12903_vm1, %v6276_v18  ;;  %v6317_v5 = vsel %vm12903_vm1, %v6276_v18, 0.0  ;;  %v6347_v19 = vmul.f32 %v6276_v18, %v6276_v18  ;;  %v6281_v51 = vadd.f32 %v9106_v58, %v6039_v62  ;;  %v6037_v0 = vadd.f32 %v6010_v13, %v5785_v50 }
 0x263   :  { %v6252_v7 = vpop.f32.mrf.mxu0  ;;  %v9083_v15 = vpop.f32.mrf.mxu1  ;;  %v6370_v43 = vadd.f32 %v6369_v21, %v6368_v42  ;;  %v6318_v1 = vadd.f32 %v6317_v5, %v6316_v33  ;;  %v6375_v31 = vsel %vm12903_vm1, %v6349_v6, 0.0 }
 0x264   :  { %v6371_v27 = vsel %vm12903_vm1, %v6347_v19, 0.0  ;;  %v6040_v57 = vadd.f32 %v9083_v15, %v5796_v8  ;;  %7909 = vst.msk [vmem:[%s12855_s8 + $0x1f0] sm:$0xff] %vm12903_vm1, %v6281_v51  ;;  %v6279_v14 = vadd.f32 %v6252_v7, %v6037_v0  ;;  %v6352_v59 = vmul.f32 %v6281_v51, %v6281_v51 }
 0x265   :  { %v9107_v46 = vpop.f32.mrf.mxu0  ;;  %v6013_v32 = vpop.f32.mrf.mxu1  ;;  %v6320_v63 = vadd.f32 %v6319_v49, %v6318_v1  ;;  %v6372_v40 = vadd.f32 %v6371_v27, %v6370_v43  ;;  %v6327_v37 = vsel %vm12903_vm1, %v6281_v51, 0.0  ;;  %v6419_v15 = vlaneseq  ;;  %v32_v1 = vld [vmem:[%s12857_s5] sm:$0x1] }
 0x266   :  { %v6282_v23 = vadd.f32 %v9107_v46, %v6040_v57  ;;  %v6038_v34 = vadd.f32 %v6013_v32, %v5788_v2  ;;  %7907 = vst.msk [vmem:[%s12855_s8 + $0x1e0] sm:$0xff] %vm12903_vm1, %v6279_v14  ;;  %v6350_v4 = vmul.f32 %v6279_v14, %v6279_v14  ;;  %v6323_v53 = vsel %vm12903_vm1, %v6279_v14, 0.0  ;;  %v6402_v14 = vld [vmem:[%s12855_s8] sm:$0xff]  ;;  %v6405_v32 = vld [vmem:[%s12855_s8 + $0x18] sm:$0xff] }
 0x267   :  { %v6374_v17 = vadd.f32 %v6373_v24, %v6372_v40  ;;  %v6322_v35 = vadd.f32 %v6321_v41, %v6320_v63  ;;  %v6255_v47 = vpop.f32.mrf.mxu0  ;;  %v6381_v38 = vsel %vm12903_vm1, %v6352_v59, 0.0  ;;  %v6420_v43 = vshrl.u32 %v6419_v15, 7  ;;  %v6403_v40 = vld [vmem:[%s12855_s8 + $0x8] sm:$0xff]  ;;  %v6413_v59 = vld [vmem:[%s12855_s8 + $0x58] sm:$0xff] }
 0x268   :  { %7910 = vst.msk [vmem:[%s12855_s8 + $0x1f8] sm:$0xff] %vm12903_vm1, %v6282_v23  ;;  %v6280_v11 = vadd.f32 %v6255_v47, %v6038_v34  ;;  %v6377_v26 = vsel %vm12903_vm1, %v6350_v4, 0.0  ;;  %v6353_v22 = vmul.f32 %v6282_v23, %v6282_v23  ;;  %v6329_v56 = vsel %vm12903_vm1, %v6282_v23, 0.0  ;;  %v6408_v23 = vld [vmem:[%s12855_s8 + $0x30] sm:$0xff]  ;;  %v6406_v34 = vld [vmem:[%s12855_s8 + $0x20] sm:$0xff] }
 0x269   :  { %v6324_v20 = vadd.f32 %v6323_v53, %v6322_v35  ;;  %v6376_v30 = vadd.f32 %v6375_v31, %v6374_v17  ;;  %v6421_v27 = vsub.s32 0, %v6420_v43  ;;  %v6409_v17 = vld [vmem:[%s12855_s8 + $0x38] sm:$0xff]  ;;  %v6407_v35 = vld [vmem:[%s12855_s8 + $0x28] sm:$0xff]  ;;  %v6412_v47 = vld [vmem:[%s12855_s8 + $0x50] sm:$0xff] }
 0x26a   :  { %7908 = vst.msk [vmem:[%s12855_s8 + $0x1e8] sm:$0xff] %vm12903_vm1, %v6280_v11  ;;  %v6325_v39 = vsel %vm12903_vm1, %v6280_v11, 0.0  ;;  %v6351_v54 = vmul.f32 %v6280_v11, %v6280_v11  ;;  %v6383_v3 = vsel %vm12903_vm1, %v6353_v22, 0.0  ;;  %v6414_v22 = vld [vmem:[%s12855_s8 + $0x60] sm:$0xff] }
 0x26b   :  { %v6378_v61 = vadd.f32 %v6377_v26, %v6376_v30  ;;  %v6326_v48 = vadd.f32 %v6325_v39, %v6324_v20  ;;  %v6410_v30 = vld [vmem:[%s12855_s8 + $0x40] sm:$0xff]  ;;  %v6411_v26 = vld [vmem:[%s12855_s8 + $0x48] sm:$0xff] }
 0x26c   :  { %v6379_v28 = vsel %vm12903_vm1, %v6351_v54, 0.0  ;;  %vm13112_vm1 = vcmask 261120  }
 0x26d   :  { %v6328_v50 = vadd.f32 %v6327_v37, %v6326_v48  ;;  %v6380_v12 = vadd.f32 %v6379_v28, %v6378_v61  ;;  %v6416_v37 = vld [vmem:[%s12855_s8 + $0x70] sm:$0xff]  ;;  %v6415_v28 = vld [vmem:[%s12855_s8 + $0x68] sm:$0xff]  ;;  %vm13113_vm0 = vmmov %vm13112_vm1 }
 0x26f   :  { %v6330_v16 = vadd.f32 %v6329_v56, %v6328_v50  ;;  %v6382_v45 = vadd.f32 %v6381_v38, %v6380_v12 }
 0x271   :  { %v6331_v9 = vrot.slane %v6330_v16, 4  ;;  %v6384_v36 = vadd.f32 %v6383_v3, %v6382_v45  ;;  %v7989_v63 = vld [vmem:[%s12855_s8 + $0x1e8] sm:$0xff] }
 0x273   :  { %v6332_v58 = vadd.f32 %v6331_v9, %v6330_v16  ;;  %v6385_v52 = vrot.slane %v6384_v36, 4 }
 0x275   :  { %v6333_v25 = vrot.slane %v6332_v58, 2  ;;  %v6386_v18 = vadd.f32 %v6385_v52, %v6384_v36  ;;  %v6417_v36 = vld [vmem:[%s12855_s8 + $0x78] sm:$0xff] }
 0x277   :  { %v6334_v62 = vadd.f32 %v6333_v25, %v6332_v58  ;;  %v6387_v8 = vrot.slane %v6386_v18, 2 }
 0x279   :  { %v6335_v2 = vrot.slane %v6334_v62, 1  ;;  %v6388_v29 = vadd.f32 %v6387_v8, %v6386_v18 }
 0x27b   :  { %v6336_v44 = vadd.f32 %v6335_v2, %v6334_v62  ;;  %v6389_v13 = vrot.slane %v6388_v29, 1 }
 0x27d   :  { %v6337_v7 = vadd.f32 %v6336_v44, %v11942_v60  ;;  %v6390_v33 = vadd.f32 %v6389_v13, %v6388_v29  ;;  %v33_v60 = vld [vmem:[%s12858_s6] sm:$0x1] }
 0x27f   :  { %v6391_v42 = vadd.f32 %v6390_v33, %v11949_v10  ;;  %v6392_v5 = vmul.f32 0.001953125, %v6337_v7  ;;  %v6404_v10 = vld [vmem:[%s12855_s8 + $0x10] sm:$0xff] }
 0x281   :  { %v6393_v19 = vmul.f32 0.001953125, %v6391_v42  ;;  %v6394_v55 = vmul.f32 %v6392_v5, %v6392_v5 }
 0x283   :  { %v6395_v21 = vsub.f32 %v6393_v19, %v6394_v55 }
 0x285   :  { %v6396_v51 = vmax.f32 %v6395_v21, 0.0 }
 0x287   :  { %v6397_v0 = vadd.f32 1e-05, %v6396_v51  ;;  %v12193_v51 = vpop.permute.xlu0 %6484 }
 0x289   :  { %9218 = vrsqrt.f32 %v6397_v0 }
 0x296   :  { %v9219_v57 = vpop.eup %9218 }
 0x297   :  { %v6399_v46 = vmul.f32 %v9219_v57, %v32_v1 }
 0x299   :  { %v6400_v49 = vmul.f32 %v6399_v46, %v6392_v5  ;;  %v12095_v6 = vrot.slane %v6399_v46, %v6421_v27 }
 0x29b   :  { %v6401_v24 = vsub.f32 %v33_v60, %v6400_v49  ;;  %v6788_v41 = vmul.f32 %v7989_v63, %v12095_v6  ;;  %v6424_v4 = vmul.f32 %v12095_v6, %v6402_v14  ;;  %v6425_v31 = vmul.f32 %v12095_v6, %v6403_v40 }
 0x29c   :  { %v6426_v53 = vmul.f32 %v12095_v6, %v6404_v10  ;;  %v6427_v11 = vmul.f32 %v12095_v6, %v6405_v32  ;;  %v6428_v20 = vmul.f32 %v12095_v6, %v6406_v34  ;;  %v6429_v54 = vmul.f32 %v12095_v6, %v6407_v35 }
 0x29d   :  { %v12139_v39 = vrot.slane %v6401_v24, %v6421_v27  ;;  %v6430_v61 = vmul.f32 %v12095_v6, %v6408_v23  ;;  %v6431_v48 = vmul.f32 %v12095_v6, %v6409_v17  ;;  %v6432_v50 = vmul.f32 %v12095_v6, %v6410_v30 }
 0x29e   :  { %v6433_v12 = vmul.f32 %v12095_v6, %v6411_v26  ;;  %v6434_v38 = vmul.f32 %v12095_v6, %v6412_v47  ;;  %v6435_v56 = vmul.f32 %v12095_v6, %v6413_v59  ;;  %v6436_v45 = vmul.f32 %v12095_v6, %v6414_v22 }
 0x29f   :  { %v12158_v16 = vadd.f32 %v6788_v41, %v12139_v39  ;;  %v6437_v3 = vmul.f32 %v12095_v6, %v6415_v28  ;;  %v6438_v9 = vmul.f32 %v12095_v6, %v6416_v37  ;;  %v6446_v58 = vadd.f32 %v12139_v39, %v6424_v4  ;;  %v7916_v37 = vld [vmem:[%s12855_s8 + $0xa0] sm:$0xff] }
 0x2a0   :  { %v6447_v52 = vadd.f32 %v12139_v39, %v6425_v31  ;;  %v6448_v25 = vadd.f32 %v12139_v39, %v6426_v53  ;;  %v6449_v18 = vadd.f32 %v12139_v39, %v6427_v11  ;;  %v6439_v62 = vmul.f32 %v12095_v6, %v6417_v36  ;;  %v7914_v53 = vld [vmem:[%s12855_s8 + $0x90] sm:$0xff]  ;;  %v7912_v11 = vld [vmem:[%s12855_s8 + $0x80] sm:$0xff] }
 0x2a1   :  { %v6450_v8 = vadd.f32 %v12139_v39, %v6428_v20  ;;  %v6451_v2 = vadd.f32 %v12139_v39, %v6429_v54  ;;  %v6452_v29 = vadd.f32 %v12139_v39, %v6430_v61  ;;  %v6453_v44 = vadd.f32 %v12139_v39, %v6431_v48  ;;  %v7915_v20 = vld [vmem:[%s12855_s8 + $0x98] sm:$0xff]  ;;  %v7913_v61 = vld [vmem:[%s12855_s8 + $0x88] sm:$0xff]  ;;  %v7918_v48 = vld [vmem:[%s12855_s8 + $0xb0] sm:$0xff] }
 0x2a2   :  { %v6454_v13 = vadd.f32 %v12139_v39, %v6432_v50  ;;  %v6455_v7 = vadd.f32 %v12139_v39, %v6433_v12  ;;  %v6456_v33 = vadd.f32 %v12139_v39, %v6434_v38  ;;  %v12179_v42 = vadd.f32 %v12139_v39, %v6435_v56  ;;  %v7919_v38 = vld [vmem:[%s12855_s8 + $0xb8] sm:$0xff]  ;;  %v7917_v56 = vld [vmem:[%s12855_s8 + $0xa8] sm:$0xff] }
 0x2a3   :  { %v12182_v5 = vadd.f32 %v12139_v39, %v6436_v45  ;;  %v12185_v19 = vadd.f32 %v12139_v39, %v6437_v3  ;;  %v12188_v55 = vadd.f32 %v12139_v39, %v6438_v9  ;;  %v12191_v21 = vadd.f32 %v12139_v39, %v6439_v62  ;;  %v7922_v45 = vld [vmem:[%s12855_s8 + $0xd0] sm:$0xff] }
 0x2a4   :  { %vm6462_vm2 = vcmp.ge.f32.partialorder %v6446_v58, 0.0  ;;  %vm6463_vm3 = vcmp.ge.f32.partialorder %v6447_v52, 0.0  ;;  %vm6464_vm4 = vcmp.ge.f32.partialorder %v6448_v25, 0.0  ;;  %vm6465_vm5 = vcmp.ge.f32.partialorder %v6449_v18, 0.0 }
 0x2a5   :  { %vm6466_vm6 = vcmp.ge.f32.partialorder %v6450_v8, 0.0  ;;  %vm6467_vm7 = vcmp.ge.f32.partialorder %v6451_v2, 0.0  ;;  %vm6468_vm8 = vcmp.ge.f32.partialorder %v6452_v29, 0.0  ;;  %vm6469_vm9 = vcmp.ge.f32.partialorder %v6453_v44, 0.0 }
 0x2a6   :  { %vm6470_vm10 = vcmp.ge.f32.partialorder %v6454_v13, 0.0  ;;  %vm6471_vm11 = vcmp.ge.f32.partialorder %v6455_v7, 0.0  ;;  %vm6472_vm12 = vcmp.ge.f32.partialorder %v6456_v33, 0.0  ;;  %vm6473_vm13 = vcmp.ge.f32.partialorder %v12179_v42, 0.0 }
 0x2a7   :  { %vm6474_vm14 = vcmp.ge.f32.partialorder %v12182_v5, 0.0  ;;  %vm6475_vm15 = vcmp.ge.f32.partialorder %v12185_v19, 0.0  ;;  %v6487_v0 = vmul.f32 %v12193_v51, %v6446_v58  ;;  %v6488_v15 = vmul.f32 %v12193_v51, %v6447_v52 }
 0x2a8   :  { %v6489_v43 = vmul.f32 %v12193_v51, %v6448_v25  ;;  %v6490_v1 = vmul.f32 %v12193_v51, %v6449_v18  ;;  %v6491_v27 = vmul.f32 %v12193_v51, %v6450_v8  ;;  %v6492_v57 = vmul.f32 %v12193_v51, %v6451_v2 }
 0x2a9   :  { %v6493_v46 = vmul.f32 %v12193_v51, %v6452_v29  ;;  %v6494_v60 = vmul.f32 %v12193_v51, %v6453_v44  ;;  %v6495_v10 = vmul.f32 %v12193_v51, %v6454_v13  ;;  %v6496_v49 = vmul.f32 %v12193_v51, %v6455_v7 }
 0x2aa   :  { %v6497_v14 = vmul.f32 %v12193_v51, %v6456_v33  ;;  %v6498_v32 = vmul.f32 %v12193_v51, %v12179_v42  ;;  %v6499_v63 = vmul.f32 %v12193_v51, %v12182_v5  ;;  %v6500_v40 = vmul.f32 %v12193_v51, %v12185_v19 }
 0x2ab   :  { %v6501_v23 = vmul.f32 %v12193_v51, %v12188_v55  ;;  %v6502_v34 = vmul.f32 %v12193_v51, %v12191_v21  ;;  %v6503_v24 = vsel %vm6462_vm2, %v6446_v58, %v6487_v0  ;;  %v6504_v41 = vsel %vm6463_vm3, %v6447_v52, %v6488_v15  ;;  %vm13114_vm2 = vmmov %vm13113_vm0  ;;  %v7920_v52 = vld [vmem:[%s12855_s8 + $0xc0] sm:$0xff] }
 0x2ac   :  { %v6505_v4 = vsel %vm6464_vm4, %v6448_v25, %v6489_v43  ;;  %v6506_v17 = vsel %vm6465_vm5, %v6449_v18, %v6490_v1  ;;  %v6507_v35 = vsel %vm6466_vm6, %v6450_v8, %v6491_v27  ;;  %v6508_v47 = vsel %vm6467_vm7, %v6451_v2, %v6492_v57  ;;  %6519 = vst.msk [vmem:[%s12855_s8] sm:$0xff] %vm13112_vm1, %v6503_v24  ;;  %vm13115_vm1 = vmmov %vm13113_vm0  ;;  %v7923_v25 = vld [vmem:[%s12855_s8 + $0xd8] sm:$0xff]  ;;  %v7921_v18 = vld [vmem:[%s12855_s8 + $0xc8] sm:$0xff] }
 0x2ad   :  { %v6509_v31 = vsel %vm6468_vm8, %v6452_v29, %v6493_v46  ;;  %6520 = vst.msk [vmem:[%s12855_s8 + $0x8] sm:$0xff] %vm13113_vm0, %v6504_v41  ;;  %v6510_v30 = vsel %vm6469_vm9, %v6453_v44, %v6494_v60  ;;  %v6511_v59 = vsel %vm6470_vm10, %v6454_v13, %v6495_v10  ;;  %v6512_v26 = vsel %vm6471_vm11, %v6455_v7, %v6496_v49  ;;  %vm13116_vm3 = vmmov %vm13113_vm0  ;;  %v7926_v44 = vld [vmem:[%s12855_s8 + $0xf0] sm:$0xff]  ;;  %v7924_v13 = vld [vmem:[%s12855_s8 + $0xe0] sm:$0xff] }
 0x2ae   :  { %6521 = vst.msk [vmem:[%s12855_s8 + $0x10] sm:$0xff] %vm13114_vm2, %v6505_v4  ;;  %v6513_v54 = vsel %vm6472_vm12, %v6456_v33, %v6497_v14  ;;  %vm13117_vm4 = vmmov %vm13113_vm0  ;;  %v6514_v22 = vsel %vm6473_vm13, %v12179_v42, %v6498_v32  ;;  %v6515_v28 = vsel %vm6474_vm14, %v12182_v5, %v6499_v63  ;;  %v6516_v50 = vsel %vm6475_vm15, %v12185_v19, %v6500_v40  ;;  %v7925_v7 = vld [vmem:[%s12855_s8 + $0xe8] sm:$0xff] }
 0x2af   :  { %6522 = vst.msk [vmem:[%s12855_s8 + $0x18] sm:$0xff] %vm13115_vm1, %v6506_v17  ;;  %vm13118_vm5 = vmmov %vm13113_vm0  ;;  %vm13119_vm6 = vcmp.ge.f32.partialorder %v12188_v55, 0.0  ;;  %vm13124_vm11 = vcmp.ge.f32.partialorder %v12191_v21, 0.0  ;;  %v6551_v9 = vmul.f32 %v7912_v11, %v12095_v6  ;;  %v6552_v36 = vmul.f32 %v7913_v61, %v12095_v6 }
 0x2b0   :  { %6523 = vst.msk [vmem:[%s12855_s8 + $0x20] sm:$0xff] %vm13116_vm3, %v6507_v35  ;;  %v6517_v12 = vsel %vm13119_vm6, %v12188_v55, %v6501_v23  ;;  %vm13120_vm7 = vmmov %vm13113_vm0  ;;  %v6518_v3 = vsel %vm13124_vm11, %v12191_v21, %v6502_v34  ;;  %v6553_v58 = vmul.f32 %v7914_v53, %v12095_v6  ;;  %v6554_v62 = vmul.f32 %v7915_v20, %v12095_v6  ;;  %v7927_v55 = vld [vmem:[%s12855_s8 + $0xf8] sm:$0xff] }
 0x2b1   :  { %6524 = vst.msk [vmem:[%s12855_s8 + $0x28] sm:$0xff] %vm13117_vm4, %v6508_v47  ;;  %vm13121_vm8 = vmmov %vm13113_vm0  ;;  %v6555_v8 = vmul.f32 %v7916_v37, %v12095_v6  ;;  %v6556_v2 = vmul.f32 %v7917_v56, %v12095_v6  ;;  %v6557_v29 = vmul.f32 %v7918_v48, %v12095_v6  ;;  %v6558_v33 = vmul.f32 %v7919_v38, %v12095_v6 }
 0x2b2   :  { %6525 = vst.msk [vmem:[%s12855_s8 + $0x30] sm:$0xff] %vm13118_vm5, %v6509_v31  ;;  %vm13122_vm9 = vmmov %vm13113_vm0  ;;  %v6559_v42 = vmul.f32 %v7920_v52, %v12095_v6  ;;  %v6560_v5 = vmul.f32 %v7921_v18, %v12095_v6  ;;  %v6561_v19 = vmul.f32 %v7922_v45, %v12095_v6  ;;  %v6562_v21 = vmul.f32 %v7923_v25, %v12095_v6  ;;  %v7944_v52 = vld [vmem:[%s12855_s8 + $0x100] sm:$0xff]  ;;  %v7947_v25 = vld [vmem:[%s12855_s8 + $0x118] sm:$0xff] }
 0x2b3   :  { %6526 = vst.msk [vmem:[%s12855_s8 + $0x38] sm:$0xff] %vm13120_vm7, %v6510_v30  ;;  %vm13123_vm10 = vmmov %vm13113_vm0  ;;  %v6563_v0 = vmul.f32 %v7924_v13, %v12095_v6  ;;  %v6564_v15 = vmul.f32 %v7925_v7, %v12095_v6  ;;  %v6565_v43 = vmul.f32 %v7926_v44, %v12095_v6  ;;  %v6566_v1 = vmul.f32 %v7927_v55, %v12095_v6  ;;  %v7950_v44 = vld [vmem:[%s12855_s8 + $0x130] sm:$0xff]  ;;  %v7948_v13 = vld [vmem:[%s12855_s8 + $0x120] sm:$0xff] }
 0x2b4   :  { %6527 = vst.msk [vmem:[%s12855_s8 + $0x40] sm:$0xff] %vm13121_vm8, %v6511_v59  ;;  %vm13125_vm12 = vmmov %vm13113_vm0  ;;  %v6567_v27 = vadd.f32 %v6551_v9, %v12139_v39  ;;  %v6568_v57 = vadd.f32 %v6552_v36, %v12139_v39  ;;  %v6569_v46 = vadd.f32 %v6553_v58, %v12139_v39  ;;  %v6570_v60 = vadd.f32 %v6554_v62, %v12139_v39  ;;  %v7946_v58 = vld [vmem:[%s12855_s8 + $0x110] sm:$0xff]  ;;  %v7949_v55 = vld [vmem:[%s12855_s8 + $0x128] sm:$0xff] }
 0x2b5   :  { %6528 = vst.msk [vmem:[%s12855_s8 + $0x48] sm:$0xff] %vm13122_vm9, %v6512_v26  ;;  %vm13126_vm13 = vmmov %vm13113_vm0  ;;  %v6571_v10 = vadd.f32 %v6555_v8, %v12139_v39  ;;  %v6572_v49 = vadd.f32 %v6556_v2, %v12139_v39  ;;  %v6573_v14 = vadd.f32 %v6557_v29, %v12139_v39  ;;  %v6574_v32 = vadd.f32 %v6558_v33, %v12139_v39  ;;  %v7945_v29 = vld [vmem:[%s12855_s8 + $0x108] sm:$0xff] }
 0x2b6   :  { %6529 = vst.msk [vmem:[%s12855_s8 + $0x50] sm:$0xff] %vm13123_vm10, %v6513_v54  ;;  %vm13127_vm14 = vmmov %vm13113_vm0  ;;  %v6575_v63 = vadd.f32 %v6559_v42, %v12139_v39  ;;  %v6576_v40 = vadd.f32 %v6560_v5, %v12139_v39  ;;  %v6577_v23 = vadd.f32 %v6561_v19, %v12139_v39  ;;  %v6578_v34 = vadd.f32 %v6562_v21, %v12139_v39  ;;  %v7951_v19 = vld [vmem:[%s12855_s8 + $0x138] sm:$0xff]  ;;  %v7954_v21 = vld [vmem:[%s12855_s8 + $0x150] sm:$0xff] }
 0x2b7   :  { %6530 = vst.msk [vmem:[%s12855_s8 + $0x58] sm:$0xff] %vm13125_vm12, %v6514_v22  ;;  %vm13128_vm15 = vmmov %vm13113_vm0  ;;  %v6579_v24 = vadd.f32 %v6563_v0, %v12139_v39  ;;  %v6580_v41 = vadd.f32 %v6564_v15, %v12139_v39  ;;  %v6581_v4 = vadd.f32 %v6565_v43, %v12139_v39  ;;  %v12391_v17 = vadd.f32 %v6566_v1, %v12139_v39 }
 0x2b8   :  { %6531 = vst.msk [vmem:[%s12855_s8 + $0x60] sm:$0xff] %vm13126_vm13, %v6515_v28  ;;  %vm6583_vm2 = vcmp.ge.f32.partialorder %v6567_v27, 0.0  ;;  %vm6584_vm1 = vcmp.ge.f32.partialorder %v6568_v57, 0.0  ;;  %vm6585_vm3 = vcmp.ge.f32.partialorder %v6569_v46, 0.0  ;;  %vm6586_vm4 = vcmp.ge.f32.partialorder %v6570_v60, 0.0 }
 0x2b9   :  { %6532 = vst.msk [vmem:[%s12855_s8 + $0x68] sm:$0xff] %vm13127_vm14, %v6516_v50  ;;  %vm6587_vm5 = vcmp.ge.f32.partialorder %v6571_v10, 0.0  ;;  %vm6588_vm6 = vcmp.ge.f32.partialorder %v6572_v49, 0.0  ;;  %vm6589_vm7 = vcmp.ge.f32.partialorder %v6573_v14, 0.0  ;;  %vm6590_vm8 = vcmp.ge.f32.partialorder %v6574_v32, 0.0 }
 0x2ba   :  { %6533 = vst.msk [vmem:[%s12855_s8 + $0x70] sm:$0xff] %vm13128_vm15, %v6517_v12  ;;  %vm6591_vm9 = vcmp.ge.f32.partialorder %v6575_v63, 0.0  ;;  %vm6592_vm10 = vcmp.ge.f32.partialorder %v6576_v40, 0.0  ;;  %vm6593_vm11 = vcmp.ge.f32.partialorder %v6577_v23, 0.0  ;;  %vm6594_vm12 = vcmp.ge.f32.partialorder %v6578_v34, 0.0  ;;  %vm13129_vm15 = vmmov %vm13113_vm0 }
 0x2bb   :  { %6534 = vst.msk [vmem:[%s12855_s8 + $0x78] sm:$0xff] %vm13113_vm0, %v6518_v3  ;;  %vm6595_vm13 = vcmp.ge.f32.partialorder %v6579_v24, 0.0  ;;  %vm6596_vm14 = vcmp.ge.f32.partialorder %v6580_v41, 0.0  ;;  %v6599_v35 = vmul.f32 %v6567_v27, %v12193_v51  ;;  %v6600_v47 = vmul.f32 %v6568_v57, %v12193_v51 }
 0x2bc   :  { %v6601_v31 = vmul.f32 %v6569_v46, %v12193_v51  ;;  %v6602_v53 = vmul.f32 %v6570_v60, %v12193_v51  ;;  %v6603_v11 = vmul.f32 %v6571_v10, %v12193_v51  ;;  %v6604_v20 = vmul.f32 %v6572_v49, %v12193_v51 }
 0x2bd   :  { %v6605_v30 = vmul.f32 %v6573_v14, %v12193_v51  ;;  %v6606_v59 = vmul.f32 %v6574_v32, %v12193_v51  ;;  %v6607_v26 = vmul.f32 %v6575_v63, %v12193_v51  ;;  %v6608_v54 = vmul.f32 %v6576_v40, %v12193_v51 }
 0x2be   :  { %v6609_v61 = vmul.f32 %v6577_v23, %v12193_v51  ;;  %v6610_v48 = vmul.f32 %v6578_v34, %v12193_v51  ;;  %v6611_v37 = vmul.f32 %v6579_v24, %v12193_v51  ;;  %v6612_v22 = vmul.f32 %v6580_v41, %v12193_v51 }
 0x2bf   :  { %v6613_v28 = vmul.f32 %v6581_v4, %v12193_v51  ;;  %v6614_v50 = vmul.f32 %v12391_v17, %v12193_v51  ;;  %v6615_v12 = vsel %vm6583_vm2, %v6567_v27, %v6599_v35  ;;  %v6616_v38 = vsel %vm6584_vm1, %v6568_v57, %v6600_v47  ;;  %vm13130_vm2 = vmmov %vm13113_vm0  ;;  %v7952_v27 = vld [vmem:[%s12855_s8 + $0x140] sm:$0xff]  ;;  %v7955_v57 = vld [vmem:[%s12855_s8 + $0x158] sm:$0xff] }
 0x2c0   :  { %v6617_v56 = vsel %vm6585_vm3, %v6569_v46, %v6601_v31  ;;  %v6618_v45 = vsel %vm6586_vm4, %v6570_v60, %v6602_v53  ;;  %v6619_v3 = vsel %vm6587_vm5, %v6571_v10, %v6603_v11  ;;  %v6620_v9 = vsel %vm6588_vm6, %v6572_v49, %v6604_v20  ;;  %7928 = vst.msk [vmem:[%s12855_s8 + $0x80] sm:$0xff] %vm13113_vm0, %v6615_v12  ;;  %vm13131_vm1 = vmmov %vm13113_vm0  ;;  %v7953_v46 = vld [vmem:[%s12855_s8 + $0x148] sm:$0xff] }
 0x2c1   :  { %v6621_v36 = vsel %vm6589_vm7, %v6573_v14, %v6605_v30  ;;  %7929 = vst.msk [vmem:[%s12855_s8 + $0x88] sm:$0xff] %vm13129_vm15, %v6616_v38  ;;  %v6622_v18 = vsel %vm6590_vm8, %v6574_v32, %v6606_v59  ;;  %v6623_v62 = vsel %vm6591_vm9, %v6575_v63, %v6607_v26  ;;  %v6624_v8 = vsel %vm6592_vm10, %v6576_v40, %v6608_v54  ;;  %vm13132_vm3 = vmmov %vm13113_vm0  ;;  %v7958_v32 = vld [vmem:[%s12855_s8 + $0x170] sm:$0xff]  ;;  %v7956_v63 = vld [vmem:[%s12855_s8 + $0x160] sm:$0xff] }
 0x2c2   :  { %7930 = vst.msk [vmem:[%s12855_s8 + $0x90] sm:$0xff] %vm13130_vm2, %v6617_v56  ;;  %v6625_v2 = vsel %vm6593_vm11, %v6577_v23, %v6609_v61  ;;  %vm13133_vm4 = vmmov %vm13113_vm0  ;;  %v6626_v7 = vsel %vm6594_vm12, %v6578_v34, %v6610_v48  ;;  %v6627_v33 = vsel %vm6595_vm13, %v6579_v24, %v6611_v37  ;;  %v6628_v42 = vsel %vm6596_vm14, %v6580_v41, %v6612_v22  ;;  %v7957_v40 = vld [vmem:[%s12855_s8 + $0x168] sm:$0xff] }
 0x2c3   :  { %7931 = vst.msk [vmem:[%s12855_s8 + $0x98] sm:$0xff] %vm13131_vm1, %v6618_v45  ;;  %vm13134_vm5 = vmmov %vm13113_vm0  ;;  %vm13135_vm6 = vcmp.ge.f32.partialorder %v6581_v4, 0.0  ;;  %vm13140_vm11 = vcmp.ge.f32.partialorder %v12391_v17, 0.0  ;;  %v6663_v15 = vmul.f32 %v7944_v52, %v12095_v6  ;;  %v6664_v43 = vmul.f32 %v7945_v29, %v12095_v6 }
 0x2c4   :  { %7932 = vst.msk [vmem:[%s12855_s8 + $0xa0] sm:$0xff] %vm13132_vm3, %v6619_v3  ;;  %v6629_v5 = vsel %vm13135_vm6, %v6581_v4, %v6613_v28  ;;  %vm13136_vm7 = vmmov %vm13113_vm0  ;;  %v6630_v0 = vsel %vm13140_vm11, %v12391_v17, %v6614_v50  ;;  %v6665_v1 = vmul.f32 %v7946_v58, %v12095_v6  ;;  %v6666_v60 = vmul.f32 %v7947_v25, %v12095_v6  ;;  %v7959_v4 = vld [vmem:[%s12855_s8 + $0x178] sm:$0xff] }
 0x2c5   :  { %7933 = vst.msk [vmem:[%s12855_s8 + $0xa8] sm:$0xff] %vm13133_vm4, %v6620_v9  ;;  %vm13137_vm8 = vmmov %vm13113_vm0  ;;  %v6667_v10 = vmul.f32 %v7948_v13, %v12095_v6  ;;  %v6668_v49 = vmul.f32 %v7949_v55, %v12095_v6  ;;  %v6669_v14 = vmul.f32 %v7950_v44, %v12095_v6  ;;  %v6670_v23 = vmul.f32 %v7951_v19, %v12095_v6 }
 0x2c6   :  { %7934 = vst.msk [vmem:[%s12855_s8 + $0xb0] sm:$0xff] %vm13134_vm5, %v6621_v36  ;;  %vm13138_vm9 = vmmov %vm13113_vm0  ;;  %v6671_v34 = vmul.f32 %v7952_v27, %v12095_v6  ;;  %v6672_v24 = vmul.f32 %v7953_v46, %v12095_v6  ;;  %v6673_v41 = vmul.f32 %v7954_v21, %v12095_v6  ;;  %v6674_v17 = vmul.f32 %v7955_v57, %v12095_v6  ;;  %v7976_v27 = vld [vmem:[%s12855_s8 + $0x180] sm:$0xff]  ;;  %v7979_v57 = vld [vmem:[%s12855_s8 + $0x198] sm:$0xff] }
 0x2c7   :  { %7935 = vst.msk [vmem:[%s12855_s8 + $0xb8] sm:$0xff] %vm13136_vm7, %v6622_v18  ;;  %vm13139_vm10 = vmmov %vm13113_vm0  ;;  %v6675_v35 = vmul.f32 %v7956_v63, %v12095_v6  ;;  %v6676_v47 = vmul.f32 %v7957_v40, %v12095_v6  ;;  %v6677_v31 = vmul.f32 %v7958_v32, %v12095_v6  ;;  %v6678_v53 = vmul.f32 %v7959_v4, %v12095_v6  ;;  %v7982_v32 = vld [vmem:[%s12855_s8 + $0x1b0] sm:$0xff]  ;;  %v7980_v63 = vld [vmem:[%s12855_s8 + $0x1a0] sm:$0xff] }
 0x2c8   :  { %7936 = vst.msk [vmem:[%s12855_s8 + $0xc0] sm:$0xff] %vm13137_vm8, %v6623_v62  ;;  %vm13141_vm12 = vmmov %vm13113_vm0  ;;  %v6679_v11 = vadd.f32 %v6663_v15, %v12139_v39  ;;  %v6680_v20 = vadd.f32 %v6664_v43, %v12139_v39  ;;  %v6681_v30 = vadd.f32 %v6665_v1, %v12139_v39  ;;  %v6682_v59 = vadd.f32 %v6666_v60, %v12139_v39  ;;  %v7978_v1 = vld [vmem:[%s12855_s8 + $0x190] sm:$0xff]  ;;  %v7981_v4 = vld [vmem:[%s12855_s8 + $0x1a8] sm:$0xff] }
 0x2c9   :  { %7937 = vst.msk [vmem:[%s12855_s8 + $0xc8] sm:$0xff] %vm13138_vm9, %v6624_v8  ;;  %vm13142_vm13 = vmmov %vm13113_vm0  ;;  %v6683_v26 = vadd.f32 %v6667_v10, %v12139_v39  ;;  %v6684_v54 = vadd.f32 %v6668_v49, %v12139_v39  ;;  %v6685_v61 = vadd.f32 %v6669_v14, %v12139_v39  ;;  %v6686_v48 = vadd.f32 %v6670_v23, %v12139_v39  ;;  %v7977_v14 = vld [vmem:[%s12855_s8 + $0x188] sm:$0xff] }
 0x2ca   :  { %7938 = vst.msk [vmem:[%s12855_s8 + $0xd0] sm:$0xff] %vm13139_vm10, %v6625_v2  ;;  %vm13143_vm14 = vmmov %vm13113_vm0  ;;  %v6687_v37 = vadd.f32 %v6671_v34, %v12139_v39  ;;  %v6688_v22 = vadd.f32 %v6672_v24, %v12139_v39  ;;  %v6689_v28 = vadd.f32 %v6673_v41, %v12139_v39  ;;  %v6690_v50 = vadd.f32 %v6674_v17, %v12139_v39  ;;  %v7983_v41 = vld [vmem:[%s12855_s8 + $0x1b8] sm:$0xff]  ;;  %v7986_v17 = vld [vmem:[%s12855_s8 + $0x1d0] sm:$0xff] }
 0x2cb   :  { %7939 = vst.msk [vmem:[%s12855_s8 + $0xd8] sm:$0xff] %vm13141_vm12, %v6626_v7  ;;  %vm13144_vm15 = vmmov %vm13113_vm0  ;;  %v6691_v12 = vadd.f32 %v6675_v35, %v12139_v39  ;;  %v6692_v38 = vadd.f32 %v6676_v47, %v12139_v39  ;;  %v6693_v56 = vadd.f32 %v6677_v31, %v12139_v39  ;;  %v12573_v45 = vadd.f32 %v6678_v53, %v12139_v39 }
 0x2cc   :  { %7940 = vst.msk [vmem:[%s12855_s8 + $0xe0] sm:$0xff] %vm13142_vm13, %v6627_v33  ;;  %vm6695_vm2 = vcmp.ge.f32.partialorder %v6679_v11, 0.0  ;;  %vm6696_vm1 = vcmp.ge.f32.partialorder %v6680_v20, 0.0  ;;  %vm6697_vm3 = vcmp.ge.f32.partialorder %v6681_v30, 0.0  ;;  %vm6698_vm4 = vcmp.ge.f32.partialorder %v6682_v59, 0.0 }
 0x2cd   :  { %7941 = vst.msk [vmem:[%s12855_s8 + $0xe8] sm:$0xff] %vm13143_vm14, %v6628_v42  ;;  %vm6699_vm5 = vcmp.ge.f32.partialorder %v6683_v26, 0.0  ;;  %vm6700_vm6 = vcmp.ge.f32.partialorder %v6684_v54, 0.0  ;;  %vm6701_vm7 = vcmp.ge.f32.partialorder %v6685_v61, 0.0  ;;  %vm6702_vm8 = vcmp.ge.f32.partialorder %v6686_v48, 0.0 }
 0x2ce   :  { %7942 = vst.msk [vmem:[%s12855_s8 + $0xf0] sm:$0xff] %vm13144_vm15, %v6629_v5  ;;  %vm6703_vm9 = vcmp.ge.f32.partialorder %v6687_v37, 0.0  ;;  %vm6704_vm10 = vcmp.ge.f32.partialorder %v6688_v22, 0.0  ;;  %vm6705_vm11 = vcmp.ge.f32.partialorder %v6689_v28, 0.0  ;;  %vm6706_vm12 = vcmp.ge.f32.partialorder %v6690_v50, 0.0  ;;  %vm13145_vm15 = vmmov %vm13113_vm0 }
 0x2cf   :  { %7943 = vst.msk [vmem:[%s12855_s8 + $0xf8] sm:$0xff] %vm13113_vm0, %v6630_v0  ;;  %vm6707_vm13 = vcmp.ge.f32.partialorder %v6691_v12, 0.0  ;;  %vm6708_vm14 = vcmp.ge.f32.partialorder %v6692_v38, 0.0  ;;  %v6711_v3 = vmul.f32 %v6679_v11, %v12193_v51  ;;  %v6712_v9 = vmul.f32 %v6680_v20, %v12193_v51 }
 0x2d0   :  { %v6713_v36 = vmul.f32 %v6681_v30, %v12193_v51  ;;  %v6714_v58 = vmul.f32 %v6682_v59, %v12193_v51  ;;  %v6715_v52 = vmul.f32 %v6683_v26, %v12193_v51  ;;  %v6716_v25 = vmul.f32 %v6684_v54, %v12193_v51 }
 0x2d1   :  { %v6717_v18 = vmul.f32 %v6685_v61, %v12193_v51  ;;  %v6718_v62 = vmul.f32 %v6686_v48, %v12193_v51  ;;  %v6719_v8 = vmul.f32 %v6687_v37, %v12193_v51  ;;  %v6720_v2 = vmul.f32 %v6688_v22, %v12193_v51 }
 0x2d2   :  { %v6721_v29 = vmul.f32 %v6689_v28, %v12193_v51  ;;  %v6722_v44 = vmul.f32 %v6690_v50, %v12193_v51  ;;  %v6723_v13 = vmul.f32 %v6691_v12, %v12193_v51  ;;  %v6724_v7 = vmul.f32 %v6692_v38, %v12193_v51 }
 0x2d3   :  { %v6725_v33 = vmul.f32 %v6693_v56, %v12193_v51  ;;  %v6726_v42 = vmul.f32 %v12573_v45, %v12193_v51  ;;  %v6727_v5 = vsel %vm6695_vm2, %v6679_v11, %v6711_v3  ;;  %v6728_v19 = vsel %vm6696_vm1, %v6680_v20, %v6712_v9  ;;  %vm13146_vm2 = vmmov %vm13113_vm0  ;;  %v7984_v11 = vld [vmem:[%s12855_s8 + $0x1c0] sm:$0xff]  ;;  %v7987_v20 = vld [vmem:[%s12855_s8 + $0x1d8] sm:$0xff] }
 0x2d4   :  { %v6729_v55 = vsel %vm6697_vm3, %v6681_v30, %v6713_v36  ;;  %v6730_v21 = vsel %vm6698_vm4, %v6682_v59, %v6714_v58  ;;  %v6731_v0 = vsel %vm6699_vm5, %v6683_v26, %v6715_v52  ;;  %v6732_v15 = vsel %vm6700_vm6, %v6684_v54, %v6716_v25  ;;  %7960 = vst.msk [vmem:[%s12855_s8 + $0x100] sm:$0xff] %vm13113_vm0, %v6727_v5  ;;  %vm13147_vm1 = vmmov %vm13113_vm0  ;;  %v7985_v30 = vld [vmem:[%s12855_s8 + $0x1c8] sm:$0xff] }
 0x2d5   :  { %v6733_v43 = vsel %vm6701_vm7, %v6685_v61, %v6717_v18  ;;  %7961 = vst.msk [vmem:[%s12855_s8 + $0x108] sm:$0xff] %vm13145_vm15, %v6728_v19  ;;  %v6734_v46 = vsel %vm6702_vm8, %v6686_v48, %v6718_v62  ;;  %v6735_v60 = vsel %vm6703_vm9, %v6687_v37, %v6719_v8  ;;  %v6736_v10 = vsel %vm6704_vm10, %v6688_v22, %v6720_v2  ;;  %vm13148_vm3 = vmmov %vm13113_vm0  ;;  %v7990_v48 = vld [vmem:[%s12855_s8 + $0x1f0] sm:$0xff]  ;;  %v7988_v37 = vld [vmem:[%s12855_s8 + $0x1e0] sm:$0xff] }
 0x2d6   :  { %7962 = vst.msk [vmem:[%s12855_s8 + $0x110] sm:$0xff] %vm13146_vm2, %v6729_v55  ;;  %v6737_v49 = vsel %vm6705_vm11, %v6689_v28, %v6721_v29  ;;  %vm13149_vm4 = vmmov %vm13113_vm0  ;;  %v6738_v40 = vsel %vm6706_vm12, %v6690_v50, %v6722_v44  ;;  %v6739_v23 = vsel %vm6707_vm13, %v6691_v12, %v6723_v13  ;;  %v6740_v34 = vsel %vm6708_vm14, %v6692_v38, %v6724_v7  ;;  %v7991_v22 = vld [vmem:[%s12855_s8 + $0x1f8] sm:$0xff] }
 0x2d7   :  { %7963 = vst.msk [vmem:[%s12855_s8 + $0x118] sm:$0xff] %vm13147_vm1, %v6730_v21  ;;  %vm13150_vm5 = vmmov %vm13113_vm0  ;;  %vm13151_vm6 = vcmp.ge.f32.partialorder %v6693_v56, 0.0  ;;  %vm13156_vm11 = vcmp.ge.f32.partialorder %v12573_v45, 0.0  ;;  %v6775_v47 = vmul.f32 %v7976_v27, %v12095_v6  ;;  %v6776_v31 = vmul.f32 %v7977_v14, %v12095_v6 }
 0x2d8   :  { %7964 = vst.msk [vmem:[%s12855_s8 + $0x120] sm:$0xff] %vm13148_vm3, %v6731_v0  ;;  %v6741_v24 = vsel %vm13151_vm6, %v6693_v56, %v6725_v33  ;;  %vm13152_vm7 = vmmov %vm13113_vm0  ;;  %v6742_v35 = vsel %vm13156_vm11, %v12573_v45, %v6726_v42  ;;  %v6777_v53 = vmul.f32 %v7978_v1, %v12095_v6  ;;  %v6778_v59 = vmul.f32 %v7979_v57, %v12095_v6 }
 0x2d9   :  { %7965 = vst.msk [vmem:[%s12855_s8 + $0x128] sm:$0xff] %vm13149_vm4, %v6732_v15  ;;  %vm13153_vm8 = vmmov %vm13113_vm0  ;;  %v6779_v26 = vmul.f32 %v7980_v63, %v12095_v6  ;;  %v6780_v54 = vmul.f32 %v7981_v4, %v12095_v6  ;;  %v6781_v61 = vmul.f32 %v7982_v32, %v12095_v6  ;;  %v6782_v28 = vmul.f32 %v7983_v41, %v12095_v6 }
 0x2da   :  { %7966 = vst.msk [vmem:[%s12855_s8 + $0x130] sm:$0xff] %vm13150_vm5, %v6733_v43  ;;  %vm13154_vm9 = vmmov %vm13113_vm0  ;;  %v6783_v50 = vmul.f32 %v7984_v11, %v12095_v6  ;;  %v6784_v12 = vmul.f32 %v7985_v30, %v12095_v6  ;;  %v6785_v38 = vmul.f32 %v7986_v17, %v12095_v6  ;;  %v6786_v56 = vmul.f32 %v7987_v20, %v12095_v6 }
 0x2db   :  { %7967 = vst.msk [vmem:[%s12855_s8 + $0x138] sm:$0xff] %vm13152_vm7, %v6734_v46  ;;  %vm13155_vm10 = vmmov %vm13113_vm0  ;;  %v6787_v45 = vmul.f32 %v7988_v37, %v12095_v6  ;;  %v6789_v3 = vmul.f32 %v7990_v48, %v12095_v6  ;;  %v6790_v9 = vmul.f32 %v7991_v22, %v12095_v6  ;;  %v6791_v36 = vadd.f32 %v6775_v47, %v12139_v39 }
 0x2dc   :  { %7968 = vst.msk [vmem:[%s12855_s8 + $0x140] sm:$0xff] %vm13153_vm8, %v6735_v60  ;;  %vm13157_vm12 = vmmov %vm13113_vm0  ;;  %v6792_v58 = vadd.f32 %v6776_v31, %v12139_v39  ;;  %v6793_v52 = vadd.f32 %v6777_v53, %v12139_v39  ;;  %v6794_v25 = vadd.f32 %v6778_v59, %v12139_v39  ;;  %v6795_v18 = vadd.f32 %v6779_v26, %v12139_v39 }
 0x2dd   :  { %7969 = vst.msk [vmem:[%s12855_s8 + $0x148] sm:$0xff] %vm13154_vm9, %v6736_v10  ;;  %vm13158_vm13 = vmmov %vm13113_vm0  ;;  %v6796_v62 = vadd.f32 %v6780_v54, %v12139_v39  ;;  %v6797_v8 = vadd.f32 %v6781_v61, %v12139_v39  ;;  %v6798_v2 = vadd.f32 %v6782_v28, %v12139_v39  ;;  %v6799_v29 = vadd.f32 %v6783_v50, %v12139_v39 }
 0x2de   :  { %7970 = vst.msk [vmem:[%s12855_s8 + $0x150] sm:$0xff] %vm13155_vm10, %v6737_v49  ;;  %vm13159_vm14 = vmmov %vm13113_vm0  ;;  %v6800_v6 = vadd.f32 %v6784_v12, %v12139_v39  ;;  %v6801_v44 = vadd.f32 %v6785_v38, %v12139_v39  ;;  %v6802_v13 = vadd.f32 %v6786_v56, %v12139_v39  ;;  %vm6820_vm2 = vcmp.ge.f32.partialorder %v12158_v16, 0.0 }
 0x2df   :  { %7971 = vst.msk [vmem:[%s12855_s8 + $0x158] sm:$0xff] %vm13157_vm12, %v6738_v40  ;;  %vm13160_vm15 = vmmov %vm13113_vm0  ;;  %v6803_v7 = vadd.f32 %v6787_v45, %v12139_v39  ;;  %v6805_v33 = vadd.f32 %v6789_v3, %v12139_v39  ;;  %v6806_v42 = vadd.f32 %v6790_v9, %v12139_v39  ;;  %vm6807_vm1 = vcmp.ge.f32.partialorder %v6791_v36, 0.0 }
 0x2e0   :  { %7972 = vst.msk [vmem:[%s12855_s8 + $0x160] sm:$0xff] %vm13158_vm13, %v6739_v23  ;;  %vm6808_vm3 = vcmp.ge.f32.partialorder %v6792_v58, 0.0  ;;  %vm6809_vm4 = vcmp.ge.f32.partialorder %v6793_v52, 0.0  ;;  %vm6810_vm5 = vcmp.ge.f32.partialorder %v6794_v25, 0.0  ;;  %vm6811_vm6 = vcmp.ge.f32.partialorder %v6795_v18, 0.0 }
 0x2e1   :  { %7973 = vst.msk [vmem:[%s12855_s8 + $0x168] sm:$0xff] %vm13159_vm14, %v6740_v34  ;;  %vm6812_vm7 = vcmp.ge.f32.partialorder %v6796_v62, 0.0  ;;  %vm6813_vm8 = vcmp.ge.f32.partialorder %v6797_v8, 0.0  ;;  %vm6814_vm9 = vcmp.ge.f32.partialorder %v6798_v2, 0.0  ;;  %vm6815_vm10 = vcmp.ge.f32.partialorder %v6799_v29, 0.0 }
 0x2e2   :  { %7974 = vst.msk [vmem:[%s12855_s8 + $0x170] sm:$0xff] %vm13160_vm15, %v6741_v24  ;;  %vm6816_vm11 = vcmp.ge.f32.partialorder %v6800_v6, 0.0  ;;  %vm6817_vm12 = vcmp.ge.f32.partialorder %v6801_v44, 0.0  ;;  %vm6818_vm13 = vcmp.ge.f32.partialorder %v6802_v13, 0.0  ;;  %vm6819_vm14 = vcmp.ge.f32.partialorder %v6803_v7, 0.0  ;;  %vm13161_vm15 = vmmov %vm13113_vm0 }
 0x2e3   :  { %7975 = vst.msk [vmem:[%s12855_s8 + $0x178] sm:$0xff] %vm13113_vm0, %v6742_v35  ;;  %v6823_v5 = vmul.f32 %v6791_v36, %v12193_v51  ;;  %v6824_v19 = vmul.f32 %v6792_v58, %v12193_v51  ;;  %v6825_v39 = vmul.f32 %v6793_v52, %v12193_v51  ;;  %v6826_v55 = vmul.f32 %v6794_v25, %v12193_v51 }
 0x2e4   :  { %v6827_v21 = vmul.f32 %v6795_v18, %v12193_v51  ;;  %v6828_v0 = vmul.f32 %v6796_v62, %v12193_v51  ;;  %v6829_v15 = vmul.f32 %v6797_v8, %v12193_v51  ;;  %v6830_v43 = vmul.f32 %v6798_v2, %v12193_v51 }
 0x2e5   :  { %v6831_v1 = vmul.f32 %v6799_v29, %v12193_v51  ;;  %v6832_v27 = vmul.f32 %v6800_v6, %v12193_v51  ;;  %v6833_v57 = vmul.f32 %v6801_v44, %v12193_v51  ;;  %v6834_v46 = vmul.f32 %v6802_v13, %v12193_v51 }
 0x2e6   :  { %v6835_v60 = vmul.f32 %v6803_v7, %v12193_v51  ;;  %v6836_v10 = vmul.f32 %v12158_v16, %v12193_v51  ;;  %v6837_v49 = vmul.f32 %v6805_v33, %v12193_v51  ;;  %v6838_v14 = vmul.f32 %v6806_v42, %v12193_v51 }
 0x2e7   :  { %v6839_v32 = vsel %vm6807_vm1, %v6791_v36, %v6823_v5  ;;  %v6840_v63 = vsel %vm6808_vm3, %v6792_v58, %v6824_v19  ;;  %v6841_v40 = vsel %vm6809_vm4, %v6793_v52, %v6825_v39  ;;  %v6842_v23 = vsel %vm6810_vm5, %v6794_v25, %v6826_v55  ;;  %vm13162_vm1 = vmmov %vm13113_vm0 }
 0x2e8   :  { %v6843_v34 = vsel %vm6811_vm6, %v6795_v18, %v6827_v21  ;;  %v6844_v24 = vsel %vm6812_vm7, %v6796_v62, %v6828_v0  ;;  %7992 = vst.msk [vmem:[%s12855_s8 + $0x180] sm:$0xff] %vm13113_vm0, %v6839_v32  ;;  %v6845_v51 = vsel %vm6813_vm8, %v6797_v8, %v6829_v15  ;;  %v6846_v41 = vsel %vm6814_vm9, %v6798_v2, %v6830_v43  ;;  %vm13163_vm3 = vmmov %vm13113_vm0 }
 0x2e9   :  { %7993 = vst.msk [vmem:[%s12855_s8 + $0x188] sm:$0xff] %vm13161_vm15, %v6840_v63  ;;  %v6847_v4 = vsel %vm6815_vm10, %v6799_v29, %v6831_v1  ;;  %v6848_v17 = vsel %vm6816_vm11, %v6800_v6, %v6832_v27  ;;  %vm13164_vm4 = vmmov %vm13113_vm0  ;;  %v6849_v35 = vsel %vm6817_vm12, %v6801_v44, %v6833_v57  ;;  %v6850_v47 = vsel %vm6818_vm13, %v6802_v13, %v6834_v46 }
 0x2ea   :  { %7994 = vst.msk [vmem:[%s12855_s8 + $0x190] sm:$0xff] %vm13162_vm1, %v6841_v40  ;;  %vm13165_vm5 = vmmov %vm13113_vm0  ;;  %v6851_v31 = vsel %vm6819_vm14, %v6803_v7, %v6835_v60  ;;  %v6852_v53 = vsel %vm6820_vm2, %v12158_v16, %v6836_v10  ;;  %vm13170_vm2 = vcmp.ge.f32.partialorder %v6805_v33, 0.0  ;;  %vm13171_vm10 = vcmp.ge.f32.partialorder %v6806_v42, 0.0 }
 0x2eb   :  { %7995 = vst.msk [vmem:[%s12855_s8 + $0x198] sm:$0xff] %vm13163_vm3, %v6842_v23  ;;  %vm13166_vm6 = vmmov %vm13113_vm0  ;;  %v6853_v16 = vsel %vm13170_vm2, %v6805_v33, %v6837_v49  ;;  %v6854_v11 = vsel %vm13171_vm10, %v6806_v42, %v6838_v14 }
 0x2ec   :  { %7996 = vst.msk [vmem:[%s12855_s8 + $0x1a0] sm:$0xff] %vm13164_vm4, %v6843_v34  ;;  %vm13167_vm7 = vmmov %vm13113_vm0 }
 0x2ed   :  { %7997 = vst.msk [vmem:[%s12855_s8 + $0x1a8] sm:$0xff] %vm13165_vm5, %v6844_v24  ;;  %vm13168_vm8 = vmmov %vm13113_vm0 }
 0x2ee   :  { %7998 = vst.msk [vmem:[%s12855_s8 + $0x1b0] sm:$0xff] %vm13166_vm6, %v6845_v51  ;;  %vm13169_vm9 = vmmov %vm13113_vm0 }
 0x2ef   :  { %7999 = vst.msk [vmem:[%s12855_s8 + $0x1b8] sm:$0xff] %vm13167_vm7, %v6846_v41  ;;  %vm13172_vm11 = vmmov %vm13113_vm0 }
 0x2f0   :  { %8000 = vst.msk [vmem:[%s12855_s8 + $0x1c0] sm:$0xff] %vm13168_vm8, %v6847_v4  ;;  %vm13173_vm12 = vmmov %vm13113_vm0 }
 0x2f1   :  { %8001 = vst.msk [vmem:[%s12855_s8 + $0x1c8] sm:$0xff] %vm13169_vm9, %v6848_v17  ;;  %vm13174_vm13 = vmmov %vm13113_vm0 }
 0x2f2   :  { %8002 = vst.msk [vmem:[%s12855_s8 + $0x1d0] sm:$0xff] %vm13172_vm11, %v6849_v35  ;;  %vm13175_vm14 = vmmov %vm13113_vm0 }
 0x2f3   :  { %8003 = vst.msk [vmem:[%s12855_s8 + $0x1d8] sm:$0xff] %vm13173_vm12, %v6850_v47  ;;  %vm13176_vm15 = vmmov %vm13113_vm0 }
 0x2f4   :  { %8004 = vst.msk [vmem:[%s12855_s8 + $0x1e0] sm:$0xff] %vm13174_vm13, %v6851_v31 }
 0x2f5   :  { %8005 = vst.msk [vmem:[%s12855_s8 + $0x1e8] sm:$0xff] %vm13175_vm14, %v6852_v53 }
 0x2f6   :  { %8006 = vst.msk [vmem:[%s12855_s8 + $0x1f0] sm:$0xff] %vm13176_vm15, %v6853_v16 }
 0x2f7   :  { %8007 = vst.msk [vmem:[%s12855_s8 + $0x1f8] sm:$0xff] %vm13113_vm0, %v6854_v11 }

</bundles_post_ra>
